<compile_context>
chip_gen: v7x
topology: tpu7x:2x2x1
jax: 0.10.0
libtpu: 0.0.40
codegen_flags: <defaults>
</compile_context>

<pallas_src>
import functools

import jax
import jax.numpy as jnp
from jax.experimental import pallas as pl
from jax.experimental.pallas import tpu as pltpu


_LANES = 128


def _round8(x):
    return ((x + 7) // 8) * 8


def _w_offsets(C):
    """Row offsets of each (pre-transposed) weight in the packed (rows,128) array."""
    C2 = C // 2
    sizes = [("proj", 3 * C + C2), ("g2", C), ("r1", C2), ("r2", C),
             ("o1", 2 * C), ("o2", C)]
    off, total = {}, 0
    for name, rows in sizes:
        off[name] = total
        total += _round8(rows)
    return off, total


def _encoder_attention_kernel(fg_ref, idx_ref, w_ref, b_ref, out_ref):
    # Static dims from block shapes.
    C = out_ref.shape[1]
    N = out_ref.shape[2]
    C2 = C // 2
    CG1 = fg_ref.shape[1]            # C + geo_dim + 1 (ones row for biases)
    KN = idx_ref.shape[2]
    K = KN // N
    FOUT = 3 * C + C2                # projection rows: [q | k | v | gh]
    P = 2 * C + C2                   # gathered payload rows: [k | v | gh]
    off, _ = _w_offsets(C)

    dot = functools.partial(jnp.dot, preferred_element_type=jnp.float32)

    fg = fg_ref[0]                                   # (C+G+1, N) channels-first
    f = fg[0:C, :]                                   # (C, N) residual feats

    # Fused projection  [q|k|v|gh] = W_proj @ [feats; geos; 1]
    # (geo_mlp layer-1 wg1 folded in; qkv biases ride the ones row).
    w_proj = w_ref[off["proj"]:off["proj"] + FOUT, 0:CG1]
    proj = dot(w_proj, fg)                           # (FOUT, N) f32
    q = proj[0:C, :]                                 # (C, N)
    gh_q = proj[3 * C:FOUT, :]                       # (C2, N)

    # Neighbor gather: single bf16 one-hot matmul picks k, v and gh for all K
    # neighbors at once, directly in the lane-dense (P, K*N) layout.
    # TODO(synk): replace the O(N^2*K) one-hot with a scalar-prefetched DMA /
    # dynamic row gather + query tiling for large N (v7x 64 MiB VMEM budget).
    idx_row = idx_ref[0]                             # (1, K*N) int32 neighbor ids
    iota_n = jax.lax.broadcasted_iota(jnp.int32, (N, KN), 0)
    sel = (iota_n == idx_row).astype(jnp.bfloat16)   # (N, K*N), exact 0/1 in bf16
    payload = proj[C:FOUT, :].astype(jnp.bfloat16)   # (P, N)
    gath = dot(payload, sel)                         # (P, K*N), f32 accumulate
    g3 = gath.reshape(P, K, N)
    knn_k = g3[0:C]                                  # (C,  K, N)
    knn_v = g3[C:2 * C]                              # (C,  K, N)
    knn_gh = g3[2 * C:P]                             # (C2, K, N)

    # geo_mlp layer 2 (layer 1 already applied inside the projection).
    geo_d = (gh_q[:, None, :] - knn_gh).reshape(C2, KN)
    geo_h = jnp.maximum(geo_d + b_ref[0:C2, 0:1], 0.0)            # (C2, K*N)
    w_g2 = w_ref[off["g2"]:off["g2"] + C, 0:C2]
    geo_emb = dot(w_g2, geo_h) + b_ref[0:C, 1:2]                  # (C, K*N)
    geo_emb3 = geo_emb.reshape(C, K, N)

    # rel_mlp (eval-mode BatchNorm2d folded into layer-1 weight/bias).
    rel = (q[:, None, :] - knn_k + geo_emb3).reshape(C, KN)
    w_r1 = w_ref[off["r1"]:off["r1"] + C2, 0:C]
    rel_h = jnp.maximum(dot(w_r1, rel) + b_ref[0:C2, 2:3], 0.0)   # (C2, K*N)
    w_r2 = w_ref[off["r2"]:off["r2"] + C, 0:C2]
    rel_out = (dot(w_r2, rel_h) + b_ref[0:C, 3:4]).reshape(C, K, N)

    # softmax over neighbors (PyTorch dim=-1 on (B, C, N, K)) + aggregation.
    # K-reductions are cheap sublane reductions in this layout.
    m = jnp.max(rel_out, axis=1, keepdims=True)                   # (C, 1, N)
    e = jnp.exp(rel_out - m)                                      # (C, K, N)
    s = jnp.sum(e, axis=1)                                        # (C, N)
    wv = jnp.sum(e * (knn_v + geo_emb3), axis=1)                  # (C, N)
    agg = wv * pl.reciprocal(s, approx=True) + f                  # (C, N)

    # out_conv (BNs are Identity since encoder_bn=False) + residual.
    w_o1 = w_ref[off["o1"]:off["o1"] + 2 * C, 0:C]
    oh = jnp.maximum(dot(w_o1, agg) + b_ref[0:2 * C, 4:5], 0.0)   # (2C, N)
    w_o2 = w_ref[off["o2"]:off["o2"] + C, 0:2 * C]
    o2 = dot(w_o2, oh) + b_ref[0:C, 5:6]                          # (C, N)

    out_ref[0] = o2 + agg            # already (C, N): lane-dense, no transpose


def init_params(key, C, G):
    C2 = C // 2
    keys = jax.random.split(key, 22)

    def w(k, shape, scale=0.1):
        return scale * jax.random.normal(k, shape, dtype=jnp.float32)

    p = {}
    p["wq"], p["bq"] = w(keys[0], (C, C)), w(keys[1], (1, C))
    p["wk"], p["bk"] = w(keys[2], (C, C)), w(keys[3], (1, C))
    p["wv"], p["bv"] = w(keys[4], (C, C)), w(keys[5], (1, C))
    p["wg1"], p["bg1"] = w(keys[6], (G, C2)), w(keys[7], (1, C2))
    p["wg2"], p["bg2"] = w(keys[8], (C2, C)), w(keys[9], (1, C))
    p["wr1"], p["br1"] = w(keys[10], (C, C2)), w(keys[11], (1, C2))
    p["wr2"], p["br2"] = w(keys[12], (C2, C)), w(keys[13], (1, C))
    p["wo1"], p["bo1"] = w(keys[14], (C, 2 * C)), w(keys[15], (1, 2 * C))
    p["wo2"], p["bo2"] = w(keys[16], (2 * C, C)), w(keys[17], (1, C))
    # rel_mlp's BatchNorm2d, eval mode, folded to per-channel scale/shift.
    gamma = 1.0 + w(keys[18], (1, C2))
    beta = w(keys[19], (1, C2))
    mean = w(keys[20], (1, C2))
    var = 1.0 + jnp.abs(w(keys[21], (1, C2)))
    eps = 1e-5
    p["bns"] = gamma / jnp.sqrt(var + eps)
    p["bnb"] = beta - mean * p["bns"]
    return p


def pack_params(p, C, G):
    """Pack all (pre-transposed) weights and bias columns into 2 arrays."""
    C2 = C // 2
    FOUT = 3 * C + C2
    CG1 = C + G + 1
    assert FOUT <= _LANES and 2 * C <= _LANES and CG1 <= _LANES
    off, total = _w_offsets(C)

    # Projection block: [q|k|v|gh] = W_proj @ [feats; geos; 1].
    w_proj = jnp.zeros((FOUT, CG1), jnp.float32)
    w_proj = w_proj.at[0:C, 0:C].set(p["wq"].T)
    w_proj = w_proj.at[C:2 * C, 0:C].set(p["wk"].T)
    w_proj = w_proj.at[2 * C:3 * C, 0:C].set(p["wv"].T)
    w_proj = w_proj.at[3 * C:FOUT, C:C + G].set(p["wg1"].T)      # wg1 fold
    qkv_bias = jnp.concatenate([p["bq"], p["bk"], p["bv"]], axis=1)   # (1, 3C)
    w_proj = w_proj.at[0:3 * C, C + G:C + G + 1].set(qkv_bias.T)

    # Fold rel_mlp's eval-mode BatchNorm2d into its first conv.
    wr1f = p["wr1"] * p["bns"]
    br1f = p["br1"] * p["bns"] + p["bnb"]

    W = jnp.zeros((total, _LANES), jnp.float32)

    def put(arr, name, mat):
        r0 = off[name]
        return arr.at[r0:r0 + mat.shape[0], 0:mat.shape[1]].set(mat)

    W = put(W, "proj", w_proj)
    W = put(W, "g2", p["wg2"].T)
    W = put(W, "r1", wr1f.T)
    W = put(W, "r2", p["wr2"].T)
    W = put(W, "o1", p["wo1"].T)
    W = put(W, "o2", p["wo2"].T)

    # Per-channel bias columns (channels-first layout adds them as columns).
    Bc = jnp.zeros((2 * C, 8), jnp.float32)
    Bc = Bc.at[0:C2, 0:1].set(p["bg1"].T)
    Bc = Bc.at[0:C, 1:2].set(p["bg2"].T)
    Bc = Bc.at[0:C2, 2:3].set(br1f.T)
    Bc = Bc.at[0:C, 3:4].set(p["br2"].T)
    Bc = Bc.at[0:2 * C, 4:5].set(p["bo1"].T)
    Bc = Bc.at[0:C, 5:6].set(p["bo2"].T)
    return W, Bc


def _knn_idx(geos_nc, k_neighbors):
    # pairwise squared distance + top-k smallest (includes the point itself)
    d = jnp.sum((geos_nc[:, :, None, :] - geos_nc[:, None, :, :]) ** 2, axis=-1)
    _, idx = jax.lax.top_k(-d, k_neighbors)
    return idx.astype(jnp.int32)


def encoder_attention(pts, feats, params, k_neighbors):
    """pts: (B, 3, N), feats: (B, C, N)  -> out: (B, C, N)   (PyTorch layout)."""
    B, C, N = feats.shape
    G = pts.shape[1]
    K = k_neighbors
    C2 = C // 2
    KN = K * N
    FOUT = 3 * C + C2
    P = 2 * C + C2

    feats32 = feats.astype(jnp.float32)
    pts32 = pts.astype(jnp.float32)
    ones = jnp.ones((B, 1, N), jnp.float32)
    fg = jnp.concatenate([feats32, pts32, ones], axis=1)          # (B, C+G+1, N)

    # TODO(synk): k-nearest-neighbor top-k selection has no clean Pallas
    # equivalent; computed in plain JAX glue (jax.lax.top_k).
    geos_nc = jnp.transpose(pts32, (0, 2, 1))                     # (B, N, G)
    knn_idx = _knn_idx(geos_nc, K)                                # (B, N, K)
    idx_kn = jnp.transpose(knn_idx, (0, 2, 1)).reshape(B, 1, KN)  # (B, 1, K*N)

    wpack, bpack = pack_params(params, C, G)

    flops = 2 * B * (
        FOUT * (C + G + 1) * N        # fused projection
        + P * N * KN                  # one-hot neighbor gather
        + C * C2 * KN                 # geo_mlp layer 2
        + C2 * C * KN                 # rel_mlp layer 1
        + C * C2 * KN                 # rel_mlp layer 2
        + 2 * C * C * N               # out_conv layer 1
        + 2 * C * C * N)              # out_conv layer 2
    cost = pl.CostEstimate(
        flops=flops,
        transcendentals=B * (C * KN + C * N),
        bytes_accessed=4 * (fg.size + idx_kn.size + wpack.size + bpack.size
                            + B * C * N))

    in_specs = [
        pl.BlockSpec((1, C + G + 1, N), lambda b: (b, 0, 0)),
        pl.BlockSpec((1, 1, KN), lambda b: (b, 0, 0)),
        pl.BlockSpec(wpack.shape, lambda b: (0, 0)),
        pl.BlockSpec(bpack.shape, lambda b: (0, 0)),
    ]

    out = pl.pallas_call(
        _encoder_attention_kernel,
        out_shape=jax.ShapeDtypeStruct((B, C, N), jnp.float32),
        grid_spec=pltpu.PrefetchScalarGridSpec(
            num_scalar_prefetch=0,
            grid=(B,),
            in_specs=in_specs,
            out_specs=pl.BlockSpec((1, C, N), lambda b: (b, 0, 0)),
        ),
        compiler_params=pltpu.CompilerParams(
            dimension_semantics=("parallel",)),
        cost_estimate=cost,
    )(fg, idx_kn, wpack, bpack)
    return out


def reference_forward(pts, feats, params, k_neighbors):
    """Pure-JAX reference with identical math (for correctness check)."""
    p = params
    feats_nc = jnp.transpose(feats, (0, 2, 1)).astype(jnp.float32)
    geos_nc = jnp.transpose(pts, (0, 2, 1)).astype(jnp.float32)
    knn_idx = _knn_idx(geos_nc, k_neighbors)

    def one(f, g, idx):
        q = f @ p["wq"] + p["bq"][0]
        k = f @ p["wk"] + p["bk"][0]
        v = f @ p["wv"] + p["bv"][0]
        knn_k, knn_v, knn_g = k[idx], v[idx], g[idx]
        geo_diff = g[:, None, :] - knn_g
        gh = jnp.maximum(geo_diff @ p["wg1"] + p["bg1"][0], 0.0)
        ge = gh @ p["wg2"] + p["bg2"][0]
        rel = q[:, None, :] - knn_k + ge
        rh = rel @ p["wr1"] + p["br1"][0]
        rh = jnp.maximum(rh * p["bns"][0] + p["bnb"][0], 0.0)
        ro = rh @ p["wr2"] + p["br2"][0]
        m = jnp.max(ro, axis=1, keepdims=True)
        e = jnp.exp(ro - m)
        attn = e / jnp.sum(e, axis=1, keepdims=True)
        agg = jnp.sum(attn * (knn_v + ge), axis=1) + f
        oh = jnp.maximum(agg @ p["wo1"] + p["bo1"][0], 0.0)
        o2 = oh @ p["wo2"] + p["bo2"][0]
        return o2 + agg

    out_nc = jax.vmap(one)(feats_nc, geos_nc, knn_idx)
    return jnp.transpose(out_nc, (0, 2, 1))


if __name__ == "__main__":
    # batch, encoder_dim, num points, cfgs.k, geo_dim
    B, C, N, K, G = 2, 32, 128, 8, 3

    key = jax.random.PRNGKey(0)
    kp, kpts, kfeat = jax.random.split(key, 3)
    params = init_params(kp, C, G)
    pts = jax.random.normal(kpts, (B, G, N), dtype=jnp.float32)
    feats = jax.random.normal(kfeat, (B, C, N), dtype=jnp.float32)

    out = encoder_attention(pts, feats, params, K)
    out = jax.block_until_ready(out)

    ref = reference_forward(pts, feats, params, K)
    assert out.shape == (B, C, N), out.shape
    max_err = float(jnp.max(jnp.abs(out - ref)))
    assert max_err < 5e-2, f"max abs err {max_err}"

    print("KERNEL_OK")
</pallas_src>

<mosaic_0001>
module attributes {stable_mosaic.version = 11 : i64} {
  func.func @_encoder_attention_kernel(%arg0: i32, %arg1: memref<1x36x128xf32, #tpu.memory_space<vmem>>, %arg2: memref<1x1x1024xi32, #tpu.memory_space<vmem>>, %arg3: memref<288x128xf32, #tpu.memory_space<vmem>>, %arg4: memref<64x8xf32, #tpu.memory_space<vmem>>, %arg5: memref<1x32x128xf32, #tpu.memory_space<vmem>>) attributes {dimension_semantics = [#tpu.dimension_semantics<parallel>], iteration_bounds = array<i64: 2>, scalar_prefetch = 0 : i64, scratch_operands = 0 : i64, tpu.core_type = #tpu.core_type<tc>, window_params = [{transform_indices = @transform_0, window_bounds = array<i64: 1, 36, 128>}, {transform_indices = @transform_1, window_bounds = array<i64: 1, 1, 1024>}, {pipeline_mode = #tpu.pipeline_mode<synchronous>, transform_indices = @transform_2, window_bounds = array<i64: 288, 128>}, {pipeline_mode = #tpu.pipeline_mode<synchronous>, transform_indices = @transform_3, window_bounds = array<i64: 64, 8>}, {transform_indices = @transform_4, window_bounds = array<i64: 1, 32, 128>}]} {
    %c0 = arith.constant 0 : index
    %c0_0 = arith.constant 0 : index
    %c0_1 = arith.constant 0 : index
    %0 = vector.load %arg1[%c0, %c0_0, %c0_1] : memref<1x36x128xf32, #tpu.memory_space<vmem>>, vector<1x36x128xf32>
    %1 = vector.shape_cast %0 : vector<1x36x128xf32> to vector<36x128xf32>
    %2 = vector.extract_strided_slice %1 {offsets = [0, 0], sizes = [32, 128], strides = [1, 1]} : vector<36x128xf32> to vector<32x128xf32>
    %c0_2 = arith.constant 0 : index
    %c0_3 = arith.constant 0 : index
    %3 = vector.load %arg3[%c0_2, %c0_3] : memref<288x128xf32, #tpu.memory_space<vmem>>, vector<112x36xf32>
    %cst = arith.constant dense<0.000000e+00> : vector<112x128xf32>
    %4 = tpu.matmul %3, %1, %cst {dimension_numbers = #tpu.dot_dimension_numbers<[1], [0], [0], [1], [0, 0, 1, 1], [], []>} : vector<112x36xf32>, vector<36x128xf32>, vector<112x128xf32> -> vector<112x128xf32>
    %5 = vector.extract_strided_slice %4 {offsets = [0, 0], sizes = [32, 128], strides = [1, 1]} : vector<112x128xf32> to vector<32x128xf32>
    %6 = vector.extract_strided_slice %4 {offsets = [96, 0], sizes = [16, 128], strides = [1, 1]} : vector<112x128xf32> to vector<16x128xf32>
    %c0_4 = arith.constant 0 : index
    %c0_5 = arith.constant 0 : index
    %c0_6 = arith.constant 0 : index
    %7 = vector.load %arg2[%c0_4, %c0_5, %c0_6] : memref<1x1x1024xi32, #tpu.memory_space<vmem>>, vector<1x1x1024xi32>
    %8 = vector.shape_cast %7 : vector<1x1x1024xi32> to vector<1x1024xi32>
    %9 = tpu.iota {dimensions = array<i32: 0>} : vector<128x1024xi32>
    %10 = vector.broadcast %8 : vector<1x1024xi32> to vector<128x1024xi32>
    %11 = arith.cmpi eq, %9, %10 : vector<128x1024xi32>
    %12 = arith.extui %11 : vector<128x1024xi1> to vector<128x1024xi32>
    %13 = arith.sitofp %12 : vector<128x1024xi32> to vector<128x1024xf32>
    %14 = arith.truncf %13 : vector<128x1024xf32> to vector<128x1024xbf16>
    %15 = vector.extract_strided_slice %4 {offsets = [32, 0], sizes = [80, 128], strides = [1, 1]} : vector<112x128xf32> to vector<80x128xf32>
    %16 = arith.truncf %15 : vector<80x128xf32> to vector<80x128xbf16>
    %cst_7 = arith.constant dense<0.000000e+00> : vector<80x1024xf32>
    %17 = tpu.matmul %16, %14, %cst_7 {dimension_numbers = #tpu.dot_dimension_numbers<[1], [0], [0], [1], [0, 0, 1, 1], [], []>} : vector<80x128xbf16>, vector<128x1024xbf16>, vector<80x1024xf32> -> vector<80x1024xf32>
    %18 = vector.shape_cast %17 : vector<80x1024xf32> to vector<80x8x128xf32>
    %19 = vector.extract_strided_slice %18 {offsets = [0, 0, 0], sizes = [32, 8, 128], strides = [1, 1, 1]} : vector<80x8x128xf32> to vector<32x8x128xf32>
    %20 = vector.extract_strided_slice %18 {offsets = [32, 0, 0], sizes = [32, 8, 128], strides = [1, 1, 1]} : vector<80x8x128xf32> to vector<32x8x128xf32>
    %21 = vector.extract_strided_slice %18 {offsets = [64, 0, 0], sizes = [16, 8, 128], strides = [1, 1, 1]} : vector<80x8x128xf32> to vector<16x8x128xf32>
    %22 = vector.shape_cast %6 : vector<16x128xf32> to vector<16x1x128xf32>
    %23 = vector.broadcast %22 : vector<16x1x128xf32> to vector<16x8x128xf32>
    %24 = arith.subf %23, %21 : vector<16x8x128xf32>
    %25 = vector.shape_cast %24 : vector<16x8x128xf32> to vector<16x1024xf32>
    %c0_8 = arith.constant 0 : index
    %c0_9 = arith.constant 0 : index
    %26 = vector.load %arg4[%c0_8, %c0_9] : memref<64x8xf32, #tpu.memory_space<vmem>>, vector<16x1xf32>
    %27 = vector.broadcast %26 : vector<16x1xf32> to vector<16x1024xf32>
    %28 = arith.addf %25, %27 : vector<16x1024xf32>
    %cst_10 = arith.constant 0.000000e+00 : f32
    %29 = vector.broadcast %cst_10 : f32 to vector<16x1024xf32>
    %30 = arith.maximumf %28, %29 : vector<16x1024xf32>
    %c112 = arith.constant 112 : index
    %c0_11 = arith.constant 0 : index
    %31 = vector.load %arg3[%c112, %c0_11] : memref<288x128xf32, #tpu.memory_space<vmem>>, vector<32x16xf32>
    %cst_12 = arith.constant dense<0.000000e+00> : vector<32x1024xf32>
    %32 = tpu.matmul %31, %30, %cst_12 {dimension_numbers = #tpu.dot_dimension_numbers<[1], [0], [0], [1], [0, 0, 1, 1], [], []>} : vector<32x16xf32>, vector<16x1024xf32>, vector<32x1024xf32> -> vector<32x1024xf32>
    %c0_13 = arith.constant 0 : index
    %c1 = arith.constant 1 : index
    %33 = vector.load %arg4[%c0_13, %c1] : memref<64x8xf32, #tpu.memory_space<vmem>>, vector<32x1xf32>
    %34 = vector.broadcast %33 : vector<32x1xf32> to vector<32x1024xf32>
    %35 = arith.addf %32, %34 : vector<32x1024xf32>
    %36 = vector.shape_cast %35 : vector<32x1024xf32> to vector<32x8x128xf32>
    %37 = vector.shape_cast %5 : vector<32x128xf32> to vector<32x1x128xf32>
    %38 = vector.broadcast %37 : vector<32x1x128xf32> to vector<32x8x128xf32>
    %39 = arith.subf %38, %19 : vector<32x8x128xf32>
    %40 = arith.addf %39, %36 : vector<32x8x128xf32>
    %41 = vector.shape_cast %40 : vector<32x8x128xf32> to vector<32x1024xf32>
    %c144 = arith.constant 144 : index
    %c0_14 = arith.constant 0 : index
    %42 = vector.load %arg3[%c144, %c0_14] : memref<288x128xf32, #tpu.memory_space<vmem>>, vector<16x32xf32>
    %cst_15 = arith.constant dense<0.000000e+00> : vector<16x1024xf32>
    %43 = tpu.matmul %42, %41, %cst_15 {dimension_numbers = #tpu.dot_dimension_numbers<[1], [0], [0], [1], [0, 0, 1, 1], [], []>} : vector<16x32xf32>, vector<32x1024xf32>, vector<16x1024xf32> -> vector<16x1024xf32>
    %c0_16 = arith.constant 0 : index
    %c2 = arith.constant 2 : index
    %44 = vector.load %arg4[%c0_16, %c2] : memref<64x8xf32, #tpu.memory_space<vmem>>, vector<16x1xf32>
    %45 = vector.broadcast %44 : vector<16x1xf32> to vector<16x1024xf32>
    %46 = arith.addf %43, %45 : vector<16x1024xf32>
    %cst_17 = arith.constant 0.000000e+00 : f32
    %47 = vector.broadcast %cst_17 : f32 to vector<16x1024xf32>
    %48 = arith.maximumf %46, %47 : vector<16x1024xf32>
    %c160 = arith.constant 160 : index
    %c0_18 = arith.constant 0 : index
    %49 = vector.load %arg3[%c160, %c0_18] : memref<288x128xf32, #tpu.memory_space<vmem>>, vector<32x16xf32>
    %cst_19 = arith.constant dense<0.000000e+00> : vector<32x1024xf32>
    %50 = tpu.matmul %49, %48, %cst_19 {dimension_numbers = #tpu.dot_dimension_numbers<[1], [0], [0], [1], [0, 0, 1, 1], [], []>} : vector<32x16xf32>, vector<16x1024xf32>, vector<32x1024xf32> -> vector<32x1024xf32>
    %c0_20 = arith.constant 0 : index
    %c3 = arith.constant 3 : index
    %51 = vector.load %arg4[%c0_20, %c3] : memref<64x8xf32, #tpu.memory_space<vmem>>, vector<32x1xf32>
    %52 = vector.broadcast %51 : vector<32x1xf32> to vector<32x1024xf32>
    %53 = arith.addf %50, %52 : vector<32x1024xf32>
    %54 = vector.shape_cast %53 : vector<32x1024xf32> to vector<32x8x128xf32>
    %cst_21 = arith.constant dense<0xFF800000> : vector<32x128xf32>
    %55 = vector.multi_reduction <maximumf>, %54, %cst_21 [1] : vector<32x8x128xf32> to vector<32x128xf32>
    %56 = vector.shape_cast %55 : vector<32x128xf32> to vector<32x1x128xf32>
    %57 = vector.broadcast %56 : vector<32x1x128xf32> to vector<32x8x128xf32>
    %58 = arith.subf %54, %57 : vector<32x8x128xf32>
    %59 = math.exp %58 : vector<32x8x128xf32>
    %cst_22 = arith.constant dense<0.000000e+00> : vector<32x128xf32>
    %60 = vector.multi_reduction <add>, %59, %cst_22 [1] : vector<32x8x128xf32> to vector<32x128xf32>
    %61 = arith.addf %20, %36 : vector<32x8x128xf32>
    %62 = arith.mulf %59, %61 : vector<32x8x128xf32>
    %cst_23 = arith.constant dense<0.000000e+00> : vector<32x128xf32>
    %63 = vector.multi_reduction <add>, %62, %cst_23 [1] : vector<32x8x128xf32> to vector<32x128xf32>
    %64 = tpu.reciprocal %60 {approx = true} : vector<32x128xf32> -> vector<32x128xf32>
    %65 = arith.mulf %63, %64 : vector<32x128xf32>
    %66 = arith.addf %65, %2 : vector<32x128xf32>
    %c192 = arith.constant 192 : index
    %c0_24 = arith.constant 0 : index
    %67 = vector.load %arg3[%c192, %c0_24] : memref<288x128xf32, #tpu.memory_space<vmem>>, vector<64x32xf32>
    %cst_25 = arith.constant dense<0.000000e+00> : vector<64x128xf32>
    %68 = tpu.matmul %67, %66, %cst_25 {dimension_numbers = #tpu.dot_dimension_numbers<[1], [0], [0], [1], [0, 0, 1, 1], [], []>} : vector<64x32xf32>, vector<32x128xf32>, vector<64x128xf32> -> vector<64x128xf32>
    %c0_26 = arith.constant 0 : index
    %c4 = arith.constant 4 : index
    %69 = vector.load %arg4[%c0_26, %c4] : memref<64x8xf32, #tpu.memory_space<vmem>>, vector<64x1xf32>
    %70 = vector.broadcast %69 : vector<64x1xf32> to vector<64x128xf32>
    %71 = arith.addf %68, %70 : vector<64x128xf32>
    %cst_27 = arith.constant 0.000000e+00 : f32
    %72 = vector.broadcast %cst_27 : f32 to vector<64x128xf32>
    %73 = arith.maximumf %71, %72 : vector<64x128xf32>
    %c256 = arith.constant 256 : index
    %c0_28 = arith.constant 0 : index
    %74 = vector.load %arg3[%c256, %c0_28] : memref<288x128xf32, #tpu.memory_space<vmem>>, vector<32x64xf32>
    %cst_29 = arith.constant dense<0.000000e+00> : vector<32x128xf32>
    %75 = tpu.matmul %74, %73, %cst_29 {dimension_numbers = #tpu.dot_dimension_numbers<[1], [0], [0], [1], [0, 0, 1, 1], [], []>} : vector<32x64xf32>, vector<64x128xf32>, vector<32x128xf32> -> vector<32x128xf32>
    %c0_30 = arith.constant 0 : index
    %c5 = arith.constant 5 : index
    %76 = vector.load %arg4[%c0_30, %c5] : memref<64x8xf32, #tpu.memory_space<vmem>>, vector<32x1xf32>
    %77 = vector.broadcast %76 : vector<32x1xf32> to vector<32x128xf32>
    %78 = arith.addf %75, %77 : vector<32x128xf32>
    %79 = arith.addf %78, %66 : vector<32x128xf32>
    %c0_31 = arith.constant 0 : index
    %c0_32 = arith.constant 0 : index
    %c0_33 = arith.constant 0 : index
    %80 = vector.load %arg5[%c0_31, %c0_32, %c0_33] : memref<1x32x128xf32, #tpu.memory_space<vmem>>, vector<1x32x128xf32>
    %81 = vector.shape_cast %80 : vector<1x32x128xf32> to vector<32x128xf32>
    %82 = vector.shape_cast %79 : vector<32x128xf32> to vector<1x32x128xf32>
    tpu.vector_store %arg5[%c0_31, %c0_32, %c0_33], %82 {strides = array<i32>} : memref<1x32x128xf32, #tpu.memory_space<vmem>>, vector<1x32x128xf32>,
    return
  }
  func.func @transform_0(%arg0: i32) -> (i32, i32, i32) {
    %c0_i32 = arith.constant 0 : i32
    %c0_i32_0 = arith.constant 0 : i32
    %c0_i32_1 = arith.constant 0 : i32
    return %arg0, %c0_i32, %c0_i32_0 : i32, i32, i32
  }
  func.func @transform_1(%arg0: i32) -> (i32, i32, i32) {
    %c0_i32 = arith.constant 0 : i32
    %c0_i32_0 = arith.constant 0 : i32
    %c0_i32_1 = arith.constant 0 : i32
    return %arg0, %c0_i32, %c0_i32_0 : i32, i32, i32
  }
  func.func @transform_2(%arg0: i32) -> (i32, i32) {
    %c0_i32 = arith.constant 0 : i32
    %c0_i32_0 = arith.constant 0 : i32
    %c0_i32_1 = arith.constant 0 : i32
    return %c0_i32, %c0_i32_0 : i32, i32
  }
  func.func @transform_3(%arg0: i32) -> (i32, i32) {
    %c0_i32 = arith.constant 0 : i32
    %c0_i32_0 = arith.constant 0 : i32
    %c0_i32_1 = arith.constant 0 : i32
    return %c0_i32, %c0_i32_0 : i32, i32
  }
  func.func @transform_4(%arg0: i32) -> (i32, i32, i32) {
    %c0_i32 = arith.constant 0 : i32
    %c0_i32_0 = arith.constant 0 : i32
    %c0_i32_1 = arith.constant 0 : i32
    return %arg0, %c0_i32, %c0_i32_0 : i32, i32, i32
  }
}

</mosaic_0001>

<bundles_post_ra>
// kernel: tpu_custom_call.1
= control target key start
LH: loop header
LB: loop body
LE: loop exit
PB: predicated region body
PF: predicated region fallthrough
CT: control target
= control target key end

     0   :  { %9 = vsyncpa [#allocation3], 0  ;;  %s12555_s0 = inlined_call_operand.vmem [shape: f32[2,36,128], index: 0, kind: input, shape index: {}]   ;;  %s12556_s1 = inlined_call_operand.vmem [shape: s32[2,1,1024], index: 1, kind: input, shape index: {}]   ;;  %s12557_s2 = inlined_call_operand.hbm [shape: f32[288,128], index: 2, kind: input, shape index: {}]   ;;  %s12558_s3 = inlined_call_operand.vmem [shape: f32[64,8], index: 3, kind: input, shape index: {}]   ;;  %s12559_s4 = inlined_call_operand.hbm [shape: f32[2,32,128], index: 4, kind: output, shape index: {}]  }
   0x1   :  { %10 = vsyncpa [#allocation4], 0 }
   0x2   :  { %12 = vsyncpa [#allocation4 + $0x1], 0  ;;  %s8652_s15 = smov 0   ;;  %s8654_s16 = smov 0  }
   0x3   :  { %s8656_s17 = smov 0   ;;  %s8658_s18 = smov 0  }
   0x4 LB: > { %s8673_s19 = sadd.s32 4294967295, %s8608_s18   ;;  %s7753_s20 = sadd.s32 4294967294, %s8608_s18   ;;  %s8608_s18 = sphi %s8658_s18, %s13105_s18   ;;  %s8604_s17 = sphi %s8656_s17, %s13104_s17   ;;  %s8600_s16 = sphi %s8654_s16, %s13103_s16   ;;  %s8596_s15 = sphi %s8652_s15, %s13102_s15  }
   0x5   : > { %s8677_s21 = sadd.s32 1, %s8608_s18   ;;  %s119_s22 = sadd.s32 1, %s8604_s17 }
   0x6   : > { %s116_s23 = ssub.s32 %s8608_s18, %s8677_s21  ;;  %p129_p0 = scmp.ne.s32.totalorder %s8604_s17, %s8600_s16 }
   0x7   : > { %p117_p1 = scmp.eq.s32.totalorder %s116_s23, 0  ;;  %p130_p2 = scmp.eq.s32.totalorder %s8673_s19, 1 }
   0x8   : > { %p135_p3 = scmp.ne.s32.totalorder %s8600_s16, %s8596_s15  ;;  %p136_p4 = scmp.eq.s32.totalorder %s7753_s20, 1 }
   0x9   : > { %s8688_s24 = scalar_select %p117_p1, %s8604_s17, %s119_s22  }
   0xa   : > { %p8690_p5 = por %p130_p2, %p129_p0  ;;  %p8694_p6 = por %p136_p4, %p135_p3 }
   0xb   : > { %p7754_p7 = scmp.ge.s32.totalorder %s8608_s18, 1  ;;  %p143_p8 = scmp.lt.s32.totalorder %s8608_s18, 3 }
   0xc   : > { %s12659_s25 = scalar_select %p8690_p5, 1, 0 }
   0xd   : > { %s12660_s26 = scalar_select %p8694_p6, 1, 0 }
   0xe   : > { %p12560_p9 = scmp.eq.s32.totalorder %s8673_s19, 0  ;;  %p8701_p10 = pnand %p7754_p7, %p143_p8 }
   0xf   : > { %s8610_s28 = smov [#allocation2]   ;;  %s8514_s7 = scalar_lea.hbm %s12557_s2, 4608 }
  0x10   : > { %s12661_s27 = scalar_select %p8701_p10, 1, 0 }
  0x11   : > { %s155_s29 = sshll.u32 %s8610_s28, 4  ;;  %p8310_p11 = pneg %p8701_p10  ;;  %s156_s29 = int_to_ptr.vmem [resolvable:$true] %s155_s29 }
  0x12   : > { %p8515_p13 = scmp.ne.s32.totalorder %s12557_s2, %s8514_s7  ;;  %p8521_p3 = scmp.lt.u32.totalorder %s8514_s7, %s12557_s2 }
  0x13   : > { %p8709_p12 = pnand %p12560_p9, %p8310_p11 }
  0x15   : > { %p8516_p0 = pneg %p8709_p12 }
  0x17   : > { %p8517_p1 = pnand %p8516_p0, %p8515_p13 }
  0x19   : > { %p8518_p2 = pneg %p8517_p1 }
  0x1b   : > { %p8523_p4 = pnand %p8521_p3, %p8518_p2 }
  0x1d   : > { %8526 = shalt.err (!%p8523_p4)
}
  0x1e   : > { %s8527_s12 = scalar_lea.vmem %s156_s29, 4608  ;;  %p8535_p9 = scmp.lt.s32.totalorder %s156_s29, %s156_s29 }
  0x1f   : > { %p8528_p7 = scmp.ne.s32.totalorder %s156_s29, %s8527_s12  ;;  %p8536_p6 = scmp.lt.s32.totalorder %s8527_s12, %s8527_s12 }
  0x21   : > { %p8530_p8 = pnand %p8528_p7, %p8516_p0  ;;  %p8537_p5 = por %p8536_p6, %p8535_p9 }
  0x23   : > { %p8531_p11 = pneg %p8530_p8 }
  0x25   : > { %p8538_p10 = pnand %p8537_p5, %p8531_p11 }
  0x27   : > { %8541 = shalt.err (!%p8538_p10)
}
  0x28   : > { %s8611_s13 = smov 128   ;;  %s8612_s14 = smov 8  }
  0x29   : > { %8313 = dma.hbm_to_vmem [thread:$0]  (!%p8709_p12), %s12557_s2, 4608, %s156_s29, [#allocation3], %s8611_s13, %s8611_s13, %s8612_s14  }
  0x2a   : > { %p12663_p13 = scmp.ne.s32.totalorder %s12661_s27, 0 }
  0x2c   : > { %189 = sbr.rel (%p12663_p13) target bundleno = 2189 (0x88d), region = 36 }
  0x33   : > { %p12664_p1 = scmp.eq.s32.totalorder %s8673_s19, 0 }
  0x35   : > { %8587 = dma.done.wait (%p12664_p1), [#allocation3], 4608   ;;  %p12665_p0 = pmov %p12664_p1 }
  0x36   : > { %p219_p5 = scmp.lt.s32.totalorder %s8673_s19, 1  ;;  %v431_v0 = vlaneseq  ;;  %vm248_vm0 = vcmask 293888   ;;  %v234_v17 = vld [vmem:[#allocation2] sm:$0xff]  ;;  %vm291_vm7 = vcmask 1043456   ;;  %v8613_v22 = vmov 1.0|1.0  }
  0x37   : > { %8589 = vsyncadd (%p12665_p0), [#allocation3], 4294962688  ;;  %8144 = vmatprep.mubr.msk.f32.mxu0 %vm248_vm0, %v234_v17  ;;  %v235_v27 = vld [vmem:[#allocation2 + $0x8] sm:$0xff]  ;;  %v236_v28 = vld [vmem:[#allocation2 + $0x10] sm:$0xff]  ;;  %v8614_v61 = vmov 0   ;;  %s216_s22 = sand.u32 1, %s8600_s16  }
  0x38   : > { %s220_s23 = scalar_select %p219_p5, %s8673_s19, 1  ;;  %v8737_v1 = vshrl.u32 %v431_v0, 7  ;;  %v237_v34 = vld [vmem:[#allocation2 + $0x18] sm:$0xff]  ;;  %v238_v35 = vld [vmem:[#allocation2 + $0x20] sm:$0xff]  ;;  %v239_v40 = vld [vmem:[#allocation2 + $0x28] sm:$0xff]  ;;  %965 = vmatprep.mubr.bf16.mxu1 %v8614_v61  ;;  %8369 = vset.pattern.permute.xlu0 %v8614_v61 }
  0x39   : > { %v240_v41 = vld [vmem:[#allocation2 + $0x30] sm:$0xff]  ;;  %v241_v44 = vld [vmem:[#allocation2 + $0x38] sm:$0xff]  ;;  %v242_v45 = vld [vmem:[#allocation2 + $0x40] sm:$0xff]  ;;  %s8090_s27 = sshll.u32 %s8673_s19, 9  ;;  %s12514_s7 = scalar_lea.sflag [#allocation4], %s216_s22 }
  0x3a   : > { %s8303_s28 = smul.u32 40, %s220_s23  ;;  %s7761_s30 = sshll.u32 %s220_s23, 3  ;;  %v8740_v2 = vsub.s32 0, %v8737_v1  ;;  %v454_v3 = vsub.s32 1, %v8737_v1  ;;  %v458_v4 = vsub.s32 2, %v8737_v1  ;;  %v462_v5 = vsub.s32 3, %v8737_v1 }
  0x3b   : > { %s227_s5 = scalar_lea.vmem %s12556_s1, %s7761_s30  ;;  %v8758_v9 = vadd.s32 8, %v8737_v1  ;;  %v8779_v19 = vadd.s32 16, %v8737_v1  ;;  %v8782_v20 = vadd.s32 24, %v8737_v1  ;;  %v8809_v24 = vadd.s32 32, %v8737_v1  ;;  %v243_v46 = vld [vmem:[#allocation2 + $0x48] sm:$0xff]  ;;  %v244_v47 = vld [vmem:[#allocation2 + $0x50] sm:$0xff]  ;;  %s12512_s6 = scalar_lea.hbm %s12559_s4, %s8090_s27 }
  0x3c   : > { %s8751_s8 = scalar_lea.vmem %s12555_s0, %s8303_s28  ;;  %v8755_v8 = vld [vmem:[%s227_s5] sm:$0xff]  ;;  %v8812_v25 = vadd.s32 40, %v8737_v1  ;;  %v8848_v30 = vadd.s32 48, %v8737_v1  ;;  %v8851_v31 = vadd.s32 56, %v8737_v1  ;;  %v8912_v37 = vadd.s32 64, %v8737_v1  ;;  %v245_v48 = vld [vmem:[#allocation2 + $0x58] sm:$0xff] }
  0x3d   : > { %v229_v6 = vld [vmem:[%s8751_s8] sm:$0xff]  ;;  %v230_v7 = vld [vmem:[%s8751_s8 + $0x8] sm:$0xff]  ;;  %v8762_v11 = vrot.slane %v8755_v8, %v8740_v2  ;;  %v8765_v12 = vrot.slane %v8755_v8, %v454_v3  ;;  %v231_v13 = vld [vmem:[%s8751_s8 + $0x10] sm:$0xff]  ;;  %v8770_v15 = vrot.slane %v8755_v8, %v458_v4  ;;  %v8773_v16 = vrot.slane %v8755_v8, %v462_v5  ;;  %s7759_s23 = sshll.u32 %s216_s22, 5  ;;  %p13100_p9 = scmp.ne.s32.totalorder %s12659_s25, 0 }
  0x3e   : > { %v8207_v10 = vpack.c.bf16 %v230_v7, %v229_v6  ;;  %v232_v14 = vld [vmem:[%s8751_s8 + $0x18] sm:$0xff]  ;;  %v233_v21 = vld [vmem:[%s8751_s8 + $0x20] sm:$0xf]  ;;  %v8915_v38 = vadd.s32 72, %v8737_v1  ;;  %v247_v50 = vld [vmem:[#allocation2 + $0x68] sm:$0xff]  ;;  %v9010_v51 = vadd.s32 80, %v8737_v1 }
  0x3f   : > { %v8211_v18 = vpack.c.bf16 %v232_v14, %v231_v13  ;;  %vm481_vm1 = vcmp.eq.s32.totalorder %v8737_v1, %v8765_v12  ;;  %vm489_vm2 = vcmp.eq.s32.totalorder %v8758_v9, %v8765_v12  ;;  %vm483_vm3 = vcmp.eq.s32.totalorder %v8737_v1, %v8773_v16  ;;  %v246_v49 = vld [vmem:[#allocation2 + $0x60] sm:$0xff]  ;;  %s218_s28 = scalar_lea.vmem [#allocation5], %s7759_s23  ;;  %s8624_s9 = smov [#allocation5]  }
  0x40   : > { %8208 = vmatprep.subr.bf16.mxu0 %v8207_v10  ;;  %vm491_vm4 = vcmp.eq.s32.totalorder %v8758_v9, %v8773_v16  ;;  %vm480_vm5 = vcmp.eq.s32.totalorder %v8737_v1, %v8762_v11  ;;  %vm488_vm6 = vcmp.eq.s32.totalorder %v8758_v9, %v8762_v11  ;;  %vm7905_vm8 = vmpackc.low %vm489_vm2, %vm481_vm1  ;;  %vm482_vm9 = vcmp.eq.s32.totalorder %v8737_v1, %v8770_v15  ;;  %v3093_v17 = vld [vmem:[%s12558_s3] sm:$0xff]  ;;  %s7667_s30 = sshll.u32 %s218_s28, 4  ;;  %s8546_s10 = sshll.u32 %s8624_s9, 4  ;;  %s12505_s30 = int_to_ptr.vmem [resolvable:$true] %s7667_s30  ;;  %s8547_s10 = int_to_ptr.vmem [resolvable:$false] %s8546_s10 }
  0x41   : > { %8210 = vmatpush3.bf16.msra.mxu0 %v8207_v10  ;;  %vm490_vm10 = vcmp.eq.s32.totalorder %v8758_v9, %v8770_v15  ;;  %7906 = vmatprep.subr.msk.bf16.mxu1 %vm7905_vm8, %v8613_v22  ;;  %vm8800_vm11 = vmpackc.low %vm491_vm4, %vm483_vm3  ;;  %vm497_vm12 = vcmp.eq.s32.totalorder %v8779_v19, %v8765_v12  ;;  %vm505_vm13 = vcmp.eq.s32.totalorder %v8782_v20, %v8765_v12  ;;  %v9013_v52 = vadd.s32 88, %v8737_v1  ;;  %s8542_s19 = scalar_lea.vmem %s12505_s30, 512  ;;  %s8548_s11 = scalar_lea.vmem %s8547_s10, 1024 }
  0x42   : > { %8212 = vmatprep.subr.bf16.mxu0 %v8211_v18  ;;  %vm7907_vm14 = vmpackc.low %vm488_vm6, %vm480_vm5  ;;  %vm499_vm15 = vcmp.eq.s32.totalorder %v8779_v19, %v8773_v16  ;;  %vm507_vm1 = vcmp.eq.s32.totalorder %v8782_v20, %v8773_v16  ;;  %vm496_vm3 = vcmp.eq.s32.totalorder %v8779_v19, %v8762_v11  ;;  %vm504_vm4 = vcmp.eq.s32.totalorder %v8782_v20, %v8762_v11  ;;  %p8543_p6 = scmp.ne.s32.totalorder %s12505_s30, %s8542_s19  ;;  %p8549_p2 = scmp.lt.s32.totalorder %s12505_s30, %s8547_s10 }
  0x43   : > { %7908 = vmatpush1.bf16.msk.msra.mxu1 %vm7907_vm14, %v8613_v22  ;;  %vm8826_vm2 = vmpackc.low %vm490_vm10, %vm482_vm9  ;;  %vm498_vm6 = vcmp.eq.s32.totalorder %v8779_v19, %v8770_v15  ;;  %vm506_vm8 = vcmp.eq.s32.totalorder %v8782_v20, %v8770_v15  ;;  %vm513_vm10 = vcmp.eq.s32.totalorder %v8809_v24, %v8765_v12  ;;  %vm521_vm14 = vcmp.eq.s32.totalorder %v8812_v25, %v8765_v12  ;;  %p8550_p3 = scmp.lt.s32.totalorder %s8548_s11, %s8542_s19 }
  0x44   : > { %vm7909_vm5 = vmpackc.low %vm505_vm13, %vm497_vm12  ;;  %vm515_vm13 = vcmp.eq.s32.totalorder %v8809_v24, %v8773_v16  ;;  %v9036_v53 = vadd.s32 96, %v8737_v1  ;;  %v9039_v54 = vadd.s32 104, %v8737_v1  ;;  %v9060_v55 = vadd.s32 112, %v8737_v1  ;;  %3097 = vperm.xlu0 %8369, %v3093_v17   ;;  %p8544_p10 = pnand %p8543_p6, %p13100_p9 }
  0x45   : > { %8214 = vmatpush3.bf16.msra.mxu0 %v8211_v18  ;;  %7910 = vmatprep.subr.msk.bf16.mxu1 %vm7909_vm5, %v8613_v22  ;;  %vm8839_vm9 = vmpackc.low %vm507_vm1, %vm499_vm15  ;;  %vm523_vm15 = vcmp.eq.s32.totalorder %v8812_v25, %v8773_v16  ;;  %vm512_vm1 = vcmp.eq.s32.totalorder %v8809_v24, %v8762_v11  ;;  %vm522_vm5 = vcmp.eq.s32.totalorder %v8812_v25, %v8770_v15  ;;  %v9063_v56 = vadd.s32 120, %v8737_v1  ;;  %v3094_v18 = vld [vmem:[%s12558_s3 + $0x8] sm:$0xff]  ;;  %p8551_p4 = por %p8550_p3, %p8549_p2 }
  0x46   : > { %8142 = vmatprep.subr.msk.mxu0 %vm291_vm7, %v233_v21  ;;  %vm8854_vm12 = vmpackc.low %vm504_vm4, %vm496_vm3  ;;  %vm520_vm3 = vcmp.eq.s32.totalorder %v8812_v25, %v8762_v11  ;;  %vm514_vm4 = vcmp.eq.s32.totalorder %v8809_v24, %v8770_v15  ;;  %v470_v57 = vsub.s32 5, %v8737_v1  ;;  %v478_v58 = vsub.s32 7, %v8737_v1  ;;  %p8545_p12 = pneg %p8544_p10 }
  0x47   : > { %7912 = vmatpush1.bf16.msk.msra.mxu1 %vm8854_vm12, %v8613_v22  ;;  %vm8932_vm12 = vmpackc.low %vm522_vm5, %vm514_vm4  ;;  %vm545_vm4 = vcmp.eq.s32.totalorder %v8912_v37, %v8765_v12  ;;  %vm553_vm5 = vcmp.eq.s32.totalorder %v8915_v38, %v8765_v12  ;;  %v466_v62 = vsub.s32 4, %v8737_v1  ;;  %v474_v63 = vsub.s32 6, %v8737_v1 }
  0x48   : > { %v9087_v59 = vrot.slane %v8755_v8, %v470_v57  ;;  %v9090_v60 = vrot.slane %v8755_v8, %v478_v58  ;;  %v12686_v5 = vmov 0  ;;  %v12688_v6 = vmov 0  ;;  %3102 = vperm.xlu0 %8369, %v3094_v18   ;;  %p8552_p7 = pnand %p8551_p4, %p8545_p12 }
  0x49   : > { %8143 = vmatpush3.msk.msra.mxu0 %vm291_vm7, %v233_v21  ;;  %vm8869_vm7 = vmpackc.low %vm506_vm8, %vm498_vm6  ;;  %vm529_vm6 = vcmp.eq.s32.totalorder %v8848_v30, %v8765_v12  ;;  %vm537_vm8 = vcmp.eq.s32.totalorder %v8851_v31, %v8765_v12  ;;  %v9111_v0 = vrot.slane %v8755_v8, %v466_v62  ;;  %v9114_v3 = vrot.slane %v8755_v8, %v474_v63 }
  0x4a   : > { %8145 = vmatmul.mubr.msk.f32.vlgmr.msra.gmra.mrb[0].mxu0 %vm248_vm0, %v235_v27  ;;  %7938 = vmatprep.subr.msk.bf16.mxu0 %vm8800_vm11, %v8613_v22  ;;  %vm7913_vm11 = vmpackc.low %vm521_vm14, %vm513_vm10  ;;  %vm531_vm10 = vcmp.eq.s32.totalorder %v8848_v30, %v8773_v16  ;;  %vm539_vm14 = vcmp.eq.s32.totalorder %v8851_v31, %v8773_v16  ;;  %v12690_v7 = vmov 0  ;;  %v12692_v8 = vmov 0 }
  0x4b   : > { %8147 = vmatprep.mubr.msk.f32.mxu0 %vm248_vm0, %v236_v28  ;;  %7940 = vmatpush1.bf16.msk.msra.mxu0 %vm8826_vm2, %v8613_v22  ;;  %vm8903_vm2 = vmpackc.low %vm523_vm15, %vm515_vm13  ;;  %vm528_vm13 = vcmp.eq.s32.totalorder %v8848_v30, %v8762_v11  ;;  %vm536_vm15 = vcmp.eq.s32.totalorder %v8851_v31, %v8762_v11  ;;  %v12694_v10 = vmov 0  ;;  %v12700_v13 = vmov 0 }
  0x4c   : > { %7942 = vmatprep.subr.msk.bf16.mxu0 %vm8839_vm9, %v8613_v22  ;;  %7914 = vmatprep.subr.msk.bf16.mxu1 %vm7913_vm11, %v8613_v22  ;;  %vm7915_vm9 = vmpackc.low %vm520_vm3, %vm512_vm1  ;;  %vm530_vm3 = vcmp.eq.s32.totalorder %v8848_v30, %v8770_v15  ;;  %vm538_vm11 = vcmp.eq.s32.totalorder %v8851_v31, %v8770_v15  ;;  %v12702_v14 = vmov 0  ;;  %v8615_v21 = vmov 1966171168  }
  0x4d   : > { %vm7917_vm1 = vmpackc.low %vm537_vm8, %vm529_vm6  ;;  %7916 = vmatpush1.bf16.msk.msra.mxu1 %vm7915_vm9, %v8613_v22  ;;  %vm547_vm6 = vcmp.eq.s32.totalorder %v8912_v37, %v8773_v16  ;;  %vm555_vm8 = vcmp.eq.s32.totalorder %v8915_v38, %v8773_v16  ;;  %v2629_v23 = vunpack.c.l.s4 %v8615_v21 }
  0x4e   : > { %8148 = vmatmul.mubr.msk.f32.gmra.mrb[2].mxu0 %vm248_vm0, %v237_v34  ;;  %7918 = vmatprep.subr.msk.bf16.mxu1 %vm7917_vm1, %v8613_v22  ;;  %vm8975_vm9 = vmpackc.low %vm538_vm11, %vm530_vm3  ;;  %vm546_vm3 = vcmp.eq.s32.totalorder %v8912_v37, %v8770_v15  ;;  %vm554_vm11 = vcmp.eq.s32.totalorder %v8915_v38, %v8770_v15 }
  0x4f   : > { %8150 = vmatprep.mubr.msk.f32.mxu0 %vm248_vm0, %v238_v35  ;;  %7944 = vmatpush1.bf16.msk.msra.mxu0 %vm8869_vm7, %v8613_v22  ;;  %vm8958_vm7 = vmpackc.low %vm539_vm14, %vm531_vm10  ;;  %vm544_vm10 = vcmp.eq.s32.totalorder %v8912_v37, %v8762_v11  ;;  %vm552_vm14 = vcmp.eq.s32.totalorder %v8915_v38, %v8762_v11  ;;  %v2630_v26 = vunpack.c.0.s8 %v2629_v23 }
  0x50   : > { %7946 = vmatprep.subr.msk.bf16.mxu0 %vm8903_vm2, %v8613_v22  ;;  %vm7919_vm2 = vmpackc.low %vm536_vm15, %vm528_vm13 }
  0x51   : > { %vm7921_vm13 = vmpackc.low %vm553_vm5, %vm545_vm4  ;;  %7920 = vmatpush1.bf16.msk.msra.mxu1 %vm7919_vm2, %v8613_v22  ;;  %vm569_vm4 = vcmp.eq.s32.totalorder %v9013_v52, %v8765_v12  ;;  %vm563_vm5 = vcmp.eq.s32.totalorder %v9010_v51, %v8773_v16  ;;  %v9219_v27 = vsub.s32 %v2630_v26, %v8737_v1 }
  0x52   : > { %8151 = vmatmul.mubr.msk.f32.gmra.mrb[4].mxu0 %vm248_vm0, %v239_v40  ;;  %vm7953_vm15 = vmpackc.low %vm555_vm8, %vm547_vm6  ;;  %7922 = vmatprep.subr.msk.bf16.mxu1 %vm7921_vm13, %v8613_v22  ;;  %vm571_vm6 = vcmp.eq.s32.totalorder %v9013_v52, %v8773_v16  ;;  %vm560_vm8 = vcmp.eq.s32.totalorder %v9010_v51, %v8762_v11 }
  0x53   : > { %8153 = vmatprep.mubr.msk.f32.mxu0 %vm248_vm0, %v240_v41  ;;  %7948 = vmatpush1.bf16.msk.msra.mxu0 %vm8932_vm12, %v8613_v22  ;;  %vm7923_vm1 = vmpackc.low %vm552_vm14, %vm544_vm10  ;;  %vm562_vm10 = vcmp.eq.s32.totalorder %v9010_v51, %v8770_v15  ;;  %vm570_vm14 = vcmp.eq.s32.totalorder %v9013_v52, %v8770_v15 }
  0x54   : > { %7950 = vmatprep.subr.msk.bf16.mxu0 %vm8958_vm7, %v8613_v22  ;;  %vm7955_vm12 = vmpackc.low %vm554_vm11, %vm546_vm3  ;;  %vm561_vm7 = vcmp.eq.s32.totalorder %v9010_v51, %v8765_v12  ;;  %vm585_vm3 = vcmp.eq.s32.totalorder %v9039_v54, %v8765_v12  ;;  %vm579_vm11 = vcmp.eq.s32.totalorder %v9036_v53, %v8773_v16 }
  0x55   : > { %7924 = vmatpush1.bf16.msk.msra.mxu1 %vm7923_vm1, %v8613_v22  ;;  %vm7925_vm2 = vmpackc.low %vm569_vm4, %vm561_vm7  ;;  %vm577_vm1 = vcmp.eq.s32.totalorder %v9036_v53, %v8765_v12 }
  0x56   : > { %8154 = vmatmul.mubr.msk.f32.gmra.mrb[6].mxu0 %vm248_vm0, %v241_v44  ;;  %7926 = vmatprep.subr.msk.bf16.mxu1 %vm7925_vm2, %v8613_v22  ;;  %vm7929_vm7 = vmpackc.low %vm585_vm3, %vm577_vm1  ;;  %vm584_vm2 = vcmp.eq.s32.totalorder %v9039_v54, %v8762_v11  ;;  %vm592_vm3 = vcmp.eq.s32.totalorder %v9060_v55, %v8762_v11 }
  0x57   : > { %8156 = vmatprep.mubr.msk.f32.mxu0 %vm248_vm0, %v242_v45  ;;  %7952 = vmatpush1.bf16.msk.msra.mxu0 %vm8975_vm9, %v8613_v22  ;;  %vm568_vm9 = vcmp.eq.s32.totalorder %v9013_v52, %v8762_v11 }
  0x58   : > { %7954 = vmatprep.subr.msk.bf16.mxu0 %vm7953_vm15, %v8613_v22  ;;  %vm7927_vm13 = vmpackc.low %vm568_vm9, %vm560_vm8 }
  0x59   : > { %7928 = vmatpush1.bf16.msk.msra.mxu1 %vm7927_vm13, %v8613_v22  ;;  %vm7959_vm15 = vmpackc.low %vm570_vm14, %vm562_vm10  ;;  %vm593_vm10 = vcmp.eq.s32.totalorder %v9060_v55, %v8765_v12  ;;  %vm601_vm14 = vcmp.eq.s32.totalorder %v9063_v56, %v8765_v12  ;;  %vm595_vm13 = vcmp.eq.s32.totalorder %v9060_v55, %v8773_v16  ;;  %v12698_v12 = vmov 0 }
  0x5a   : > { %8157 = vmatmul.mubr.msk.f32.gmra.mrb[8].mxu0 %vm248_vm0, %v243_v46  ;;  %7930 = vmatprep.subr.msk.bf16.mxu1 %vm7929_vm7, %v8613_v22  ;;  %vm7933_vm1 = vmpackc.low %vm601_vm14, %vm593_vm10  ;;  %vm602_vm7 = vcmp.eq.s32.totalorder %v9063_v56, %v8770_v15 }
  0x5b   : > { %8159 = vmatprep.mubr.msk.f32.mxu0 %vm248_vm0, %v244_v47  ;;  %7956 = vmatpush1.bf16.msk.msra.mxu0 %vm7955_vm12, %v8613_v22  ;;  %vm587_vm12 = vcmp.eq.s32.totalorder %v9039_v54, %v8773_v16 }
  0x5c   : > { %vm7961_vm4 = vmpackc.low %vm587_vm12, %vm579_vm11  ;;  %vm600_vm11 = vcmp.eq.s32.totalorder %v9063_v56, %v8762_v11  ;;  %vm594_vm12 = vcmp.eq.s32.totalorder %v9060_v55, %v8770_v15 }
  0x5e   : > { %8160 = vmatmul.mubr.msk.f32.gmra.mrb[10].mxu0 %vm248_vm0, %v245_v48 }
  0x5f   : > { %8162 = vmatprep.mubr.msk.f32.mxu0 %vm248_vm0, %v246_v49 }
  0x62   : > { %8163 = vmatmul.mubr.msk.f32.gmra.mrb[12].mxu0 %vm248_vm0, %v247_v50  ;;  %vm7957_vm0 = vmpackc.low %vm571_vm6, %vm563_vm5  ;;  %vm576_vm5 = vcmp.eq.s32.totalorder %v9036_v53, %v8762_v11  ;;  %vm578_vm6 = vcmp.eq.s32.totalorder %v9036_v53, %v8770_v15  ;;  %v12696_v11 = vmov 0 }
  0x63   : > { %7958 = vmatprep.subr.msk.bf16.mxu0 %vm7957_vm0, %v8613_v22  ;;  %vm586_vm0 = vcmp.eq.s32.totalorder %v9039_v54, %v8770_v15  ;;  %vm7931_vm8 = vmpackc.low %vm584_vm2, %vm576_vm5  ;;  %1048 = vmatprep.mubr.bf16.mxu0 %v8614_v61  ;;  %v12704_v15 = vmov 0 }
  0x64   : > { %7960 = vmatpush1.bf16.msk.msra.mxu0 %vm7959_vm15, %v8613_v22  ;;  %7932 = vmatpush1.bf16.msk.msra.mxu1 %vm7931_vm8, %v8613_v22  ;;  %vm7963_vm9 = vmpackc.low %vm586_vm0, %vm578_vm6  ;;  %vm603_vm15 = vcmp.eq.s32.totalorder %v9063_v56, %v8773_v16  ;;  %vm485_vm6 = vcmp.eq.s32.totalorder %v8737_v1, %v9087_v59  ;;  %vm493_vm0 = vcmp.eq.s32.totalorder %v8758_v9, %v9087_v59  ;;  %v12706_v16 = vmov 0 }
  0x65   : > { %7962 = vmatprep.subr.msk.bf16.mxu0 %vm7961_vm4, %v8613_v22  ;;  %7934 = vmatprep.subr.msk.bf16.mxu1 %vm7933_vm1, %v8613_v22  ;;  %vm7965_vm4 = vmpackc.low %vm603_vm15, %vm595_vm13  ;;  %vm487_vm8 = vcmp.eq.s32.totalorder %v8737_v1, %v9090_v60  ;;  %vm565_vm13 = vcmp.eq.s32.totalorder %v9010_v51, %v9087_v59  ;;  %vm573_vm15 = vcmp.eq.s32.totalorder %v9013_v52, %v9087_v59 }
  0x66   : > { %vm7935_vm5 = vmpackc.low %vm600_vm11, %vm592_vm3  ;;  %vm567_vm1 = vcmp.eq.s32.totalorder %v9010_v51, %v9090_v60  ;;  %vm575_vm3 = vcmp.eq.s32.totalorder %v9013_v52, %v9090_v60  ;;  %vm564_vm11 = vcmp.eq.s32.totalorder %v9010_v51, %v9111_v0 }
  0x67   : > { %vm7967_vm2 = vmpackc.low %vm602_vm7, %vm594_vm12  ;;  %vm572_vm12 = vcmp.eq.s32.totalorder %v9013_v52, %v9111_v0  ;;  %vm566_vm7 = vcmp.eq.s32.totalorder %v9010_v51, %v9114_v3 }
  0x68   : > { %7964 = vmatpush1.bf16.msk.msra.mxu0 %vm7963_vm9, %v8613_v22  ;;  %7936 = vmatpush1.bf16.msk.msra.mxu1 %vm7935_vm5, %v8613_v22  ;;  %vm495_vm9 = vcmp.eq.s32.totalorder %v8758_v9, %v9090_v60  ;;  %vm7969_vm10 = vmpackc.low %vm493_vm0, %vm485_vm6 }
  0x69   : > { %7966 = vmatprep.subr.msk.bf16.mxu0 %vm7965_vm4, %v8613_v22  ;;  %7970 = vmatprep.subr.msk.bf16.mxu1 %vm7969_vm10, %v8613_v22  ;;  %vm8001_vm14 = vmpackc.low %vm495_vm9, %vm487_vm8  ;;  %vm574_vm4 = vcmp.eq.s32.totalorder %v9013_v52, %v9114_v3  ;;  %vm581_vm8 = vcmp.eq.s32.totalorder %v9036_v53, %v9087_v59  ;;  %vm589_vm9 = vcmp.eq.s32.totalorder %v9039_v54, %v9087_v59 }
  0x6a   : > { %vm9132_vm5 = vmpackc.low %vm573_vm15, %vm565_vm13  ;;  %vm583_vm10 = vcmp.eq.s32.totalorder %v9036_v53, %v9090_v60  ;;  %vm580_vm15 = vcmp.eq.s32.totalorder %v9036_v53, %v9111_v0 }
  0x6b   : > { %vm9140_vm6 = vmpackc.low %vm572_vm12, %vm564_vm11  ;;  %vm590_vm11 = vcmp.eq.s32.totalorder %v9039_v54, %v9114_v3 }
  0x6c   : > { %7968 = vmatpush1.bf16.msk.msra.mxu0 %vm7967_vm2, %v8613_v22  ;;  %vm9136_vm2 = vmpackc.low %vm575_vm3, %vm567_vm1  ;;  %v12689_v6 = vsel %vm9140_vm6, 4294967295, %v12688_v6  ;;  %vm588_vm1 = vcmp.eq.s32.totalorder %v9039_v54, %v9111_v0  ;;  %vm582_vm3 = vcmp.eq.s32.totalorder %v9036_v53, %v9114_v3 }
  0x6d   : > { %8002 = vmatprep.subr.msk.bf16.mxu0 %vm8001_vm14, %v8613_v22  ;;  %v12687_v5 = vsel %vm9136_vm2, 4294967295, %v12686_v5  ;;  %vm9144_vm0 = vmpackc.low %vm574_vm4, %vm566_vm7  ;;  %vm591_vm14 = vcmp.eq.s32.totalorder %v9039_v54, %v9090_v60  ;;  %vm597_vm7 = vcmp.eq.s32.totalorder %v9060_v55, %v9087_v59  ;;  %vm605_vm4 = vcmp.eq.s32.totalorder %v9063_v56, %v9087_v59 }
  0x6e   : > { %v12691_v7 = vsel %vm9144_vm0, 4294967295, %v12690_v7  ;;  %vm9156_vm13 = vmpackc.low %vm589_vm9, %vm581_vm8  ;;  %vm599_vm8 = vcmp.eq.s32.totalorder %v9060_v55, %v9090_v60  ;;  %vm607_vm9 = vcmp.eq.s32.totalorder %v9063_v56, %v9090_v60  ;;  %vm606_vm0 = vcmp.eq.s32.totalorder %v9063_v56, %v9114_v3 }
  0x6f   : > { %v12693_v8 = vsel %vm9156_vm13, 4294967295, %v12692_v8  ;;  %vm9168_vm12 = vmpackc.low %vm591_vm14, %vm583_vm10  ;;  %vm596_vm10 = vcmp.eq.s32.totalorder %v9060_v55, %v9111_v0  ;;  %vm604_vm14 = vcmp.eq.s32.totalorder %v9063_v56, %v9111_v0 }
  0x70   : > { %v12695_v10 = vsel %vm9168_vm12, 4294967295, %v12694_v10  ;;  %vm9180_vm13 = vmpackc.low %vm588_vm1, %vm580_vm15  ;;  %vm598_vm12 = vcmp.eq.s32.totalorder %v9060_v55, %v9114_v3 }
  0x71   : > { %v12697_v11 = vsel %vm9180_vm13, 4294967295, %v12696_v11  ;;  %vm9192_vm6 = vmpackc.low %vm590_vm11, %vm582_vm3  ;;  %vm492_vm3 = vcmp.eq.s32.totalorder %v8758_v9, %v9111_v0  ;;  %vm486_vm11 = vcmp.eq.s32.totalorder %v8737_v1, %v9114_v3 }
  0x72   : > { %v12699_v12 = vsel %vm9192_vm6, 4294967295, %v12698_v12  ;;  %vm9196_vm15 = vmpackc.low %vm605_vm4, %vm597_vm7  ;;  %vm501_vm7 = vcmp.eq.s32.totalorder %v8779_v19, %v9087_v59  ;;  %vm509_vm4 = vcmp.eq.s32.totalorder %v8782_v20, %v9087_v59 }
  0x73   : > { %v12701_v13 = vsel %vm9196_vm15, 4294967295, %v12700_v13  ;;  %vm9200_vm1 = vmpackc.low %vm607_vm9, %vm599_vm8  ;;  %vm503_vm8 = vcmp.eq.s32.totalorder %v8779_v19, %v9090_v60  ;;  %vm511_vm9 = vcmp.eq.s32.totalorder %v8782_v20, %v9090_v60  ;;  %vm556_vm15 = vcmp.eq.s32.totalorder %v8915_v38, %v9111_v0 }
  0x74   : > { %v12703_v14 = vsel %vm9200_vm1, 4294967295, %v12702_v14  ;;  %vm9204_vm13 = vmpackc.low %vm604_vm14, %vm596_vm10  ;;  %vm502_vm14 = vcmp.eq.s32.totalorder %v8779_v19, %v9114_v3  ;;  %vm533_vm1 = vcmp.eq.s32.totalorder %v8848_v30, %v9087_v59 }
  0x75   : > { %v12705_v15 = vsel %vm9204_vm13, 4294967295, %v12704_v15  ;;  %vm9208_vm2 = vmpackc.low %vm606_vm0, %vm598_vm12  ;;  %vm484_vm0 = vcmp.eq.s32.totalorder %v8737_v1, %v9111_v0  ;;  %vm494_vm12 = vcmp.eq.s32.totalorder %v8758_v9, %v9114_v3  ;;  %vm527_vm13 = vcmp.eq.s32.totalorder %v8812_v25, %v9090_v60 }
  0x76   : > { %v12707_v16 = vsel %vm9208_vm2, 4294967295, %v12706_v16  ;;  %vm9287_vm10 = vmpackc.low %vm492_vm3, %vm484_vm0  ;;  %vm508_vm3 = vcmp.eq.s32.totalorder %v8782_v20, %v9111_v0  ;;  %vm517_vm2 = vcmp.eq.s32.totalorder %v8809_v24, %v9087_v59 }
  0x77   : > { %vm8003_vm0 = vmpackc.low %vm494_vm12, %vm486_vm11 }
  0x78   : > { %vm7973_vm11 = vmpackc.low %vm509_vm4, %vm501_vm7  ;;  %vm510_vm7 = vcmp.eq.s32.totalorder %v8782_v20, %v9114_v3  ;;  %vm12714_vm4 = vcmp.eq.s32.totalorder %v8779_v19, %v9111_v0 }
  0x79   : > { %vm8005_vm12 = vmpackc.low %vm511_vm9, %vm503_vm8  ;;  %vm525_vm8 = vcmp.eq.s32.totalorder %v8812_v25, %v9087_v59  ;;  %vm519_vm9 = vcmp.eq.s32.totalorder %v8809_v24, %v9090_v60 }
 0x11d   : > { %v8146_v28 = vpop.f32.mrb[0].mxu0 }
 0x11e   : > { %v4131_v29 = vcombine.high %v8146_v28, %v8146_v28  ;;  %v4138_v32 = vrot.slane %v8146_v28, %v9219_v27  ;;  %v361_v33 = vpop.f32.mrb[1].mxu0 }
 0x11f   : > { %v4082_v34 = vcombine.high %v361_v33, %v361_v33  ;;  %v4089_v35 = vrot.slane %v361_v33, %v9219_v27 }
 0x120   : > { %v4145_v36 = vrot.slane %v4131_v29, %v9219_v27  ;;  %v4146_v39 = vcombine.high %v4138_v32, %v4138_v32  ;;  %v9225_v40 = vrot.slane %v4138_v32, %v9219_v27 }
 0x121   : > { %v4096_v41 = vrot.slane %v4082_v34, %v9219_v27  ;;  %v4097_v42 = vcombine.high %v4089_v35, %v4089_v35  ;;  %v9229_v43 = vrot.slane %v4089_v35, %v9219_v27  ;;  %v8149_v44 = vpop.f32.mrb[2].mxu0 }
 0x122   : > { %v4147_v45 = vcombine.high %v4145_v36, %v4145_v36  ;;  %v9232_v46 = vrot.slane %v4145_v36, %v9219_v27  ;;  %v9235_v47 = vrot.slane %v4146_v39, %v9219_v27  ;;  %v371_v48 = vpop.f32.mrb[3].mxu0  ;;  %v4229_v57 = vcombine.high %v8149_v44, %v8149_v44 }
 0x123   : > { %v4098_v49 = vcombine.high %v4096_v41, %v4096_v41  ;;  %v9238_v50 = vrot.slane %v4096_v41, %v9219_v27  ;;  %v9241_v51 = vrot.slane %v4097_v42, %v9219_v27  ;;  %v4236_v58 = vrot.slane %v8149_v44, %v9219_v27 }
 0x124   : > { %v9244_v52 = vrot.slane %v4147_v45, %v9219_v27  ;;  %v4180_v62 = vcombine.high %v371_v48, %v371_v48  ;;  %v4187_v63 = vrot.slane %v371_v48, %v9219_v27  ;;  %v4243_v23 = vrot.slane %v4229_v57, %v9219_v27 }
 0x125   : > { %v9247_v53 = vrot.slane %v4098_v49, %v9219_v27  ;;  %v8152_v54 = vpop.f32.mrb[4].mxu0  ;;  %v4244_v26 = vcombine.high %v4236_v58, %v4236_v58  ;;  %v9273_v28 = vrot.slane %v4236_v58, %v9219_v27 }
 0x126   : > { %v381_v55 = vpop.f32.mrb[5].mxu0  ;;  %v4194_v29 = vrot.slane %v4180_v62, %v9219_v27  ;;  %v4195_v32 = vcombine.high %v4187_v63, %v4187_v63  ;;  %v9277_v33 = vrot.slane %v4187_v63, %v9219_v27  ;;  %v4245_v36 = vcombine.high %v4243_v23, %v4243_v23 }
 0x127   : > { %v9263_v18 = vpack.c.bf16 %v8152_v54, %v381_v55  ;;  %12708 = vst [vmem:[#allocation8_spill] sm:$0xff] %v9273_v28  ;;  %v9294_v39 = vrot.slane %v4243_v23, %v9219_v27  ;;  %v9297_v41 = vrot.slane %v4244_v26, %v9219_v27 }
 0x128   : > { %v4196_v44 = vcombine.high %v4194_v29, %v4194_v29  ;;  %v9309_v45 = vrot.slane %v4194_v29, %v9219_v27  ;;  %v9312_v48 = vrot.slane %v4195_v32, %v9219_v27  ;;  %v9322_v9 = vrot.slane %v4245_v36, %v9219_v27 }
 0x129   : > { %v8155_v56 = vpop.f32.mrb[6].mxu0  ;;  %966 = vmatmul.mubr.bf16.vlgmr.msra.gmra.mrb[0].mxu1 %v9263_v18  ;;  %1049 = vmatmul.mubr.bf16.vlgmr.msra.gmra.mrb[16].mxu0 %v9263_v18  ;;  %12711 = vst [vmem:[#allocation9_spill] sm:$0xff] %v9294_v39  ;;  %12712 = vst [vmem:[#allocation10_spill] sm:$0xff] %v9297_v41  ;;  %v4275_v29 = vcombine.high %v9294_v39, %v9294_v39 }
 0x12a   : > { %v391_v17 = vpop.f32.mrb[7].mxu0  ;;  %975 = vmatprep.mubr.bf16.mxu1 %v8614_v61  ;;  %1058 = vmatprep.mubr.bf16.mxu0 %v8614_v61  ;;  %12713 = vst [vmem:[#allocation11_spill] sm:$0xff] %v9322_v9  ;;  %v9338_v49 = vrot.slane %v4196_v44, %v9219_v27  ;;  %v4277_v19 = vcombine.high %v9322_v9, %v9322_v9 }
 0x12b   : > { %v9265_v21 = vpack.c.bf16 %v8155_v56, %v391_v17  ;;  %7972 = vmatpush1.bf16.msk.msra.mxu1 %vm9287_vm10, %v8613_v22  ;;  %8004 = vmatpush1.bf16.msk.msra.mxu0 %vm8003_vm0, %v8613_v22  ;;  %vm7975_vm10 = vmpackc.low %vm508_vm3, %vm12714_vm4  ;;  %vm516_vm3 = vcmp.eq.s32.totalorder %v8809_v24, %v9111_v0  ;;  %vm524_vm4 = vcmp.eq.s32.totalorder %v8812_v25, %v9111_v0 }
 0x12c   : > { %7974 = vmatprep.subr.msk.bf16.mxu1 %vm7973_vm11, %v8613_v22  ;;  %8006 = vmatprep.subr.msk.bf16.mxu0 %vm8005_vm12, %v8613_v22  ;;  %vm9354_vm0 = vmpackc.low %vm510_vm7, %vm502_vm14  ;;  %vm541_vm14 = vcmp.eq.s32.totalorder %v8851_v31, %v9087_v59  ;;  %vm518_vm7 = vcmp.eq.s32.totalorder %v8809_v24, %v9114_v3  ;;  %v4178_v24 = vcombine.high %v9235_v47, %v9235_v47 }
 0x12d   : > { %v8158_v35 = vpop.f32.mrb[8].mxu0  ;;  %vm9363_vm11 = vmpackc.low %vm525_vm8, %vm517_vm2  ;;  %vm526_vm2 = vcmp.eq.s32.totalorder %v8812_v25, %v9114_v3  ;;  %vm543_vm8 = vcmp.eq.s32.totalorder %v8851_v31, %v9090_v60  ;;  %v4177_v25 = vcombine.high %v9232_v46, %v9232_v46  ;;  %v4225_v56 = vcombine.high %v9277_v33, %v9277_v33 }
 0x12e   : > { %v401_v42 = vpop.f32.mrb[9].mxu0  ;;  %vm9372_vm12 = vmpackc.low %vm527_vm13, %vm519_vm9 }
 0x12f   : > { %7976 = vmatpush1.bf16.msk.msra.mxu1 %vm7975_vm10, %v8613_v22  ;;  %vm535_vm10 = vcmp.eq.s32.totalorder %v8848_v30, %v9090_v60  ;;  %v9385_v58 = vpack.c.bf16 %v8158_v35, %v401_v42  ;;  %vm7979_vm13 = vmpackc.low %vm524_vm4, %vm516_vm3  ;;  %8008 = vmatpush1.bf16.msk.msra.mxu0 %vm9354_vm0, %v8613_v22  ;;  %vm540_vm3 = vcmp.eq.s32.totalorder %v8851_v31, %v9111_v0 }
 0x130   : > { %vm7981_vm9 = vmpackc.low %vm541_vm14, %vm533_vm1  ;;  %7978 = vmatprep.subr.msk.bf16.mxu1 %vm9363_vm11, %v8613_v22  ;;  %8010 = vmatprep.subr.msk.bf16.mxu0 %vm9372_vm12, %v8613_v22  ;;  %vm532_vm1 = vcmp.eq.s32.totalorder %v8848_v30, %v9111_v0  ;;  %vm534_vm11 = vcmp.eq.s32.totalorder %v8848_v30, %v9114_v3  ;;  %vm542_vm14 = vcmp.eq.s32.totalorder %v8851_v31, %v9114_v3 }
 0x131   : > { %v8161_v54 = vpop.f32.mrb[10].mxu0  ;;  %976 = vmatmul.mubr.bf16.gmra.mrb[4].mxu1 %v9265_v21  ;;  %1059 = vmatmul.mubr.bf16.gmra.mrb[20].mxu0 %v9265_v21  ;;  %vm8011_vm0 = vmpackc.low %vm526_vm2, %vm518_vm7  ;;  %vm549_vm12 = vcmp.eq.s32.totalorder %v8912_v37, %v9087_v59  ;;  %vm557_vm7 = vcmp.eq.s32.totalorder %v8915_v38, %v9087_v59  ;;  %v4179_v30 = vcombine.high %v9244_v52, %v9244_v52 }
 0x132   : > { %v411_v20 = vpop.f32.mrb[11].mxu0  ;;  %985 = vmatprep.mubr.bf16.mxu1 %v8614_v61  ;;  %1068 = vmatprep.mubr.bf16.mxu0 %v8614_v61  ;;  %vm8013_vm4 = vmpackc.low %vm543_vm8, %vm535_vm10  ;;  %vm551_vm10 = vcmp.eq.s32.totalorder %v8912_v37, %v9090_v60 }
 0x133   : > { %v9391_v62 = vpack.c.bf16 %v8161_v54, %v411_v20  ;;  %7980 = vmatpush1.bf16.msk.msra.mxu1 %vm7979_vm13, %v8613_v22  ;;  %8012 = vmatpush1.bf16.msk.msra.mxu0 %vm8011_vm0, %v8613_v22  ;;  %vm7983_vm2 = vmpackc.low %vm540_vm3, %vm532_vm1  ;;  %vm559_vm13 = vcmp.eq.s32.totalorder %v8915_v38, %v9090_v60  ;;  %vm550_vm0 = vcmp.eq.s32.totalorder %v8912_v37, %v9114_v3 }
 0x134   : > { %7982 = vmatprep.subr.msk.bf16.mxu1 %vm7981_vm9, %v8613_v22  ;;  %8014 = vmatprep.subr.msk.bf16.mxu0 %vm8013_vm4, %v8613_v22  ;;  %vm8015_vm8 = vmpackc.low %vm542_vm14, %vm534_vm11  ;;  %vm548_vm9 = vcmp.eq.s32.totalorder %v8912_v37, %v9111_v0  ;;  %vm558_vm1 = vcmp.eq.s32.totalorder %v8915_v38, %v9114_v3  ;;  %vm12721_vm14 = vnez %v12687_v5  ;;  %v4127_v60 = vcombine.high %v9229_v43, %v9229_v43 }
 0x135   : > { %v9382_v57 = vpop.f32.mrb[12].mxu0  ;;  %vm7985_vm6 = vmpackc.low %vm557_vm7, %vm549_vm12  ;;  %vm12725_vm12 = vnez %v12695_v10  ;;  %vm12726_vm7 = vnez %v12697_v11  ;;  %v9548_v0 = vrot.slane %v4178_v24, %v8740_v2  ;;  %v4128_v5 = vcombine.high %v9238_v50, %v9238_v50 }
 0x136   : > { %v9395_v63 = vpop.f32.mrb[13].mxu0  ;;  %vm8017_vm3 = vmpackc.low %vm559_vm13, %vm551_vm10  ;;  %vm12728_vm10 = vnez %v12701_v13  ;;  %vm12729_vm13 = vnez %v12703_v14  ;;  %v2676_v37 = vcombine.high %v9382_v57, %v9382_v57  ;;  %v4274_v10 = vcombine.high %v9273_v28, %v9273_v28 }
 0x137   : > { %v9409_v17 = vpack.c.bf16 %v9382_v57, %v9395_v63  ;;  %7984 = vmatpush1.bf16.msk.msra.mxu1 %vm7983_vm2, %v8613_v22  ;;  %8016 = vmatpush1.bf16.msk.msra.mxu0 %vm8015_vm8, %v8613_v22  ;;  %vm7987_vm4 = vmpackc.low %vm556_vm15, %vm548_vm9  ;;  %vm12723_vm15 = vnez %v12691_v7  ;;  %vm12727_vm2 = vnez %v12699_v12  ;;  %vm12730_vm8 = vnez %v12705_v15 }
 0x138   : > { %7986 = vmatprep.subr.msk.bf16.mxu1 %vm7985_vm6, %v8613_v22  ;;  %vm8019_vm11 = vmpackc.low %vm558_vm1, %vm550_vm0  ;;  %8018 = vmatprep.subr.msk.bf16.mxu0 %vm8017_vm3, %v8613_v22  ;;  %vm12722_vm6 = vnez %v12689_v6  ;;  %vm12731_vm9 = vnez %v12707_v16  ;;  %v9557_v6 = vrot.slane %v4177_v25, %v8740_v2  ;;  %v4130_v7 = vcombine.high %v9247_v53, %v9247_v53 }
 0x139   : > { %986 = vmatmul.mubr.bf16.gmra.mrb[8].mxu1 %v9385_v58  ;;  %1069 = vmatmul.mubr.bf16.gmra.mrb[24].mxu0 %v9385_v58  ;;  %v9566_v11 = vrot.slane %v4179_v30, %v8740_v2  ;;  %v2683_v13 = vrot.slane %v9382_v57, %v9219_v27  ;;  %v2690_v14 = vrot.slane %v2676_v37, %v9219_v27  ;;  %vm3165_vm0 = vcmask 130048  }
 0x13a   : > { %995 = vmatprep.mubr.bf16.mxu1 %v8614_v61  ;;  %1078 = vmatprep.mubr.bf16.mxu0 %v8614_v61  ;;  %v9574_v15 = vrot.slane %v4127_v60, %v8740_v2  ;;  %v9586_v26 = vrot.slane %v4128_v5, %v8740_v2  ;;  %v2627_v32 = vcombine.high %v9395_v63, %v9395_v63  ;;  %vm5060_vm1 = vcmask 261120  }
 0x13b   : > { %7988 = vmatpush1.bf16.msk.msra.mxu1 %vm7987_vm4, %v8613_v22  ;;  %8020 = vmatpush1.bf16.msk.msra.mxu0 %vm8019_vm11, %v8613_v22  ;;  %v9593_v34 = vrot.slane %v4130_v7, %v8740_v2  ;;  %v9600_v42 = vrot.slane %v4274_v10, %v8740_v2  ;;  %v2691_v54 = vcombine.high %v2683_v13, %v2683_v13  ;;  %vm7316_vm3 = vcmask 1041409  }
 0x13c   : > { %7990 = vmatprep.subr.msk.bf16.mxu1 %vm9132_vm5, %v8613_v22  ;;  %8022 = vmatprep.subr.msk.bf16.mxu0 %vm12721_vm14, %v8613_v22  ;;  %vm12724_vm5 = vnez %v12693_v8  ;;  %v2692_v20 = vcombine.high %v2690_v14, %v2690_v14  ;;  %v2634_v57 = vrot.slane %v9395_v63, %v9219_v27  ;;  %v4226_v24 = vcombine.high %v9309_v45, %v9309_v45 }
 0x13d   : > { %12732 = vst [vmem:[#allocation12_spill] sm:$0xff] %v9600_v42  ;;  %v9624_v25 = vrot.slane %v2683_v13, %v9219_v27  ;;  %v9627_v30 = vrot.slane %v2690_v14, %v9219_v27  ;;  %v8616_v63 = vmov 1983009808   ;;  %v4228_v60 = vcombine.high %v9338_v49, %v9338_v49 }
 0x13e   : > { %v1268_v37 = vunpack.c.l.s4 %v8616_v63  ;;  %v9634_v5 = vrot.slane %v2691_v54, %v9219_v27  ;;  %v9637_v7 = vrot.slane %v2692_v20, %v9219_v27  ;;  %v9640_v10 = vrot.slane %v4277_v19, %v8740_v2 }
 0x13f   : > { %7992 = vmatpush1.bf16.msk.msra.mxu1 %vm12722_vm6, %v8613_v22  ;;  %8024 = vmatpush1.bf16.msk.msra.mxu0 %vm12723_vm15, %v8613_v22  ;;  %12735 = vst [vmem:[#allocation15_spill] sm:$0xff] %v9624_v25  ;;  %12736 = vst [vmem:[#allocation16_spill] sm:$0xff] %v9627_v30  ;;  %v9645_v14 = vrot.slane %v4225_v56, %v8740_v2  ;;  %v2721_v19 = vcombine.high %v9624_v25, %v9624_v25  ;;  %vm7319_vm4 = vcmask 1042434   ;;  %vm7322_vm11 = vcmask 1043459  }
 0x140   : > { %7994 = vmatprep.subr.msk.bf16.mxu1 %vm12724_vm5, %v8613_v22  ;;  %8026 = vmatprep.subr.msk.bf16.mxu0 %vm12725_vm12, %v8613_v22  ;;  %12737 = vst [vmem:[#allocation17_spill] sm:$0xff] %v9634_v5  ;;  %12738 = vst [vmem:[#allocation18_spill] sm:$0xff] %v9637_v7  ;;  %v2722_v63 = vcombine.high %v9627_v30, %v9627_v30  ;;  %v2723_v56 = vcombine.high %v9634_v5, %v9634_v5  ;;  %vm7325_vm14 = vcmask 1044484   ;;  %vm7328_vm6 = vcmask 1045509  }
 0x141   : > { %996 = vmatmul.mubr.bf16.gmra.mrb[12].mxu1 %v9391_v62  ;;  %1079 = vmatmul.mubr.bf16.gmra.mrb[28].mxu0 %v9391_v62  ;;  %12739 = vst [vmem:[#allocation19_spill] sm:$0xff] %v9640_v10  ;;  %v9663_v44 = vrot.slane %v2634_v57, %v9219_v27  ;;  %v9669_v35 = vrot.slane %v4226_v24, %v8740_v2  ;;  %vm7331_vm15 = vcmask 1046534   ;;  %vm7334_vm5 = vcmask 1047559  }
 0x142   : > { %1005 = vmatprep.mubr.bf16.mxu1 %v8614_v61  ;;  %1088 = vmatprep.mubr.bf16.mxu0 %v8614_v61  ;;  %v9672_v20 = vrot.slane %v4228_v60, %v8740_v2  ;;  %v9687_v60 = vrot.slane %v2721_v19, %v8740_v2  ;;  %vm7547_vm12 = vcmask 523264  }
 0x143   : > { %7996 = vmatpush1.bf16.msk.msra.mxu1 %vm12726_vm7, %v8613_v22  ;;  %8028 = vmatpush1.bf16.msk.msra.mxu0 %vm12727_vm2, %v8613_v22  ;;  %12740 = vst [vmem:[#allocation20_spill] sm:$0xff] %v9663_v44 }
 0x144   : > { %7998 = vmatprep.subr.msk.bf16.mxu1 %vm12728_vm10, %v8613_v22  ;;  %8030 = vmatprep.subr.msk.bf16.mxu0 %vm12729_vm13, %v8613_v22  ;;  %12742 = vst [vmem:[#allocation22_spill] sm:$0xff] %v9672_v20  ;;  %12745 = vst [vmem:[#allocation25_spill] sm:$0xff] %v9687_v60 }
 0x147   : > { %8000 = vmatpush1.bf16.msk.msra.mxu1 %vm12730_vm8, %v8613_v22  ;;  %8032 = vmatpush1.bf16.msk.msra.mxu0 %vm12731_vm9, %v8613_v22  ;;  %v4176_v22 = vcombine.high %v9225_v40, %v9225_v40 }
 0x149   : > { %1006 = vmatmul.mubr.bf16.gmra.mrb[16].mxu1 %v9409_v17  ;;  %1089 = vmatmul.mubr.bf16.gmra.mrb[32].mxu0 %v9409_v17  ;;  %v9541_v59 = vrot.slane %v4176_v22, %v8740_v2  ;;  %v2641_v22 = vrot.slane %v2627_v32, %v9219_v27  ;;  %v8617_v32 = vmov 1934713408  }
 0x14a   : > { %1131 = vmatprep.mubr.bf16.mxu1 %v8614_v61  ;;  %1214 = vmatprep.mubr.bf16.mxu0 %v8614_v61  ;;  %v1332_v13 = vunpack.c.l.s4 %v8617_v32  ;;  %v9692_v32 = vrot.slane %v2722_v63, %v8740_v2 }
 0x14b   : > { %v2643_v54 = vcombine.high %v2641_v22, %v2641_v22  ;;  %v9666_v36 = vrot.slane %v2641_v22, %v9219_v27 }
 0x14c   : > { %12746 = vst [vmem:[#allocation26_spill] sm:$0xff] %v9692_v32 }
 0x14d   : > { %12741 = vst [vmem:[#allocation21_spill] sm:$0xff] %v9666_v36  ;;  %v9684_v24 = vrot.slane %v2643_v54, %v9219_v27  ;;  %v2673_v54 = vcombine.high %v9666_v36, %v9666_v36 }
 0x14f   : > { %12744 = vst [vmem:[#allocation24_spill] sm:$0xff] %v9684_v24 }
 0x151   : > { %1132 = vmatmul.mubr.bf16.vlgmr.msra.gmra.mrb[20].mxu1 %v9263_v18  ;;  %1215 = vmatmul.mubr.bf16.vlgmr.msra.gmra.mrb[36].mxu0 %v9263_v18 }
 0x152   : > { %1141 = vmatprep.mubr.bf16.mxu1 %v8614_v61  ;;  %1224 = vmatprep.mubr.bf16.mxu0 %v8614_v61 }
 0x159   : > { %1142 = vmatmul.mubr.bf16.gmra.mrb[24].mxu1 %v9265_v21  ;;  %1225 = vmatmul.mubr.bf16.gmra.mrb[40].mxu0 %v9265_v21  ;;  %v4276_v21 = vcombine.high %v9297_v41, %v9297_v41 }
 0x15a   : > { %1151 = vmatprep.mubr.bf16.mxu1 %v8614_v61  ;;  %1234 = vmatprep.mubr.bf16.mxu0 %v8614_v61 }
 0x15b   : > { %v9607_v55 = vrot.slane %v4276_v21, %v8740_v2  ;;  %v2642_v21 = vcombine.high %v2634_v57, %v2634_v57  ;;  %v9698_v57 = vrot.slane %v2723_v56, %v8740_v2  ;;  %v1333_v56 = vunpack.c.0.s8 %v1332_v13 }
 0x15d   : > { %12733 = vst [vmem:[#allocation13_spill] sm:$0xff] %v9607_v55  ;;  %12747 = vst [vmem:[#allocation27_spill] sm:$0xff] %v9698_v57 }
 0x161   : > { %1152 = vmatmul.mubr.bf16.gmra.mrb[28].mxu1 %v9385_v58  ;;  %1235 = vmatmul.mubr.bf16.gmra.mrb[44].mxu0 %v9385_v58  ;;  %v1269_v58 = vunpack.c.0.s8 %v1268_v37  ;;  %v9675_v37 = vrot.slane %v2642_v21, %v9219_v27  ;;  %v2672_v27 = vcombine.high %v9663_v44, %v9663_v44 }
 0x162   : > { %1161 = vmatprep.mubr.bf16.mxu1 %v8614_v61  ;;  %1244 = vmatprep.mubr.bf16.mxu0 %v8614_v61 }
 0x163   : > { %12743 = vst [vmem:[#allocation23_spill] sm:$0xff] %v9675_v37  ;;  %v2674_v63 = vcombine.high %v9675_v37, %v9675_v37 }
 0x169   : > { %1162 = vmatmul.mubr.bf16.gmra.mrb[32].mxu1 %v9391_v62  ;;  %1245 = vmatmul.mubr.bf16.gmra.mrb[48].mxu0 %v9391_v62  ;;  %v9616_v62 = vrot.slane %v4275_v29, %v8740_v2 }
 0x16a   : > { %1171 = vmatprep.mubr.bf16.mxu1 %v8614_v61  ;;  %1254 = vmatprep.mubr.bf16.mxu0 %v8614_v61  ;;  %v4129_v61 = vcombine.high %v9241_v51, %v9241_v51 }
 0x16b   : > { %12734 = vst [vmem:[#allocation14_spill] sm:$0xff] %v9616_v62 }
 0x16c   : > { %v9577_v16 = vrot.slane %v4129_v61, %v8740_v2  ;;  %v9695_v61 = vsub.s32 %v1269_v58, %v8737_v1 }
 0x171   : > { %1172 = vmatmul.mubr.bf16.gmra.mrb[36].mxu1 %v9409_v17  ;;  %1255 = vmatmul.mubr.bf16.gmra.mrb[52].mxu0 %v9409_v17  ;;  %v4227_v17 = vcombine.high %v9312_v48, %v9312_v48 }
 0x173   : > { %v9648_v29 = vrot.slane %v4227_v17, %v8740_v2  ;;  %v2724_v17 = vcombine.high %v9637_v7, %v9637_v7 }
 0x175   : > { %v9701_v22 = vrot.slane %v2724_v17, %v8740_v2  ;;  %v2675_v17 = vcombine.high %v9684_v24, %v9684_v24 }
 0x177   : > { %12748 = vst [vmem:[#allocation28_spill] sm:$0xff] %v9701_v22 }
 0x1fc   : > { %v967_v19 = vpop.f32.mrb[0].mxu1  ;;  %v1050_v21 = vpop.f32.mrb[16].mxu0 }
 0x1fd   : > { %v1265_v4 = vcombine.low %v967_v19, %v1050_v21  ;;  %v1266_v58 = vcombine.high %v967_v19, %v1050_v21  ;;  %v969_v3 = vpop.f32.mrb[1].mxu1  ;;  %v1052_v38 = vpop.f32.mrb[17].mxu0 }
 0x1fe   : > { %v1281_v23 = vcombine.low %v969_v3, %v1052_v38  ;;  %v1282_v18 = vcombine.high %v969_v3, %v1052_v38  ;;  %v971_v12 = vpop.f32.mrb[2].mxu1  ;;  %v1054_v8 = vpop.f32.mrb[18].mxu0  ;;  %v9720_v38 = vsub.s32 %v1333_v56, %v8737_v1 }
 0x1ff   : > { %v1273_v22 = vrot.slane %v1265_v4, %v9695_v61  ;;  %v1280_v32 = vrot.slane %v1266_v58, %v9695_v61  ;;  %v1401_v7 = vcombine.low %v971_v12, %v1054_v8  ;;  %v1402_v30 = vcombine.high %v971_v12, %v1054_v8  ;;  %v973_v21 = vpop.f32.mrb[3].mxu1  ;;  %v1056_v19 = vpop.f32.mrb[19].mxu0 }
 0x200   : > { %v1289_v13 = vrot.slane %v1281_v23, %v9695_v61  ;;  %v1296_v57 = vrot.slane %v1282_v18, %v9695_v61  ;;  %v1417_v60 = vcombine.low %v973_v21, %v1056_v19  ;;  %v1418_v5 = vcombine.high %v973_v21, %v1056_v19 }
 0x201   : > { %v1409_v3 = vrot.slane %v1401_v7, %v9695_v61  ;;  %v1416_v4 = vrot.slane %v1402_v30, %v9695_v61  ;;  %v9725_v23 = vrot.slane %v2672_v27, %v8740_v2  ;;  %v9728_v18 = vrot.slane %v2674_v63, %v8740_v2 }
 0x202   : > { %v1329_v58 = vcombine.low %v1273_v22, %v1289_v13  ;;  %v1330_v8 = vcombine.high %v1273_v22, %v1289_v13  ;;  %v1345_v12 = vcombine.low %v1280_v32, %v1296_v57  ;;  %v1346_v25 = vcombine.high %v1280_v32, %v1296_v57 }
 0x203   : > { %12749 = vst [vmem:[#allocation29_spill] sm:$0xff] %v9725_v23  ;;  %12750 = vst [vmem:[#allocation30_spill] sm:$0xff] %v9728_v18  ;;  %v1425_v21 = vrot.slane %v1417_v60, %v9695_v61  ;;  %v1432_v19 = vrot.slane %v1418_v5, %v9695_v61  ;;  %v9737_v7 = vrot.slane %v2673_v54, %v8740_v2 }
 0x204   : > { %v9740_v57 = vrot.slane %v2675_v17, %v8740_v2  ;;  %v977_v22 = vpop.f32.mrb[4].mxu1  ;;  %v1060_v60 = vpop.f32.mrb[20].mxu0  ;;  %v9743_v5 = vrot.slane %v1329_v58, %v9720_v38  ;;  %v9746_v1 = vrot.slane %v1330_v8, %v9720_v38  ;;  %v9749_v17 = vrot.slane %v1345_v12, %v9720_v38 }
 0x205   : > { %12751 = vst [vmem:[#allocation31_spill] sm:$0xff] %v9737_v7  ;;  %v1465_v32 = vcombine.low %v1409_v3, %v1425_v21  ;;  %v1466_v27 = vcombine.high %v1409_v3, %v1425_v21  ;;  %v1481_v63 = vcombine.low %v1416_v4, %v1432_v19  ;;  %v1482_v56 = vcombine.high %v1416_v4, %v1432_v19  ;;  %v979_v13 = vpop.f32.mrb[5].mxu1  ;;  %v1062_v54 = vpop.f32.mrb[21].mxu0 }
 0x206   : > { %12752 = vst [vmem:[#allocation32_spill] sm:$0xff] %v9740_v57  ;;  %v1537_v30 = vcombine.low %v977_v22, %v1060_v60  ;;  %v1538_v31 = vcombine.high %v977_v22, %v1060_v60  ;;  %v981_v7 = vpop.f32.mrb[6].mxu1  ;;  %v9752_v57 = vrot.slane %v1346_v25, %v9720_v38  ;;  %v1064_v58 = vpop.f32.mrb[22].mxu0  ;;  %v1553_v22 = vcombine.low %v979_v13, %v1062_v54 }
 0x207   : > { %v9755_v3 = vrot.slane %v1465_v32, %v9720_v38  ;;  %v9758_v4 = vrot.slane %v1466_v27, %v9720_v38  ;;  %v983_v21 = vpop.f32.mrb[7].mxu1  ;;  %v1554_v60 = vcombine.high %v979_v13, %v1062_v54  ;;  %v1066_v24 = vpop.f32.mrb[23].mxu0  ;;  %v1673_v12 = vcombine.low %v981_v7, %v1064_v58 }
 0x208   : > { %v1545_v8 = vrot.slane %v1537_v30, %v9695_v61  ;;  %v1552_v19 = vrot.slane %v1538_v31, %v9695_v61  ;;  %v1674_v36 = vcombine.high %v981_v7, %v1064_v58  ;;  %v1689_v18 = vcombine.low %v983_v21, %v1066_v24 }
 0x209   : > { %v1690_v25 = vcombine.high %v983_v21, %v1066_v24  ;;  %v9763_v23 = vrot.slane %v1481_v63, %v9720_v38  ;;  %v9766_v32 = vrot.slane %v1482_v56, %v9720_v38  ;;  %v1561_v27 = vrot.slane %v1553_v22, %v9695_v61 }
 0x20a   : > { %v1568_v37 = vrot.slane %v1554_v60, %v9695_v61  ;;  %v1681_v30 = vrot.slane %v1673_v12, %v9695_v61  ;;  %v1688_v31 = vrot.slane %v1674_v36, %v9695_v61  ;;  %v1697_v13 = vrot.slane %v1689_v18, %v9695_v61 }
 0x20b   : > { %v1704_v7 = vrot.slane %v1690_v25, %v9695_v61  ;;  %v1601_v54 = vcombine.low %v1545_v8, %v1561_v27  ;;  %v1602_v24 = vcombine.high %v1545_v8, %v1561_v27 }
 0x20c   : > { %v1617_v58 = vcombine.low %v1552_v19, %v1568_v37  ;;  %v1618_v63 = vcombine.high %v1552_v19, %v1568_v37  ;;  %v987_v21 = vpop.f32.mrb[8].mxu1  ;;  %v1737_v44 = vcombine.low %v1681_v30, %v1697_v13  ;;  %v1738_v56 = vcombine.high %v1681_v30, %v1697_v13  ;;  %v1070_v22 = vpop.f32.mrb[24].mxu0 }
 0x20d   : > { %v1753_v10 = vcombine.low %v1688_v31, %v1704_v7  ;;  %v1754_v62 = vcombine.high %v1688_v31, %v1704_v7  ;;  %v989_v9 = vpop.f32.mrb[9].mxu1  ;;  %v9775_v60 = vrot.slane %v1601_v54, %v9720_v38  ;;  %v9778_v36 = vrot.slane %v1602_v24, %v9720_v38  ;;  %v1072_v37 = vpop.f32.mrb[25].mxu0 }
 0x20e   : > { %v9781_v18 = vrot.slane %v1617_v58, %v9720_v38  ;;  %v9784_v8 = vrot.slane %v1618_v63, %v9720_v38  ;;  %v991_v19 = vpop.f32.mrb[10].mxu1  ;;  %v9787_v12 = vrot.slane %v1737_v44, %v9720_v38  ;;  %v9790_v25 = vrot.slane %v1738_v56, %v9720_v38  ;;  %v1074_v31 = vpop.f32.mrb[26].mxu0 }
 0x20f   : > { %v9793_v27 = vrot.slane %v1753_v10, %v9720_v38  ;;  %v9796_v30 = vrot.slane %v1754_v62, %v9720_v38  ;;  %v993_v13 = vpop.f32.mrb[11].mxu1  ;;  %v1809_v7 = vcombine.low %v987_v21, %v1070_v22  ;;  %v1810_v54 = vcombine.high %v987_v21, %v1070_v22  ;;  %v1076_v63 = vpop.f32.mrb[27].mxu0 }
 0x210   : > { %12753 = vst [vmem:[#allocation33_spill] sm:$0xff] %v9787_v12  ;;  %12754 = vst [vmem:[#allocation34_spill] sm:$0xff] %v9790_v25  ;;  %v1825_v24 = vcombine.low %v989_v9, %v1072_v37  ;;  %v1826_v58 = vcombine.high %v989_v9, %v1072_v37  ;;  %v1945_v39 = vcombine.low %v991_v19, %v1074_v31 }
 0x211   : > { %12755 = vst [vmem:[#allocation35_spill] sm:$0xff] %v9793_v27  ;;  %12756 = vst [vmem:[#allocation36_spill] sm:$0xff] %v9796_v30  ;;  %v1946_v55 = vcombine.high %v991_v19, %v1074_v31  ;;  %v1961_v44 = vcombine.low %v993_v13, %v1076_v63  ;;  %v1962_v42 = vcombine.high %v993_v13, %v1076_v63 }
 0x212   : > { %v1817_v56 = vrot.slane %v1809_v7, %v9695_v61  ;;  %v1824_v41 = vrot.slane %v1810_v54, %v9695_v61  ;;  %v1833_v10 = vrot.slane %v1825_v24, %v9695_v61  ;;  %v1840_v62 = vrot.slane %v1826_v58, %v9695_v61 }
 0x213   : > { %v1953_v28 = vrot.slane %v1945_v39, %v9695_v61  ;;  %v1960_v30 = vrot.slane %v1946_v55, %v9695_v61  ;;  %v1969_v21 = vrot.slane %v1961_v44, %v9695_v61  ;;  %v1976_v9 = vrot.slane %v1962_v42, %v9695_v61 }
 0x214   : > { %v1873_v22 = vcombine.low %v1817_v56, %v1833_v10  ;;  %v1874_v37 = vcombine.high %v1817_v56, %v1833_v10  ;;  %v1889_v19 = vcombine.low %v1824_v41, %v1840_v62  ;;  %v1890_v31 = vcombine.high %v1824_v41, %v1840_v62  ;;  %v997_v13 = vpop.f32.mrb[12].mxu1  ;;  %v1080_v24 = vpop.f32.mrb[28].mxu0 }
 0x215   : > { %v2009_v7 = vcombine.low %v1953_v28, %v1969_v21  ;;  %v2010_v63 = vcombine.high %v1953_v28, %v1969_v21  ;;  %v2025_v54 = vcombine.low %v1960_v30, %v1976_v9  ;;  %v2026_v27 = vcombine.high %v1960_v30, %v1976_v9  ;;  %v999_v25 = vpop.f32.mrb[13].mxu1  ;;  %v1082_v41 = vpop.f32.mrb[29].mxu0 }
 0x216   : > { %v9807_v58 = vrot.slane %v1873_v22, %v9720_v38  ;;  %v9810_v39 = vrot.slane %v1874_v37, %v9720_v38  ;;  %v9813_v55 = vrot.slane %v1889_v19, %v9720_v38  ;;  %v9816_v42 = vrot.slane %v1890_v31, %v9720_v38  ;;  %v1001_v44 = vpop.f32.mrb[14].mxu1  ;;  %v1084_v62 = vpop.f32.mrb[30].mxu0 }
 0x217   : > { %v9819_v28 = vrot.slane %v2009_v7, %v9720_v38  ;;  %v9822_v30 = vrot.slane %v2010_v63, %v9720_v38  ;;  %v9825_v56 = vrot.slane %v2025_v54, %v9720_v38  ;;  %v9828_v10 = vrot.slane %v2026_v27, %v9720_v38  ;;  %v1003_v21 = vpop.f32.mrb[15].mxu1  ;;  %v1086_v31 = vpop.f32.mrb[31].mxu0 }
 0x218   : > { %12757 = vst [vmem:[#allocation37_spill] sm:$0xff] %v9807_v58  ;;  %12758 = vst [vmem:[#allocation38_spill] sm:$0xff] %v9810_v39  ;;  %v2081_v9 = vcombine.low %v997_v13, %v1080_v24  ;;  %v2082_v22 = vcombine.high %v997_v13, %v1080_v24  ;;  %v2097_v37 = vcombine.low %v999_v25, %v1082_v41 }
 0x219   : > { %12759 = vst [vmem:[#allocation39_spill] sm:$0xff] %v9813_v55  ;;  %12760 = vst [vmem:[#allocation40_spill] sm:$0xff] %v9816_v42  ;;  %v2098_v19 = vcombine.high %v999_v25, %v1082_v41  ;;  %v2217_v42 = vcombine.low %v1001_v44, %v1084_v62  ;;  %v2218_v55 = vcombine.high %v1001_v44, %v1084_v62 }
 0x21a   : > { %12761 = vst [vmem:[#allocation41_spill] sm:$0xff] %v9819_v28  ;;  %12762 = vst [vmem:[#allocation42_spill] sm:$0xff] %v9822_v30  ;;  %v2233_v7 = vcombine.low %v1003_v21, %v1086_v31  ;;  %v2234_v28 = vcombine.high %v1003_v21, %v1086_v31  ;;  %v2089_v63 = vrot.slane %v2081_v9, %v9695_v61 }
 0x21b   : > { %12763 = vst [vmem:[#allocation43_spill] sm:$0xff] %v9825_v56  ;;  %12764 = vst [vmem:[#allocation44_spill] sm:$0xff] %v9828_v10  ;;  %v2096_v30 = vrot.slane %v2082_v22, %v9695_v61  ;;  %v2105_v54 = vrot.slane %v2097_v37, %v9695_v61  ;;  %v2112_v27 = vrot.slane %v2098_v19, %v9695_v61 }
 0x21c   : > { %v2225_v10 = vrot.slane %v2217_v42, %v9695_v61  ;;  %v2232_v56 = vrot.slane %v2218_v55, %v9695_v61  ;;  %v2241_v13 = vrot.slane %v2233_v7, %v9695_v61  ;;  %v2248_v25 = vrot.slane %v2234_v28, %v9695_v61  ;;  %v1007_v21 = vpop.f32.mrb[16].mxu1  ;;  %v1090_v37 = vpop.f32.mrb[32].mxu0 }
 0x21d   : > { %v2145_v24 = vcombine.low %v2089_v63, %v2105_v54  ;;  %v2146_v41 = vcombine.high %v2089_v63, %v2105_v54  ;;  %v2161_v44 = vcombine.low %v2096_v30, %v2112_v27  ;;  %v2162_v62 = vcombine.high %v2096_v30, %v2112_v27  ;;  %v1009_v58 = vpop.f32.mrb[17].mxu1  ;;  %v1092_v30 = vpop.f32.mrb[33].mxu0 }
 0x21e   : > { %v2281_v9 = vcombine.low %v2225_v10, %v2241_v13  ;;  %v2282_v31 = vcombine.high %v2225_v10, %v2241_v13  ;;  %v2297_v22 = vcombine.low %v2232_v56, %v2248_v25  ;;  %v2298_v39 = vcombine.high %v2232_v56, %v2248_v25  ;;  %v1011_v7 = vpop.f32.mrb[18].mxu1  ;;  %v1094_v27 = vpop.f32.mrb[34].mxu0 }
 0x21f   : > { %v9839_v19 = vrot.slane %v2145_v24, %v9720_v38  ;;  %v9842_v55 = vrot.slane %v2146_v41, %v9720_v38  ;;  %v9845_v42 = vrot.slane %v2161_v44, %v9720_v38  ;;  %v9848_v28 = vrot.slane %v2162_v62, %v9720_v38  ;;  %v1013_v13 = vpop.f32.mrb[19].mxu1  ;;  %v1096_v62 = vpop.f32.mrb[35].mxu0 }
 0x220   : > { %v9851_v10 = vrot.slane %v2281_v9, %v9720_v38  ;;  %v9854_v56 = vrot.slane %v2282_v31, %v9720_v38  ;;  %v9857_v63 = vrot.slane %v2297_v22, %v9720_v38  ;;  %v9860_v54 = vrot.slane %v2298_v39, %v9720_v38 }
 0x221   : > { %12765 = vst [vmem:[#allocation45_spill] sm:$0xff] %v9839_v19  ;;  %12766 = vst [vmem:[#allocation46_spill] sm:$0xff] %v9842_v55  ;;  %v2353_v25 = vcombine.low %v1007_v21, %v1090_v37  ;;  %v2354_v24 = vcombine.high %v1007_v21, %v1090_v37  ;;  %v2369_v41 = vcombine.low %v1009_v58, %v1092_v30 }
 0x222   : > { %12767 = vst [vmem:[#allocation47_spill] sm:$0xff] %v9845_v42  ;;  %12768 = vst [vmem:[#allocation48_spill] sm:$0xff] %v9848_v28  ;;  %v2370_v44 = vcombine.high %v1009_v58, %v1092_v30  ;;  %v2489_v28 = vcombine.low %v1011_v7, %v1094_v27  ;;  %v2490_v42 = vcombine.high %v1011_v7, %v1094_v27 }
 0x223   : > { %12769 = vst [vmem:[#allocation49_spill] sm:$0xff] %v9851_v10  ;;  %12770 = vst [vmem:[#allocation50_spill] sm:$0xff] %v9854_v56  ;;  %v2505_v9 = vcombine.low %v1013_v13, %v1096_v62  ;;  %v2506_v10 = vcombine.high %v1013_v13, %v1096_v62  ;;  %v2361_v31 = vrot.slane %v2353_v25, %v9695_v61 }
 0x224   : > { %12771 = vst [vmem:[#allocation51_spill] sm:$0xff] %v9857_v63  ;;  %12772 = vst [vmem:[#allocation52_spill] sm:$0xff] %v9860_v54  ;;  %v2368_v56 = vrot.slane %v2354_v24, %v9695_v61  ;;  %v2377_v22 = vrot.slane %v2369_v41, %v9695_v61  ;;  %v2384_v39 = vrot.slane %v2370_v44, %v9695_v61  ;;  %v1133_v13 = vpop.f32.mrb[20].mxu1  ;;  %v1216_v41 = vpop.f32.mrb[36].mxu0 }
 0x225   : > { %v2497_v54 = vrot.slane %v2489_v28, %v9695_v61  ;;  %v2504_v63 = vrot.slane %v2490_v42, %v9695_v61  ;;  %v2513_v21 = vrot.slane %v2505_v9, %v9695_v61  ;;  %v2520_v58 = vrot.slane %v2506_v10, %v9695_v61  ;;  %v1135_v19 = vpop.f32.mrb[21].mxu1 }
 0x226   : > { %v2417_v37 = vcombine.low %v2361_v31, %v2377_v22  ;;  %v2418_v30 = vcombine.high %v2361_v31, %v2377_v22  ;;  %v2433_v7 = vcombine.low %v2368_v56, %v2384_v39  ;;  %v2434_v27 = vcombine.high %v2368_v56, %v2384_v39  ;;  %v1218_v56 = vpop.f32.mrb[37].mxu0  ;;  %v1137_v9 = vpop.f32.mrb[22].mxu1 }
 0x227   : > { %v2553_v25 = vcombine.low %v2497_v54, %v2513_v21  ;;  %v2554_v62 = vcombine.high %v2497_v54, %v2513_v21  ;;  %v2569_v24 = vcombine.low %v2504_v63, %v2520_v58  ;;  %v2570_v55 = vcombine.high %v2504_v63, %v2520_v58  ;;  %v1220_v39 = vpop.f32.mrb[38].mxu0  ;;  %v1139_v21 = vpop.f32.mrb[23].mxu1 }
 0x228   : > { %v9871_v44 = vrot.slane %v2417_v37, %v9720_v38  ;;  %v9874_v42 = vrot.slane %v2418_v30, %v9720_v38  ;;  %v9877_v28 = vrot.slane %v2433_v7, %v9720_v38  ;;  %v9880_v10 = vrot.slane %v2434_v27, %v9720_v38  ;;  %v1222_v27 = vpop.f32.mrb[39].mxu0 }
 0x229   : > { %v9883_v54 = vrot.slane %v2553_v25, %v9720_v38  ;;  %v9886_v63 = vrot.slane %v2554_v62, %v9720_v38  ;;  %v9889_v31 = vrot.slane %v2569_v24, %v9720_v38  ;;  %v9892_v22 = vrot.slane %v2570_v55, %v9720_v38 }
 0x22a   : > { %12773 = vst [vmem:[#allocation53_spill] sm:$0xff] %v9871_v44  ;;  %12774 = vst [vmem:[#allocation54_spill] sm:$0xff] %v9874_v42  ;;  %v1297_v58 = vcombine.low %v1133_v13, %v1216_v41  ;;  %v1298_v37 = vcombine.high %v1133_v13, %v1216_v41  ;;  %v1313_v30 = vcombine.low %v1135_v19, %v1218_v56 }
 0x22b   : > { %12775 = vst [vmem:[#allocation55_spill] sm:$0xff] %v9877_v28  ;;  %12776 = vst [vmem:[#allocation56_spill] sm:$0xff] %v9880_v10  ;;  %v1314_v7 = vcombine.high %v1135_v19, %v1218_v56  ;;  %v1433_v10 = vcombine.low %v1137_v9, %v1220_v39  ;;  %v1434_v28 = vcombine.high %v1137_v9, %v1220_v39 }
 0x22c   : > { %12777 = vst [vmem:[#allocation57_spill] sm:$0xff] %v9883_v54  ;;  %12778 = vst [vmem:[#allocation58_spill] sm:$0xff] %v9886_v63  ;;  %v1449_v25 = vcombine.low %v1139_v21, %v1222_v27  ;;  %v1450_v54 = vcombine.high %v1139_v21, %v1222_v27  ;;  %v1305_v62 = vrot.slane %v1297_v58, %v9695_v61  ;;  %v9902_v21 = vpop.f32.mrb[24].mxu1  ;;  %v9904_v42 = vpop.f32.mrb[40].mxu0 }
 0x22d   : > { %12779 = vst [vmem:[#allocation59_spill] sm:$0xff] %v9889_v31  ;;  %12780 = vst [vmem:[#allocation60_spill] sm:$0xff] %v9892_v22  ;;  %v1312_v63 = vrot.slane %v1298_v37, %v9695_v61  ;;  %v1321_v24 = vrot.slane %v1313_v30, %v9695_v61  ;;  %v1328_v55 = vrot.slane %v1314_v7, %v9695_v61  ;;  %v9906_v7 = vpop.f32.mrb[25].mxu1 }
 0x22e   : > { %v1441_v22 = vrot.slane %v1433_v10, %v9695_v61  ;;  %v1448_v31 = vrot.slane %v1434_v28, %v9695_v61  ;;  %v1457_v13 = vrot.slane %v1449_v25, %v9695_v61  ;;  %v1464_v19 = vrot.slane %v1450_v54, %v9695_v61 }
 0x22f   : > { %v1361_v41 = vcombine.low %v1305_v62, %v1321_v24  ;;  %v1362_v56 = vcombine.high %v1305_v62, %v1321_v24  ;;  %v1377_v9 = vcombine.low %v1312_v63, %v1328_v55  ;;  %v1378_v39 = vcombine.high %v1312_v63, %v1328_v55  ;;  %v1228_v62 = vpop.f32.mrb[41].mxu0  ;;  %v1147_v63 = vpop.f32.mrb[26].mxu1 }
 0x230   : > { %v1497_v58 = vcombine.low %v1441_v22, %v1457_v13  ;;  %v1498_v37 = vcombine.high %v1441_v22, %v1457_v13  ;;  %v1513_v27 = vcombine.low %v1448_v31, %v1464_v19  ;;  %v1514_v30 = vcombine.high %v1448_v31, %v1464_v19  ;;  %v1230_v13 = vpop.f32.mrb[42].mxu0  ;;  %v1149_v19 = vpop.f32.mrb[27].mxu1 }
 0x231   : > { %v1369_v28 = vrot.slane %v1361_v41, %v9720_v38  ;;  %v1376_v10 = vrot.slane %v1362_v56, %v9720_v38  ;;  %v1385_v54 = vrot.slane %v1377_v9, %v9720_v38  ;;  %v1392_v25 = vrot.slane %v1378_v39, %v9720_v38  ;;  %v1232_v44 = vpop.f32.mrb[43].mxu0 }
 0x232   : > { %v1505_v24 = vrot.slane %v1497_v58, %v9720_v38  ;;  %v1512_v22 = vrot.slane %v1498_v37, %v9720_v38  ;;  %v1521_v31 = vrot.slane %v1513_v27, %v9720_v38  ;;  %v1528_v55 = vrot.slane %v1514_v30, %v9720_v38 }
 0x233   : > { %v1393_v41 = vcombine.low %v9743_v5, %v1369_v28  ;;  %v1394_v56 = vcombine.high %v9743_v5, %v1369_v28  ;;  %v1395_v9 = vcombine.low %v9746_v1, %v1376_v10  ;;  %v1396_v39 = vcombine.high %v9746_v1, %v1376_v10 }
 0x234   : > { %v1397_v12 = vcombine.low %v9749_v17, %v1385_v54  ;;  %v1398_v58 = vcombine.high %v9749_v17, %v1385_v54  ;;  %v1399_v37 = vcombine.low %v9752_v57, %v1392_v25  ;;  %v1400_v27 = vcombine.high %v9752_v57, %v1392_v25 }
 0x235   : > { %v12781_v30 = vrot.slane %v9229_v43, %v8740_v2  ;;  %v12782_v5 = vrot.slane %v9241_v51, %v8740_v2  ;;  %v9935_v1 = vsub.f32 %v9574_v15, %v1395_v9  ;;  %v9938_v10 = vsub.f32 %v9577_v16, %v1396_v39 }
 0x236   : > { %v12783_v17 = vrot.slane %v9238_v50, %v8740_v2  ;;  %v12784_v43 = vrot.slane %v9247_v53, %v8740_v2  ;;  %v9951_v51 = vsub.f32 %v9586_v26, %v1399_v37  ;;  %v9954_v25 = vsub.f32 %v9593_v34, %v1400_v27  ;;  %v9966_v34 = vpop.f32.mrb[44].mxu0 }
 0x237   : > { %v9927_v20 = vsub.f32 %v12781_v30, %v1393_v41  ;;  %v9932_v28 = vsub.f32 %v12782_v5, %v1394_v56  ;;  %v1529_v15 = vcombine.low %v9755_v3, %v1505_v24  ;;  %v1530_v16 = vcombine.high %v9755_v3, %v1505_v24 }
 0x238   : > { %v9943_v57 = vsub.f32 %v12783_v17, %v1397_v12  ;;  %v9948_v54 = vsub.f32 %v12784_v43, %v1398_v58  ;;  %v1531_v41 = vcombine.low %v9758_v4, %v1512_v22  ;;  %v1532_v50 = vcombine.high %v9758_v4, %v1512_v22  ;;  %v9960_v12 = vpop.f32.mrb[28].mxu1 }
 0x239   : > { %v1533_v53 = vcombine.low %v9763_v23, %v1521_v31  ;;  %v1534_v56 = vcombine.high %v9763_v23, %v1521_v31  ;;  %v1535_v26 = vcombine.low %v9766_v32, %v1528_v55  ;;  %v1536_v9 = vcombine.high %v9766_v32, %v1528_v55  ;;  %v9968_v39 = vpop.f32.mrb[29].mxu1  ;;  %v9986_v32 = vpop.f32.mrb[45].mxu0 }
 0x23a   : > { %v12785_v3 = vrot.slane %v9225_v40, %v8740_v2  ;;  %v12786_v4 = vrot.slane %v9235_v47, %v8740_v2  ;;  %v9981_v23 = vsub.f32 %v9541_v59, %v1531_v41  ;;  %v9984_v31 = vsub.f32 %v9548_v0, %v1532_v50  ;;  %v9988_v55 = vpop.f32.mrb[30].mxu1  ;;  %v10006_v27 = vpop.f32.mrb[46].mxu0 }
 0x23b   : > { %v12787_v40 = vrot.slane %v9232_v46, %v8740_v2  ;;  %v12788_v47 = vrot.slane %v9244_v52, %v8740_v2  ;;  %v10001_v59 = vsub.f32 %v9557_v6, %v1535_v26  ;;  %v10004_v0 = vsub.f32 %v9566_v11, %v1536_v9  ;;  %v10008_v30 = vpop.f32.mrb[31].mxu1  ;;  %v10016_v43 = vpop.f32.mrb[47].mxu0 }
 0x23c   : > { %v9973_v24 = vsub.f32 %v12785_v3, %v1529_v15  ;;  %v9978_v22 = vsub.f32 %v12786_v4, %v1530_v16  ;;  %v1569_v46 = vcombine.low %v9902_v21, %v9904_v42  ;;  %v1570_v5 = vcombine.high %v9902_v21, %v9904_v42 }
 0x23d   : > { %v9993_v58 = vsub.f32 %v12787_v40, %v1533_v53  ;;  %v9998_v37 = vsub.f32 %v12788_v47, %v1534_v56  ;;  %12789 = vst [vmem:[#allocation61_spill] sm:$0xff] %v10001_v59  ;;  %12790 = vst [vmem:[#allocation62_spill] sm:$0xff] %v10004_v0  ;;  %v1585_v52 = vcombine.low %v9906_v7, %v1228_v62  ;;  %v10028_v47 = vpop.f32.mrb[48].mxu0 }
 0x23e   : > { %v1586_v17 = vcombine.high %v9906_v7, %v1228_v62  ;;  %v1705_v6 = vcombine.low %v1147_v63, %v1230_v13  ;;  %v1706_v15 = vcombine.high %v1147_v63, %v1230_v13  ;;  %v1721_v11 = vcombine.low %v1149_v19, %v1232_v44 }
 0x23f   : > { %v1722_v16 = vcombine.high %v1149_v19, %v1232_v44  ;;  %v1577_v41 = vrot.slane %v1569_v46, %v9695_v61  ;;  %v1584_v50 = vrot.slane %v1570_v5, %v9695_v61  ;;  %v1593_v53 = vrot.slane %v1585_v52, %v9695_v61  ;;  %v10026_v19 = vpop.f32.mrb[32].mxu1 }
 0x240   : > { %v1600_v56 = vrot.slane %v1586_v17, %v9695_v61  ;;  %v1713_v42 = vrot.slane %v1705_v6, %v9695_v61  ;;  %v1720_v21 = vrot.slane %v1706_v15, %v9695_v61  ;;  %v1729_v7 = vrot.slane %v1721_v11, %v9695_v61  ;;  %v10030_v46 = vpop.f32.mrb[33].mxu1  ;;  %v10036_v15 = vpop.f32.mrb[49].mxu0 }
 0x241   : > { %v1736_v62 = vrot.slane %v1722_v16, %v9695_v61  ;;  %v1633_v26 = vcombine.low %v1577_v41, %v1593_v53  ;;  %v1634_v63 = vcombine.high %v1577_v41, %v1593_v53  ;;  %v10038_v11 = vpop.f32.mrb[34].mxu1 }
 0x242   : > { %v1649_v13 = vcombine.low %v1584_v50, %v1600_v56  ;;  %v1650_v44 = vcombine.high %v1584_v50, %v1600_v56  ;;  %v1769_v9 = vcombine.low %v1713_v42, %v1729_v7  ;;  %v1770_v3 = vcombine.high %v1713_v42, %v1729_v7  ;;  %v10044_v56 = vpop.f32.mrb[50].mxu0  ;;  %v10046_v42 = vpop.f32.mrb[35].mxu1 }
 0x243   : > { %v1785_v4 = vcombine.low %v1720_v21, %v1736_v62  ;;  %v1786_v40 = vcombine.high %v1720_v21, %v1736_v62  ;;  %v1641_v5 = vrot.slane %v1633_v26, %v9720_v38  ;;  %v1648_v52 = vrot.slane %v1634_v63, %v9720_v38  ;;  %v10052_v63 = vpop.f32.mrb[51].mxu0 }
 0x244   : > { %v1657_v17 = vrot.slane %v1649_v13, %v9720_v38  ;;  %v1664_v6 = vrot.slane %v1650_v44, %v9720_v38  ;;  %v1777_v16 = vrot.slane %v1769_v9, %v9720_v38  ;;  %v1784_v41 = vrot.slane %v1770_v3, %v9720_v38 }
 0x245   : > { %v1793_v50 = vrot.slane %v1785_v4, %v9720_v38  ;;  %v1800_v53 = vrot.slane %v1786_v40, %v9720_v38  ;;  %v1665_v21 = vcombine.low %v9775_v60, %v1641_v5  ;;  %v1666_v7 = vcombine.high %v9775_v60, %v1641_v5 }
 0x246   : > { %v1667_v62 = vcombine.low %v9778_v36, %v1648_v52  ;;  %v1668_v26 = vcombine.high %v9778_v36, %v1648_v52  ;;  %v1669_v13 = vcombine.low %v9781_v18, %v1657_v17  ;;  %v1670_v44 = vcombine.high %v9781_v18, %v1657_v17 }
 0x247   : > { %v1671_v9 = vcombine.low %v9784_v8, %v1664_v6  ;;  %v1672_v3 = vcombine.high %v9784_v8, %v1664_v6  ;;  %v12791_v4 = vrot.slane %v9277_v33, %v8740_v2  ;;  %v12793_v60 = vrot.slane %v9312_v48, %v8740_v2  ;;  %v12802_v6 = vld [vmem:[#allocation22_spill] sm:$0xff] }
 0x248   : > { %v10069_v36 = vsub.f32 %v9645_v14, %v1667_v62  ;;  %v10072_v52 = vsub.f32 %v9648_v29, %v1668_v26  ;;  %v12797_v18 = vrot.slane %v9309_v45, %v8740_v2  ;;  %v12799_v33 = vrot.slane %v9338_v49, %v8740_v2  ;;  %v12804_v14 = vld [vmem:[#allocation33_spill] sm:$0xff]  ;;  %v12805_v62 = vld [vmem:[#allocation34_spill] sm:$0xff] }
 0x249   : > { %v10061_v40 = vsub.f32 %v12791_v4, %v1665_v21  ;;  %v10066_v5 = vsub.f32 %v12793_v60, %v1666_v7  ;;  %v10085_v48 = vsub.f32 %v9669_v35, %v1671_v9  ;;  %v10088_v21 = vsub.f32 %v12802_v6, %v1672_v3  ;;  %v12806_v4 = vld [vmem:[#allocation35_spill] sm:$0xff]  ;;  %v12807_v60 = vld [vmem:[#allocation36_spill] sm:$0xff]  ;;  %v10100_v3 = vpop.f32.mrb[52].mxu0 }
 0x24a   : > { %12795 = vst [vmem:[#allocation65_spill] sm:$0xff] %v10069_v36  ;;  %12796 = vst [vmem:[#allocation66_spill] sm:$0xff] %v10072_v52  ;;  %v10077_v8 = vsub.f32 %v12797_v18, %v1669_v13  ;;  %v10082_v17 = vsub.f32 %v12799_v33, %v1670_v44  ;;  %v1801_v7 = vcombine.low %v12804_v14, %v1777_v16  ;;  %v10094_v13 = vpop.f32.mrb[36].mxu1  ;;  %v12808_v33 = vld [vmem:[#allocation8_spill] sm:$0xff] }
 0x24b   : > { %12792 = vst [vmem:[#allocation63_spill] sm:$0xff] %v10061_v40  ;;  %12794 = vst [vmem:[#allocation64_spill] sm:$0xff] %v10066_v5  ;;  %v1802_v29 = vcombine.high %v12804_v14, %v1777_v16  ;;  %v1803_v26 = vcombine.low %v12805_v62, %v1784_v41  ;;  %v1804_v45 = vcombine.high %v12805_v62, %v1784_v41  ;;  %v10102_v18 = vpop.f32.mrb[37].mxu1  ;;  %v12811_v41 = vld [vmem:[#allocation10_spill] sm:$0xff] }
 0x24c   : > { %12798 = vst [vmem:[#allocation67_spill] sm:$0xff] %v10077_v8  ;;  %12800 = vst [vmem:[#allocation68_spill] sm:$0xff] %v10082_v17  ;;  %v1805_v49 = vcombine.low %v12806_v4, %v1793_v50  ;;  %v1806_v44 = vcombine.high %v12806_v4, %v1793_v50  ;;  %v1807_v35 = vcombine.low %v12807_v60, %v1800_v53  ;;  %v12816_v4 = vld [vmem:[#allocation13_spill] sm:$0xff] }
 0x24d   : > { %12801 = vst [vmem:[#allocation69_spill] sm:$0xff] %v10085_v48  ;;  %12803 = vst [vmem:[#allocation22_spill] sm:$0xff] %v10088_v21  ;;  %v1808_v9 = vcombine.high %v12807_v60, %v1800_v53  ;;  %v12809_v16 = vrot.slane %v12808_v33, %v8740_v2  ;;  %v12812_v14 = vrot.slane %v12811_v41, %v8740_v2  ;;  %v12814_v21 = vld [vmem:[#allocation12_spill] sm:$0xff]  ;;  %v10120_v53 = vpop.f32.mrb[53].mxu0  ;;  %v10122_v60 = vpop.f32.mrb[38].mxu1  ;;  %v12818_v17 = vld [vmem:[#allocation9_spill] sm:$0xff] }
 0x24e   : > { %v10115_v50 = vsub.f32 %v12814_v21, %v1803_v26  ;;  %v10118_v48 = vsub.f32 %v12816_v4, %v1804_v45  ;;  %v12819_v33 = vrot.slane %v12818_v17, %v8740_v2  ;;  %v12826_v26 = vld [vmem:[#allocation19_spill] sm:$0xff]  ;;  %v10140_v4 = vpop.f32.mrb[54].mxu0  ;;  %v1841_v17 = vcombine.low %v9960_v12, %v9966_v34 }
 0x24f   : > { %v10107_v6 = vsub.f32 %v12809_v16, %v1801_v7  ;;  %v10112_v62 = vsub.f32 %v12812_v14, %v1802_v29  ;;  %v12821_v16 = vld [vmem:[#allocation11_spill] sm:$0xff]  ;;  %v12824_v14 = vld [vmem:[#allocation14_spill] sm:$0xff]  ;;  %v10138_v45 = vsub.f32 %v12826_v26, %v1808_v9  ;;  %v1977_v9 = vcombine.low %v9988_v55, %v10006_v27 }
 0x250   : > { %12815 = vst [vmem:[#allocation35_spill] sm:$0xff] %v10115_v50  ;;  %12817 = vst [vmem:[#allocation36_spill] sm:$0xff] %v10118_v48  ;;  %v10127_v7 = vsub.f32 %v12819_v33, %v1805_v49  ;;  %v12822_v41 = vrot.slane %v12821_v16, %v8740_v2  ;;  %v10135_v21 = vsub.f32 %v12824_v14, %v1807_v35  ;;  %v10142_v48 = vpop.f32.mrb[39].mxu1  ;;  %v10152_v33 = vpop.f32.mrb[55].mxu0 }
 0x251   : > { %12810 = vst [vmem:[#allocation33_spill] sm:$0xff] %v10107_v6  ;;  %12813 = vst [vmem:[#allocation34_spill] sm:$0xff] %v10112_v62  ;;  %v1842_v49 = vcombine.high %v9960_v12, %v9966_v34  ;;  %v1858_v35 = vcombine.high %v9968_v39, %v9986_v32  ;;  %v1978_v16 = vcombine.high %v9988_v55, %v10006_v27 }
 0x252   : > { %12820 = vst [vmem:[#allocation8_spill] sm:$0xff] %v10127_v7  ;;  %v10132_v29 = vsub.f32 %v12822_v41, %v1806_v44  ;;  %12825 = vst [vmem:[#allocation12_spill] sm:$0xff] %v10135_v21  ;;  %v1857_v44 = vcombine.low %v9968_v39, %v9986_v32  ;;  %v1993_v41 = vcombine.low %v10008_v30, %v10016_v43 }
 0x253   : > { %12827 = vst [vmem:[#allocation13_spill] sm:$0xff] %v10138_v45  ;;  %v1994_v12 = vcombine.high %v10008_v30, %v10016_v43  ;;  %v1849_v34 = vrot.slane %v1841_v17, %v9695_v61  ;;  %v1856_v14 = vrot.slane %v1842_v49, %v9695_v61  ;;  %v1872_v32 = vrot.slane %v1858_v35, %v9695_v61 }
 0x254   : > { %12823 = vst [vmem:[#allocation10_spill] sm:$0xff] %v10132_v29  ;;  %v1865_v39 = vrot.slane %v1857_v44, %v9695_v61  ;;  %v1985_v26 = vrot.slane %v1977_v9, %v9695_v61  ;;  %v1992_v45 = vrot.slane %v1978_v16, %v9695_v61  ;;  %v2001_v55 = vrot.slane %v1993_v41, %v9695_v61 }
 0x255   : > { %v2008_v27 = vrot.slane %v1994_v12, %v9695_v61  ;;  %v1921_v7 = vcombine.low %v1856_v14, %v1872_v32  ;;  %v1922_v30 = vcombine.high %v1856_v14, %v1872_v32  ;;  %v12833_v14 = vld [vmem:[#allocation38_spill] sm:$0xff]  ;;  %v2250_v62 = vcombine.high %v10038_v11, %v10044_v56 }
 0x256   : > { %v1905_v21 = vcombine.low %v1849_v34, %v1865_v39  ;;  %v1906_v29 = vcombine.high %v1849_v34, %v1865_v39  ;;  %v2041_v43 = vcombine.low %v1985_v26, %v2001_v55  ;;  %v2042_v17 = vcombine.high %v1985_v26, %v2001_v55  ;;  %v12834_v26 = vld [vmem:[#allocation39_spill] sm:$0xff] }
 0x257   : > { %v2057_v50 = vcombine.low %v1992_v45, %v2008_v27  ;;  %v2058_v49 = vcombine.high %v1992_v45, %v2008_v27  ;;  %v10177_v9 = vrot.slane %v1921_v7, %v9720_v38  ;;  %v10180_v16 = vrot.slane %v1922_v30, %v9720_v38  ;;  %v12835_v27 = vld [vmem:[#allocation40_spill] sm:$0xff] }
 0x258   : > { %v10171_v44 = vrot.slane %v1905_v21, %v9720_v38  ;;  %v10174_v35 = vrot.slane %v1906_v29, %v9720_v38  ;;  %v10183_v41 = vrot.slane %v2041_v43, %v9720_v38  ;;  %v10186_v12 = vrot.slane %v2042_v17, %v9720_v38  ;;  %v12832_v29 = vld [vmem:[#allocation37_spill] sm:$0xff] }
 0x259   : > { %v10189_v45 = vrot.slane %v2057_v50, %v9720_v38  ;;  %v10192_v21 = vrot.slane %v2058_v49, %v9720_v38  ;;  %v2113_v39 = vcombine.low %v10026_v19, %v10028_v47  ;;  %v2114_v7 = vcombine.high %v10026_v19, %v10028_v47  ;;  %v12880_v50 = vld [vmem:[#allocation25_spill] sm:$0xff] }
 0x25a   : > { %12828 = vst [vmem:[#allocation9_spill] sm:$0xff] %v10183_v41  ;;  %12829 = vst [vmem:[#allocation11_spill] sm:$0xff] %v10186_v12  ;;  %v2129_v55 = vcombine.low %v10030_v46, %v10036_v15  ;;  %v2130_v34 = vcombine.high %v10030_v46, %v10036_v15  ;;  %v2249_v30 = vcombine.low %v10038_v11, %v10044_v56 }
 0x25b   : > { %12830 = vst [vmem:[#allocation14_spill] sm:$0xff] %v10189_v45  ;;  %12831 = vst [vmem:[#allocation19_spill] sm:$0xff] %v10192_v21  ;;  %v2265_v49 = vcombine.low %v10046_v42, %v10052_v63  ;;  %v2266_v6 = vcombine.high %v10046_v42, %v10052_v63  ;;  %v2121_v19 = vrot.slane %v2113_v39, %v9695_v61  ;;  %v12878_v45 = vld [vmem:[#allocation17_spill] sm:$0xff] }
 0x25c   : > { %v2128_v47 = vrot.slane %v2114_v7, %v9695_v61  ;;  %v2137_v8 = vrot.slane %v2129_v55, %v9695_v61  ;;  %v2144_v46 = vrot.slane %v2130_v34, %v9695_v61  ;;  %v2257_v15 = vrot.slane %v2249_v30, %v9695_v61 }
 0x25d   : > { %v2264_v52 = vrot.slane %v2250_v62, %v9695_v61  ;;  %v2273_v11 = vrot.slane %v2265_v49, %v9695_v61  ;;  %v2280_v56 = vrot.slane %v2266_v6, %v9695_v61  ;;  %v2402_v49 = vcombine.high %v10102_v18, %v10120_v53 }
 0x25e   : > { %v2177_v36 = vcombine.low %v2121_v19, %v2137_v8  ;;  %v2178_v5 = vcombine.high %v2121_v19, %v2137_v8  ;;  %v2193_v40 = vcombine.low %v2128_v47, %v2144_v46  ;;  %v2194_v42 = vcombine.high %v2128_v47, %v2144_v46  ;;  %v12875_v19 = vld [vmem:[#allocation60_spill] sm:$0xff] }
 0x25f   : > { %v2313_v63 = vcombine.low %v2257_v15, %v2273_v11  ;;  %v2314_v39 = vcombine.high %v2257_v15, %v2273_v11  ;;  %v2329_v21 = vcombine.low %v2264_v52, %v2280_v56  ;;  %v2330_v7 = vcombine.high %v2264_v52, %v2280_v56  ;;  %v12862_v56 = vld [vmem:[#allocation23_spill] sm:$0xff] }
 0x260   : > { %v10251_v55 = vrot.slane %v2177_v36, %v9720_v38  ;;  %v10254_v34 = vrot.slane %v2178_v5, %v9720_v38  ;;  %v10257_v62 = vrot.slane %v2193_v40, %v9720_v38  ;;  %v10260_v30 = vrot.slane %v2194_v42, %v9720_v38  ;;  %v12876_v5 = vld [vmem:[#allocation15_spill] sm:$0xff] }
 0x261   : > { %v10263_v8 = vrot.slane %v2313_v63, %v9720_v38  ;;  %v10266_v6 = vrot.slane %v2314_v39, %v9720_v38  ;;  %v10269_v52 = vrot.slane %v2329_v21, %v9720_v38  ;;  %v10272_v36 = vrot.slane %v2330_v7, %v9720_v38  ;;  %v12860_v39 = vld [vmem:[#allocation20_spill] sm:$0xff] }
 0x262   : > { %12840 = vst [vmem:[#allocation37_spill] sm:$0xff] %v10251_v55  ;;  %12841 = vst [vmem:[#allocation38_spill] sm:$0xff] %v10254_v34  ;;  %v2385_v47 = vcombine.low %v10094_v13, %v10100_v3  ;;  %v2386_v40 = vcombine.high %v10094_v13, %v10100_v3  ;;  %v2401_v11 = vcombine.low %v10102_v18, %v10120_v53 }
 0x263   : > { %12842 = vst [vmem:[#allocation39_spill] sm:$0xff] %v10257_v62  ;;  %12843 = vst [vmem:[#allocation40_spill] sm:$0xff] %v10260_v30  ;;  %v2521_v42 = vcombine.low %v10122_v60, %v10140_v4  ;;  %v2522_v30 = vcombine.high %v10122_v60, %v10140_v4  ;;  %v2537_v7 = vcombine.low %v10142_v48, %v10152_v33  ;;  %v12864_v62 = vld [vmem:[#allocation29_spill] sm:$0xff] }
 0x264   : > { %12844 = vst [vmem:[#allocation70_spill] sm:$0xff] %v10263_v8  ;;  %12845 = vst [vmem:[#allocation71_spill] sm:$0xff] %v10266_v6  ;;  %v2393_v13 = vrot.slane %v2385_v47, %v9695_v61  ;;  %v2400_v3 = vrot.slane %v2386_v40, %v9695_v61  ;;  %v2409_v63 = vrot.slane %v2401_v11, %v9695_v61 }
 0x265   : > { %12846 = vst [vmem:[#allocation72_spill] sm:$0xff] %v10269_v52  ;;  %12847 = vst [vmem:[#allocation73_spill] sm:$0xff] %v10272_v36  ;;  %v2538_v36 = vcombine.high %v10142_v48, %v10152_v33  ;;  %v2416_v18 = vrot.slane %v2402_v49, %v9695_v61  ;;  %v2529_v53 = vrot.slane %v2521_v42, %v9695_v61 }
 0x266   : > { %v2536_v52 = vrot.slane %v2522_v30, %v9695_v61  ;;  %v2545_v60 = vrot.slane %v2537_v7, %v9695_v61  ;;  %v2449_v21 = vcombine.low %v2393_v13, %v2409_v63  ;;  %v2450_v6 = vcombine.high %v2393_v13, %v2409_v63 }
 0x267   : > { %v2552_v4 = vrot.slane %v2538_v36, %v9695_v61  ;;  %v2465_v46 = vcombine.low %v2400_v3, %v2416_v18  ;;  %v2466_v48 = vcombine.high %v2400_v3, %v2416_v18  ;;  %v12856_v3 = vld [vmem:[#allocation53_spill] sm:$0xff]  ;;  %v12877_v43 = vrot.slane %v12876_v5, %v8740_v2 }
 0x268   : > { %v2585_v33 = vcombine.low %v2529_v53, %v2545_v60  ;;  %v2586_v47 = vcombine.high %v2529_v53, %v2545_v60  ;;  %v2457_v11 = vrot.slane %v2449_v21, %v9720_v38  ;;  %v2464_v49 = vrot.slane %v2450_v6, %v9720_v38  ;;  %v12857_v53 = vld [vmem:[#allocation54_spill] sm:$0xff]  ;;  %v12858_v60 = vld [vmem:[#allocation55_spill] sm:$0xff] }
 0x269   : > { %v2601_v8 = vcombine.low %v2536_v52, %v2552_v4  ;;  %v2602_v40 = vcombine.high %v2536_v52, %v2552_v4  ;;  %v2473_v42 = vrot.slane %v2465_v46, %v9720_v38  ;;  %v2480_v30 = vrot.slane %v2466_v48, %v9720_v38  ;;  %v12859_v48 = vld [vmem:[#allocation56_spill] sm:$0xff] }
 0x26a   : > { %v2593_v7 = vrot.slane %v2585_v33, %v9720_v38  ;;  %v2600_v36 = vrot.slane %v2586_v47, %v9720_v38  ;;  %v2481_v18 = vcombine.low %v12856_v3, %v2457_v11  ;;  %v2482_v52 = vcombine.high %v12856_v3, %v2457_v11 }
 0x26b   : > { %v2609_v63 = vrot.slane %v2601_v8, %v9720_v38  ;;  %v2616_v13 = vrot.slane %v2602_v40, %v9720_v38  ;;  %v2483_v21 = vcombine.low %v12857_v53, %v2464_v49  ;;  %v2484_v6 = vcombine.high %v12857_v53, %v2464_v49  ;;  %v12865_v53 = vld [vmem:[#allocation30_spill] sm:$0xff] }
 0x26c   : > { %v2485_v46 = vcombine.low %v12858_v60, %v2473_v42  ;;  %v2486_v4 = vcombine.high %v12858_v60, %v2473_v42  ;;  %v2487_v33 = vcombine.low %v12859_v48, %v2480_v30  ;;  %v2488_v47 = vcombine.high %v12859_v48, %v2480_v30  ;;  %v12866_v42 = vld [vmem:[#allocation21_spill] sm:$0xff]  ;;  %v12868_v48 = vld [vmem:[#allocation24_spill] sm:$0xff] }
 0x26d   : > { %v12861_v8 = vrot.slane %v12860_v39, %v8740_v2  ;;  %v12863_v11 = vrot.slane %v12862_v56, %v8740_v2  ;;  %v10357_v49 = vsub.f32 %v12864_v62, %v2483_v21  ;;  %v10360_v15 = vsub.f32 %v12865_v53, %v2484_v6 }
 0x26e   : > { %v12867_v60 = vrot.slane %v12866_v42, %v8740_v2  ;;  %v12869_v39 = vrot.slane %v12868_v48, %v8740_v2  ;;  %v12872_v42 = vld [vmem:[#allocation57_spill] sm:$0xff]  ;;  %v2624_v55 = vcombine.high %v12875_v19, %v2616_v13 }
 0x26f   : > { %v10349_v40 = vsub.f32 %v12861_v8, %v2481_v18  ;;  %v10354_v3 = vsub.f32 %v12863_v11, %v2482_v52  ;;  %v12870_v8 = vld [vmem:[#allocation31_spill] sm:$0xff]  ;;  %v12871_v52 = vld [vmem:[#allocation32_spill] sm:$0xff]  ;;  %v2618_v48 = vcombine.high %v12872_v42, %v2593_v7 }
 0x270   : > { %v10365_v30 = vsub.f32 %v12867_v60, %v2485_v46  ;;  %v10370_v18 = vsub.f32 %v12869_v39, %v2486_v4  ;;  %v10373_v56 = vsub.f32 %v12870_v8, %v2487_v33  ;;  %v10376_v11 = vsub.f32 %v12871_v52, %v2488_v47  ;;  %v12873_v39 = vld [vmem:[#allocation58_spill] sm:$0xff]  ;;  %v12874_v46 = vld [vmem:[#allocation59_spill] sm:$0xff] }
 0x271   : > { %v2821_v62 = vcombine.low %v10349_v40, %v10357_v49  ;;  %v2837_v6 = vcombine.low %v10354_v3, %v10360_v15  ;;  %v2617_v60 = vcombine.low %v12872_v42, %v2593_v7  ;;  %v2619_v8 = vcombine.low %v12873_v39, %v2600_v36 }
 0x272   : > { %v2853_v4 = vcombine.low %v10365_v30, %v10373_v56  ;;  %v2869_v47 = vcombine.low %v10370_v18, %v10376_v11  ;;  %v2620_v52 = vcombine.high %v12873_v39, %v2600_v36  ;;  %v2621_v21 = vcombine.low %v12874_v46, %v2609_v63  ;;  %v12881_v39 = vld [vmem:[#allocation27_spill] sm:$0xff] }
 0x273   : > { %v2622_v34 = vcombine.high %v12874_v46, %v2609_v63  ;;  %v2623_v33 = vcombine.low %v12875_v19, %v2616_v13  ;;  %v10405_v53 = vsub.f32 %v12877_v43, %v2617_v60  ;;  %v12879_v7 = vrot.slane %v12878_v45, %v8740_v2  ;;  %v12882_v63 = vld [vmem:[#allocation16_spill] sm:$0xff]  ;;  %v12884_v13 = vld [vmem:[#allocation18_spill] sm:$0xff] }
 0x274   : > { %v10413_v36 = vsub.f32 %v12880_v50, %v2619_v8  ;;  %v10416_v12 = vsub.f32 %v12881_v39, %v2620_v52  ;;  %v12883_v46 = vrot.slane %v12882_v63, %v8740_v2  ;;  %v12885_v43 = vrot.slane %v12884_v13, %v8740_v2  ;;  %v12886_v60 = vld [vmem:[#allocation26_spill] sm:$0xff]  ;;  %v10458_v2 = vpop.permute.xlu0 %3097 }
 0x275   : > { %v10410_v42 = vsub.f32 %v12879_v7, %v2618_v48  ;;  %v10429_v45 = vsub.f32 %v12886_v60, %v2623_v33  ;;  %v12887_v48 = vld [vmem:[#allocation28_spill] sm:$0xff]  ;;  %v2829_v39 = vrot.slane %v2821_v62, %v9695_v61  ;;  %v2845_v63 = vrot.slane %v2837_v6, %v9695_v61 }
 0x276   : > { %v10421_v19 = vsub.f32 %v12883_v46, %v2621_v21  ;;  %v10426_v5 = vsub.f32 %v12885_v43, %v2622_v34  ;;  %v10432_v7 = vsub.f32 %v12887_v48, %v2624_v55  ;;  %v2957_v50 = vcombine.low %v10405_v53, %v10413_v36 }
 0x277   : > { %v2973_v21 = vcombine.low %v10410_v42, %v10416_v12  ;;  %v2861_v46 = vrot.slane %v2853_v4, %v9695_v61  ;;  %v2877_v13 = vrot.slane %v2869_v47, %v9695_v61  ;;  %v2885_v8 = vcombine.low %v2829_v39, %v2845_v63 }
 0x278   : > { %v2989_v34 = vcombine.low %v10421_v19, %v10429_v45  ;;  %v3005_v55 = vcombine.low %v10426_v5, %v10432_v7  ;;  %v2965_v43 = vrot.slane %v2957_v50, %v9695_v61  ;;  %v2886_v32 = vcombine.high %v2829_v39, %v2845_v63 }
 0x279   : > { %v2981_v60 = vrot.slane %v2973_v21, %v9695_v61  ;;  %v2917_v52 = vcombine.low %v2861_v46, %v2877_v13  ;;  %v2918_v62 = vcombine.high %v2861_v46, %v2877_v13  ;;  %v2893_v47 = vrot.slane %v2885_v8, %v9720_v38 }
 0x27a   : > { %v2997_v48 = vrot.slane %v2989_v34, %v9695_v61  ;;  %v3013_v33 = vrot.slane %v3005_v55, %v9695_v61  ;;  %v2900_v21 = vrot.slane %v2886_v32, %v9720_v38 }
 0x27b   : > { %v3021_v41 = vcombine.low %v2965_v43, %v2981_v60  ;;  %v3022_v17 = vcombine.high %v2965_v43, %v2981_v60  ;;  %v2925_v50 = vrot.slane %v2917_v52, %v9720_v38  ;;  %v2932_v34 = vrot.slane %v2918_v62, %v9720_v38 }
 0x27c   : > { %v3053_v6 = vcombine.low %v2997_v48, %v3013_v33  ;;  %v3054_v4 = vcombine.high %v2997_v48, %v3013_v33  ;;  %v10468_v48 = vpop.permute.xlu0 %3102 }
 0x27d   : > { %v3029_v55 = vrot.slane %v3021_v41, %v9720_v38  ;;  %v3036_v59 = vrot.slane %v3022_v17, %v9720_v38  ;;  %v2950_v63 = vcombine.high %v2893_v47, %v2925_v50  ;;  %v2952_v46 = vcombine.high %v2900_v21, %v2932_v34 }
 0x27e   : > { %v3061_v0 = vrot.slane %v3053_v6, %v9720_v38  ;;  %v3068_v39 = vrot.slane %v3054_v4, %v9720_v38  ;;  %v2949_v13 = vcombine.low %v2893_v47, %v2925_v50  ;;  %v2951_v33 = vcombine.low %v2900_v21, %v2932_v34 }
 0x27f   : > { %v3106_v32 = vadd.f32 %v10458_v2, %v2950_v63  ;;  %v3108_v41 = vadd.f32 %v10458_v2, %v2952_v46 }
 0x280   : > { %v3086_v43 = vcombine.high %v3029_v55, %v3061_v0  ;;  %v3088_v8 = vcombine.high %v3036_v59, %v3068_v39  ;;  %v3085_v60 = vcombine.low %v3029_v55, %v3061_v0  ;;  %v3087_v52 = vcombine.low %v3036_v59, %v3068_v39 }
 0x281   : > { %v3105_v62 = vadd.f32 %v10458_v2, %v2949_v13  ;;  %v3107_v17 = vadd.f32 %v10458_v2, %v2951_v33  ;;  %v3122_v0 = vmax.f32 %v3106_v32, 0.0  ;;  %v3124_v59 = vmax.f32 %v3108_v41, 0.0 }
 0x282   : > { %v3114_v6 = vadd.f32 %v10468_v48, %v3086_v43  ;;  %v3116_v4 = vadd.f32 %v10468_v48, %v3088_v8  ;;  %v3113_v47 = vadd.f32 %v10468_v48, %v3085_v60  ;;  %v3115_v50 = vadd.f32 %v10468_v48, %v3087_v52 }
 0x283   : > { %v3121_v21 = vmax.f32 %v3105_v62, 0.0  ;;  %v3123_v34 = vmax.f32 %v3107_v17, 0.0  ;;  %v12888_v13 = vcombine.high %v10349_v40, %v10357_v49  ;;  %v12889_v43 = vcombine.high %v10354_v3, %v10360_v15 }
 0x284   : > { %v3130_v55 = vmax.f32 %v3114_v6, 0.0  ;;  %v3132_v39 = vmax.f32 %v3116_v4, 0.0  ;;  %v3129_v63 = vmax.f32 %v3113_v47, 0.0  ;;  %v3131_v46 = vmax.f32 %v3115_v50, 0.0 }
 0x285   : > { %v2836_v33 = vrot.slane %v12888_v13, %v9695_v61  ;;  %v2852_v8 = vrot.slane %v12889_v43, %v9695_v61  ;;  %v12890_v60 = vcombine.high %v10365_v30, %v10373_v56  ;;  %v12891_v32 = vcombine.high %v10370_v18, %v10376_v11 }
 0x286   : > { %v8215_v62 = vpack.c.bf16 %v3130_v55, %v3122_v0  ;;  %v8219_v17 = vpack.c.bf16 %v3132_v39, %v3124_v59  ;;  %v8217_v6 = vpack.c.bf16 %v3129_v63, %v3121_v21  ;;  %v8221_v40 = vpack.c.bf16 %v3131_v46, %v3123_v34 }
 0x287   : > { %v2868_v52 = vrot.slane %v12890_v60, %v9695_v61  ;;  %v2884_v41 = vrot.slane %v12891_v32, %v9695_v61  ;;  %v2901_v49 = vcombine.low %v2836_v33, %v2852_v8  ;;  %v12892_v15 = vcombine.high %v10405_v53, %v10413_v36  ;;  %v10512_v36 = vld [vmem:[#allocation2 + $0x70] sm:$0xff] }
 0x288   : > { %v12893_v30 = vcombine.high %v10410_v42, %v10416_v12  ;;  %8216 = vmatprep.subr.bf16.mxu1 %v8215_v62  ;;  %8220 = vmatprep.subr.bf16.mxu0 %v8219_v17  ;;  %v12894_v18 = vcombine.high %v10421_v19, %v10429_v45  ;;  %v12895_v47 = vcombine.high %v10426_v5, %v10432_v7  ;;  %v12639_v34 = vmov 0.0  }
 0x289   : > { %v2933_v4 = vcombine.low %v2868_v52, %v2884_v41  ;;  %v2972_v3 = vrot.slane %v12892_v15, %v9695_v61  ;;  %v2902_v0 = vcombine.high %v2836_v33, %v2852_v8  ;;  %8218 = vmatpush1.bf16.msra.mxu1 %v8217_v6  ;;  %8222 = vmatpush1.bf16.msra.mxu0 %v8221_v40  ;;  %v3141_v33 = vld [vmem:[%s12558_s3] sm:$0xff]  ;;  %v8619_v6 = vmov 1  }
 0x28a   : > { %v2988_v56 = vrot.slane %v12893_v30, %v9695_v61  ;;  %v3004_v11 = vrot.slane %v12894_v18, %v9695_v61  ;;  %v3020_v50 = vrot.slane %v12895_v47, %v9695_v61  ;;  %v2909_v53 = vrot.slane %v2901_v49, %v9720_v38  ;;  %3242 = vmatprep.mubr.f32.mxu1 %v12639_v34  ;;  %v3142_v18 = vld [vmem:[%s12558_s3 + $0x8] sm:$0xff] }
 0x28b   : > { %v2941_v12 = vrot.slane %v2933_v4, %v9720_v38  ;;  %v2916_v19 = vrot.slane %v2902_v0, %v9720_v38  ;;  %v2934_v45 = vcombine.high %v2868_v52, %v2884_v41  ;;  %3331 = vmatprep.mubr.f32.mxu0 %v12639_v34  ;;  %v3138_v52 = vld [vmem:[#allocation2 + $0x78] sm:$0xff]  ;;  %8370 = vset.pattern.permute.xlu1 %v8619_v6  ;;  %v3143_v4 = vld [vmem:[%s12558_s3 + $0x10] sm:$0xff] }
 0x28c   : > { %v3037_v42 = vcombine.low %v2972_v3, %v2988_v56  ;;  %v3069_v59 = vcombine.low %v3004_v11, %v3020_v50  ;;  %v3038_v21 = vcombine.high %v2972_v3, %v2988_v56  ;;  %v3070_v55 = vcombine.high %v3004_v11, %v3020_v50  ;;  %8033 = vmatmul.mubr.msk.f32.vlgmr.msra.gmra.mrb[40].mxu1 %vm3165_vm0, %v10512_v36  ;;  %v3139_v50 = vld [vmem:[#allocation2 + $0x80] sm:$0xff] }
 0x28d   : > { %v2954_v5 = vcombine.high %v2909_v53, %v2941_v12  ;;  %v2953_v39 = vcombine.low %v2909_v53, %v2941_v12  ;;  %v2948_v46 = vrot.slane %v2934_v45, %v9720_v38  ;;  %8037 = vmatmul.mubr.msk.f32.vlgmr.msra.gmra.mrb[14].mxu0 %vm3165_vm0, %v10512_v36  ;;  %3248 = vmatprep.mubr.f32.mxu1 %v12639_v34 }
 0x28e   : > { %v3045_v7 = vrot.slane %v3037_v42, %v9720_v38  ;;  %v3077_v63 = vrot.slane %v3069_v59, %v9720_v38  ;;  %v3052_v13 = vrot.slane %v3038_v21, %v9720_v38  ;;  %v3084_v8 = vrot.slane %v3070_v55, %v9720_v38  ;;  %3337 = vmatprep.mubr.f32.mxu0 %v12639_v34  ;;  %v3140_v55 = vld [vmem:[#allocation2 + $0x88] sm:$0xff] }
 0x28f   : > { %v3110_v43 = vadd.f32 %v10458_v2, %v2954_v5  ;;  %v3109_v60 = vadd.f32 %v10458_v2, %v2953_v39  ;;  %v2956_v41 = vcombine.high %v2916_v19, %v2948_v46  ;;  %v2955_v17 = vcombine.low %v2916_v19, %v2948_v46  ;;  %3147 = vperm.xlu1 %8370, %v3141_v33   ;;  %v3144_v39 = vld [vmem:[%s12558_s3 + $0x18] sm:$0xff]  ;;  %v5049_v46 = vld [vmem:[%s12558_s3 + $0x8] sm:$0xff] }
 0x290   : > { %v3090_v32 = vcombine.high %v3045_v7, %v3077_v63  ;;  %v3089_v62 = vcombine.low %v3045_v7, %v3077_v63  ;;  %v3092_v40 = vcombine.high %v3052_v13, %v3084_v8  ;;  %v3091_v49 = vcombine.low %v3052_v13, %v3084_v8  ;;  %8371 = vset.pattern.permute.xlu0 %v8619_v6  ;;  %v5048_v63 = vld [vmem:[%s12558_s3] sm:$0xff] }
 0x291   : > { %v3112_v3 = vadd.f32 %v10458_v2, %v2956_v41  ;;  %v3111_v56 = vadd.f32 %v10458_v2, %v2955_v17  ;;  %8034 = vmatmul.mubr.msk.f32.gmra.mrb[42].mxu1 %vm3165_vm0, %v3138_v52  ;;  %8038 = vmatmul.mubr.msk.f32.gmra.mrb[56].mxu0 %vm3165_vm0, %v3138_v52  ;;  %v3126_v0 = vmax.f32 %v3110_v43, 0.0  ;;  %v3125_v12 = vmax.f32 %v3109_v60, 0.0 }
 0x292   : > { %v3118_v15 = vadd.f32 %v10468_v48, %v3090_v32  ;;  %v3117_v30 = vadd.f32 %v10468_v48, %v3089_v62  ;;  %v3120_v11 = vadd.f32 %v10468_v48, %v3092_v40  ;;  %v3119_v47 = vadd.f32 %v10468_v48, %v3091_v49  ;;  %3254 = vmatprep.mubr.f32.mxu1 %v12639_v34 }
 0x293   : > { %3343 = vmatprep.mubr.f32.mxu0 %v12639_v34  ;;  %3157 = vperm.xlu0 %8371, %v3143_v4   ;;  %v3128_v2 = vmax.f32 %v3112_v3, 0.0  ;;  %v3127_v19 = vmax.f32 %v3111_v56, 0.0  ;;  %v8620_v13 = vmov 2  }
 0x294   : > { %v3134_v53 = vmax.f32 %v3118_v15, 0.0  ;;  %v3133_v42 = vmax.f32 %v3117_v30, 0.0  ;;  %v3136_v59 = vmax.f32 %v3120_v11, 0.0  ;;  %v3135_v45 = vmax.f32 %v3119_v47, 0.0  ;;  %3152 = vperm.xlu1 %8370, %v3142_v18  }
 0x295   : > { %8035 = vmatmul.mubr.msk.f32.gmra.mrb[44].mxu1 %vm3165_vm0, %v3139_v50  ;;  %8039 = vmatmul.mubr.msk.f32.gmra.mrb[58].mxu0 %vm3165_vm0, %v3139_v50 }
 0x296   : > { %v8223_v21 = vpack.c.bf16 %v3134_v53, %v3126_v0  ;;  %v8225_v5 = vpack.c.bf16 %v3133_v42, %v3125_v12  ;;  %v8227_v48 = vpack.c.bf16 %v3136_v59, %v3128_v2  ;;  %v8229_v7 = vpack.c.bf16 %v3135_v45, %v3127_v19  ;;  %3260 = vmatprep.mubr.f32.mxu1 %v12639_v34 }
 0x297   : > { %3349 = vmatprep.mubr.f32.mxu0 %v12639_v34  ;;  %8373 = vset.pattern.permute.xlu0 %v8620_v13 }
 0x298   : > { %8224 = vmatprep.subr.bf16.mxu1 %v8223_v21  ;;  %8228 = vmatprep.subr.bf16.mxu0 %v8227_v48 }
 0x299   : > { %8226 = vmatpush1.bf16.msra.mxu1 %v8225_v5  ;;  %8230 = vmatpush1.bf16.msra.mxu0 %v8229_v7 }
 0x29a   : > { %8036 = vmatmul.mubr.msk.f32.gmra.mrb[46].mxu1 %vm3165_vm0, %v3140_v55  ;;  %8040 = vmatmul.mubr.msk.f32.gmra.mrb[60].mxu0 %vm3165_vm0, %v3140_v55 }
 0x29b   : > { %3420 = vmatprep.mubr.f32.mxu1 %v12639_v34  ;;  %3509 = vmatprep.mubr.f32.mxu0 %v12639_v34 }
 0x29c   : > { %3162 = vperm.xlu1 %8370, %v3144_v39   ;;  %5057 = vperm.xlu0 %8373, %v5049_v46  }
 0x29e   : > { %8041 = vmatmul.mubr.msk.f32.vlgmr.msra.gmra.mrb[48].mxu1 %vm3165_vm0, %v10512_v36  ;;  %8045 = vmatmul.mubr.msk.f32.vlgmr.msra.gmra.mrb[62].mxu0 %vm3165_vm0, %v10512_v36 }
 0x29f   : > { %3426 = vmatprep.mubr.f32.mxu1 %v12639_v34  ;;  %3515 = vmatprep.mubr.f32.mxu0 %v12639_v34 }
 0x2a0   : > { %8372 = vset.pattern.permute.xlu1 %v8620_v13 }
 0x2a1   : > { %5052 = vperm.xlu1 %8372, %v5048_v63  }
 0x2a2   : > { %8042 = vmatmul.mubr.msk.f32.gmra.mrb[50].mxu1 %vm3165_vm0, %v3138_v52  ;;  %8046 = vmatmul.mubr.msk.f32.gmra.mrb[64].mxu0 %vm3165_vm0, %v3138_v52 }
 0x2a3   : > { %3432 = vmatprep.mubr.f32.mxu1 %v12639_v34  ;;  %3521 = vmatprep.mubr.f32.mxu0 %v12639_v34 }
 0x2a6   : > { %8043 = vmatmul.mubr.msk.f32.gmra.mrb[52].mxu1 %vm3165_vm0, %v3139_v50  ;;  %8047 = vmatmul.mubr.msk.f32.gmra.mrb[66].mxu0 %vm3165_vm0, %v3139_v50 }
 0x2a7   : > { %3438 = vmatprep.mubr.f32.mxu1 %v12639_v34  ;;  %3527 = vmatprep.mubr.f32.mxu0 %v12639_v34 }
 0x2aa   : > { %8044 = vmatmul.mubr.msk.f32.gmra.mrb[54].mxu1 %vm3165_vm0, %v3140_v55  ;;  %8048 = vmatmul.mubr.msk.f32.gmra.mrb[68].mxu0 %vm3165_vm0, %v3140_v55 }
 0x2ab   : > { %5131 = vmatprep.mubr.f32.mxu1 %v12639_v34  ;;  %5285 = vmatprep.mubr.f32.mxu0 %v12639_v34 }
 0x30e   : > { %v10578_v36 = vpop.permute.xlu1 %3147 }
 0x312   : > { %v10600_v5 = vpop.permute.xlu0 %3157 }
 0x313   : > { %v10590_v17 = vpop.permute.xlu1 %3152 }
 0x35f   : > { %v3244_v33 = vpop.f32.mrb[40].mxu1 }
 0x360   : > { %v3333_v43 = vpop.f32.mrb[14].mxu0  ;;  %v3246_v8 = vpop.f32.mrb[41].mxu1  ;;  %v3245_v52 = vadd.f32 %v3244_v33, %v10578_v36 }
 0x361   : > { %v3335_v60 = vpop.f32.mrb[15].mxu0  ;;  %v3334_v32 = vadd.f32 %v3333_v43, %v10578_v36  ;;  %v3247_v41 = vadd.f32 %v3246_v8, %v10578_v36 }
 0x362   : > { %v3336_v62 = vadd.f32 %v3335_v60, %v10578_v36 }
 0x363   : > { %v3534_v6 = vcombine.low %v3245_v52, %v3334_v32  ;;  %v3535_v40 = vcombine.high %v3245_v52, %v3334_v32 }
 0x364   : > { %v3250_v49 = vpop.f32.mrb[42].mxu1  ;;  %v3550_v4 = vcombine.low %v3247_v41, %v3336_v62  ;;  %v3551_v15 = vcombine.high %v3247_v41, %v3336_v62  ;;  %v3339_v3 = vpop.f32.mrb[56].mxu0 }
 0x365   : > { %v3252_v30 = vpop.f32.mrb[43].mxu1  ;;  %v3542_v56 = vrot.slane %v3534_v6, %v9695_v61  ;;  %v3549_v18 = vrot.slane %v3535_v40, %v9695_v61  ;;  %v3251_v11 = vadd.f32 %v3250_v49, %v10590_v17  ;;  %v3341_v47 = vpop.f32.mrb[57].mxu0  ;;  %v3340_v12 = vadd.f32 %v3339_v3, %v10590_v17 }
 0x366   : > { %v3558_v50 = vrot.slane %v3550_v4, %v9695_v61  ;;  %v3565_v0 = vrot.slane %v3551_v15, %v9695_v61  ;;  %v3253_v53 = vadd.f32 %v3252_v30, %v10590_v17  ;;  %v3342_v42 = vadd.f32 %v3341_v47, %v10590_v17 }
 0x367   : > { %v3670_v55 = vcombine.low %v3251_v11, %v3340_v12  ;;  %v3671_v39 = vcombine.high %v3251_v11, %v3340_v12 }
 0x368   : > { %v3256_v2 = vpop.f32.mrb[44].mxu1  ;;  %v3598_v59 = vcombine.low %v3542_v56, %v3558_v50  ;;  %v3599_v19 = vcombine.high %v3542_v56, %v3558_v50  ;;  %v3614_v45 = vcombine.low %v3549_v18, %v3565_v0  ;;  %v3615_v21 = vcombine.high %v3549_v18, %v3565_v0  ;;  %v3345_v48 = vpop.f32.mrb[58].mxu0 }
 0x369   : > { %v3258_v7 = vpop.f32.mrb[45].mxu1  ;;  %v3686_v63 = vcombine.low %v3253_v53, %v3342_v42  ;;  %v3687_v46 = vcombine.high %v3253_v53, %v3342_v42  ;;  %v3347_v13 = vpop.f32.mrb[59].mxu0  ;;  %v3678_v52 = vrot.slane %v3670_v55, %v9695_v61  ;;  %v3685_v32 = vrot.slane %v3671_v39, %v9695_v61 }
 0x36a   : > { %v10603_v33 = vrot.slane %v3598_v59, %v9720_v38  ;;  %v10606_v43 = vrot.slane %v3599_v19, %v9720_v38  ;;  %v10609_v8 = vrot.slane %v3614_v45, %v9720_v38  ;;  %v10612_v60 = vrot.slane %v3615_v21, %v9720_v38  ;;  %v10622_v59 = vpop.permute.xlu1 %3162 }
 0x36b   : > { %v3694_v41 = vrot.slane %v3686_v63, %v9695_v61  ;;  %v3701_v62 = vrot.slane %v3687_v46, %v9695_v61  ;;  %v3257_v40 = vadd.f32 %v3256_v2, %v10600_v5  ;;  %v3259_v49 = vadd.f32 %v3258_v7, %v10600_v5 }
 0x36c   : > { %v3346_v4 = vadd.f32 %v3345_v48, %v10600_v5  ;;  %v3348_v15 = vadd.f32 %v3347_v13, %v10600_v5 }
 0x36d   : > { %v3262_v6 = vpop.f32.mrb[46].mxu1  ;;  %v3351_v3 = vpop.f32.mrb[60].mxu0  ;;  %v3734_v56 = vcombine.low %v3678_v52, %v3694_v41  ;;  %v3735_v18 = vcombine.high %v3678_v52, %v3694_v41  ;;  %v3750_v11 = vcombine.low %v3685_v32, %v3701_v62  ;;  %v3751_v47 = vcombine.high %v3685_v32, %v3701_v62 }
 0x36e   : > { %v3264_v30 = vpop.f32.mrb[47].mxu1  ;;  %v3353_v50 = vpop.f32.mrb[61].mxu0  ;;  %v3806_v0 = vcombine.low %v3257_v40, %v3346_v4  ;;  %v3807_v53 = vcombine.high %v3257_v40, %v3346_v4  ;;  %v3822_v12 = vcombine.low %v3259_v49, %v3348_v15  ;;  %v3823_v42 = vcombine.high %v3259_v49, %v3348_v15 }
 0x36f   : > { %v10625_v2 = vrot.slane %v3734_v56, %v9720_v38  ;;  %v10628_v19 = vrot.slane %v3735_v18, %v9720_v38  ;;  %v10631_v45 = vrot.slane %v3750_v11, %v9720_v38  ;;  %v10634_v21 = vrot.slane %v3751_v47, %v9720_v38 }
 0x370   : > { %v3814_v7 = vrot.slane %v3806_v0, %v9695_v61  ;;  %v3821_v55 = vrot.slane %v3807_v53, %v9695_v61  ;;  %v3830_v39 = vrot.slane %v3822_v12, %v9695_v61  ;;  %v3837_v63 = vrot.slane %v3823_v42, %v9695_v61 }
 0x371   : > { %v3422_v48 = vpop.f32.mrb[48].mxu1  ;;  %v3511_v46 = vpop.f32.mrb[62].mxu0  ;;  %v10642_v32 = vadd.f32 %v3262_v6, %v10622_v59  ;;  %v10645_v41 = vadd.f32 %v3264_v30, %v10622_v59  ;;  %v10648_v62 = vadd.f32 %v3351_v3, %v10622_v59  ;;  %v10654_v6 = vadd.f32 %v3353_v50, %v10622_v59 }
 0x372   : > { %v3424_v13 = vpop.f32.mrb[49].mxu1  ;;  %v3423_v52 = vadd.f32 %v3422_v48, %v10578_v36  ;;  %v3512_v49 = vadd.f32 %v3511_v46, %v10578_v36  ;;  %v3513_v4 = vpop.f32.mrb[63].mxu0  ;;  %v3870_v15 = vcombine.low %v3814_v7, %v3830_v39  ;;  %v3871_v56 = vcombine.high %v3814_v7, %v3830_v39 }
 0x373   : > { %v3425_v40 = vadd.f32 %v3424_v13, %v10578_v36  ;;  %v3514_v18 = vadd.f32 %v3513_v4, %v10578_v36  ;;  %v3886_v11 = vcombine.low %v3821_v55, %v3837_v63  ;;  %v3887_v47 = vcombine.high %v3821_v55, %v3837_v63 }
 0x374   : > { %v3566_v0 = vcombine.low %v3423_v52, %v3512_v49  ;;  %v3567_v30 = vcombine.high %v3423_v52, %v3512_v49  ;;  %v10657_v3 = vrot.slane %v3870_v15, %v9720_v38  ;;  %v10660_v12 = vrot.slane %v3871_v56, %v9720_v38 }
 0x375   : > { %v3428_v53 = vpop.f32.mrb[50].mxu1  ;;  %v3582_v42 = vcombine.low %v3425_v40, %v3514_v18  ;;  %v3583_v48 = vcombine.high %v3425_v40, %v3514_v18  ;;  %v3517_v46 = vpop.f32.mrb[64].mxu0  ;;  %v10664_v55 = vrot.slane %v3886_v11, %v9720_v38  ;;  %v10674_v15 = vrot.slane %v3887_v47, %v9720_v38 }
 0x376   : > { %12896 = vst [vmem:[#allocation53_spill] sm:$0xff] %v10660_v12  ;;  %v3430_v7 = vpop.f32.mrb[51].mxu1  ;;  %v3429_v36 = vadd.f32 %v3428_v53, %v10590_v17  ;;  %v3574_v50 = vrot.slane %v3566_v0, %v9695_v61  ;;  %v3581_v39 = vrot.slane %v3567_v30, %v9695_v61  ;;  %v3518_v13 = vadd.f32 %v3517_v46, %v10590_v17  ;;  %v3519_v52 = vpop.f32.mrb[65].mxu0 }
 0x377   : > { %12897 = vst [vmem:[#allocation54_spill] sm:$0xff] %v10664_v55  ;;  %v3431_v63 = vadd.f32 %v3430_v7, %v10590_v17  ;;  %v3590_v49 = vrot.slane %v3582_v42, %v9695_v61  ;;  %v3597_v40 = vrot.slane %v3583_v48, %v9695_v61  ;;  %v3520_v4 = vadd.f32 %v3519_v52, %v10590_v17 }
 0x378   : > { %12898 = vst [vmem:[#allocation55_spill] sm:$0xff] %v10674_v15  ;;  %v3702_v56 = vcombine.low %v3429_v36, %v3518_v13  ;;  %v3703_v18 = vcombine.high %v3429_v36, %v3518_v13 }
 0x379   : > { %v3434_v11 = vpop.f32.mrb[52].mxu1  ;;  %v3630_v53 = vcombine.low %v3574_v50, %v3590_v49  ;;  %v3631_v46 = vcombine.high %v3574_v50, %v3590_v49  ;;  %v3646_v7 = vcombine.low %v3581_v39, %v3597_v40  ;;  %v3647_v42 = vcombine.high %v3581_v39, %v3597_v40  ;;  %v3523_v34 = vpop.f32.mrb[66].mxu0 }
 0x37a   : > { %v3436_v48 = vpop.f32.mrb[53].mxu1  ;;  %v3710_v17 = vrot.slane %v3702_v56, %v9695_v61  ;;  %v3717_v47 = vrot.slane %v3703_v18, %v9695_v61  ;;  %v3718_v52 = vcombine.low %v3431_v63, %v3520_v4  ;;  %v3719_v15 = vcombine.high %v3431_v63, %v3520_v4  ;;  %v3525_v36 = vpop.f32.mrb[67].mxu0 }
 0x37b   : > { %v3638_v13 = vrot.slane %v3630_v53, %v9720_v38  ;;  %v3645_v0 = vrot.slane %v3631_v46, %v9720_v38  ;;  %v3654_v55 = vrot.slane %v3646_v7, %v9720_v38  ;;  %v3661_v30 = vrot.slane %v3647_v42, %v9720_v38 }
 0x37c   : > { %v3726_v50 = vrot.slane %v3718_v52, %v9695_v61  ;;  %v3733_v39 = vrot.slane %v3719_v15, %v9695_v61  ;;  %v10689_v49 = vadd.f32 %v3436_v48, %v10600_v5  ;;  %v10692_v40 = vadd.f32 %v3434_v11, %v10600_v5 }
 0x37d   : > { %v3440_v63 = vpop.f32.mrb[54].mxu1  ;;  %v3662_v4 = vcombine.low %v10603_v33, %v3638_v13  ;;  %v3663_v56 = vcombine.high %v10603_v33, %v3638_v13  ;;  %v3664_v18 = vcombine.low %v10606_v43, %v3645_v0  ;;  %v3665_v53 = vcombine.high %v10606_v43, %v3645_v0  ;;  %v10698_v46 = vpop.f32.mrb[68].mxu0 }
 0x37e   : > { %v3442_v7 = vpop.f32.mrb[55].mxu1  ;;  %v3666_v15 = vcombine.low %v10609_v8, %v3654_v55  ;;  %v3667_v42 = vcombine.high %v10609_v8, %v3654_v55  ;;  %v3668_v48 = vcombine.low %v10612_v60, %v3661_v30  ;;  %v3669_v11 = vcombine.high %v10612_v60, %v3661_v30  ;;  %v3531_v52 = vpop.f32.mrb[69].mxu0 }
 0x37f   : > { %v10705_v12 = vadd.f32 %v9927_v20, %v3662_v4  ;;  %v10708_v33 = vadd.f32 %v9932_v28, %v3663_v56  ;;  %v10711_v43 = vadd.f32 %v9935_v1, %v3664_v18  ;;  %v10714_v0 = vadd.f32 %v9938_v10, %v3665_v53 }
 0x380   : > { %v10717_v13 = vadd.f32 %v9943_v57, %v3666_v15  ;;  %v10720_v8 = vadd.f32 %v9948_v54, %v3667_v42  ;;  %v10723_v60 = vadd.f32 %v9951_v51, %v3668_v48  ;;  %v10726_v20 = vadd.f32 %v9954_v25, %v3669_v11 }
 0x381   : > { %v12899_v28 = vcombine.low %v12832_v29, %v10171_v44  ;;  %v12901_v10 = vcombine.high %v12832_v29, %v10171_v44  ;;  %v12903_v57 = vcombine.low %v12833_v14, %v10174_v35  ;;  %v12905_v51 = vcombine.high %v12833_v14, %v10174_v35 }
 0x382   : > { %v12907_v30 = vcombine.low %v12834_v26, %v10177_v9  ;;  %v12909_v44 = vcombine.high %v12834_v26, %v10177_v9  ;;  %v12913_v35 = vcombine.high %v12835_v27, %v10180_v16  ;;  %v3526_v9 = vadd.f32 %v3525_v36, %v10600_v5 }
 0x383   : > { %v10731_v1 = vadd.f32 %v3662_v4, %v12899_v28  ;;  %v10736_v55 = vadd.f32 %v3663_v56, %v12901_v10  ;;  %v10741_v54 = vadd.f32 %v3664_v18, %v12903_v57  ;;  %v10746_v25 = vadd.f32 %v3665_v53, %v12905_v51 }
 0x384   : > { %v10751_v4 = vadd.f32 %v3666_v15, %v12907_v30  ;;  %v10756_v29 = vadd.f32 %v3667_v42, %v12909_v44  ;;  %v12911_v56 = vcombine.low %v12835_v27, %v10180_v16  ;;  %v10766_v14 = vadd.f32 %v3669_v11, %v12913_v35  ;;  %v12915_v35 = vld [vmem:[#allocation61_spill] sm:$0xff] }
 0x385   : > { %12900 = vst [vmem:[#allocation56_spill] sm:$0xff] %v10731_v1  ;;  %12902 = vst [vmem:[#allocation20_spill] sm:$0xff] %v10736_v55  ;;  %v3766_v53 = vcombine.low %v3710_v17, %v3726_v50  ;;  %v3767_v28 = vcombine.high %v3710_v17, %v3726_v50  ;;  %v3782_v10 = vcombine.low %v3717_v47, %v3733_v39 }
 0x386   : > { %12904 = vst [vmem:[#allocation23_spill] sm:$0xff] %v10741_v54  ;;  %12906 = vst [vmem:[#allocation29_spill] sm:$0xff] %v10746_v25  ;;  %v10761_v18 = vadd.f32 %v3668_v48, %v12911_v56  ;;  %v3783_v15 = vcombine.high %v3717_v47, %v3733_v39  ;;  %v3524_v57 = vadd.f32 %v3523_v34, %v10600_v5  ;;  %v12998_v25 = vld [vmem:[#allocation51_spill] sm:$0xff]  ;;  %v12999_v54 = vld [vmem:[#allocation72_spill] sm:$0xff] }
 0x387   : > { %12908 = vst [vmem:[#allocation30_spill] sm:$0xff] %v10751_v4  ;;  %12910 = vst [vmem:[#allocation21_spill] sm:$0xff] %v10756_v29  ;;  %v10771_v26 = vadd.f32 %v3442_v7, %v10622_v59  ;;  %v3441_v42 = vadd.f32 %v3440_v63, %v10622_v59  ;;  %v3774_v48 = vrot.slane %v3766_v53, %v9720_v38  ;;  %v12993_v29 = vld [vmem:[#allocation71_spill] sm:$0xff] }
 0x388   : > { %12912 = vst [vmem:[#allocation24_spill] sm:$0xff] %v10761_v18  ;;  %12914 = vst [vmem:[#allocation31_spill] sm:$0xff] %v10766_v14  ;;  %v3781_v51 = vrot.slane %v3767_v28, %v9720_v38  ;;  %v3790_v16 = vrot.slane %v3782_v10, %v9720_v38  ;;  %v3797_v27 = vrot.slane %v3783_v15, %v9720_v38  ;;  %v12918_v28 = vld [vmem:[#allocation9_spill] sm:$0xff] }
 0x389   : > { %v3838_v17 = vcombine.low %v10692_v40, %v3524_v57  ;;  %v3839_v47 = vcombine.high %v10692_v40, %v3524_v57  ;;  %v3854_v34 = vcombine.low %v10689_v49, %v3526_v9  ;;  %v3855_v5 = vcombine.high %v10689_v49, %v3526_v9  ;;  %v12924_v57 = vld [vmem:[#allocation11_spill] sm:$0xff] }
 0x38a   : > { %v3798_v36 = vcombine.low %v10625_v2, %v3774_v48  ;;  %v3799_v50 = vcombine.high %v10625_v2, %v3774_v48  ;;  %v3800_v39 = vcombine.low %v10628_v19, %v3781_v51  ;;  %v3801_v63 = vcombine.high %v10628_v19, %v3781_v51 }
 0x38b   : > { %v3802_v7 = vcombine.low %v10631_v45, %v3790_v16  ;;  %v3803_v11 = vcombine.high %v10631_v45, %v3790_v16  ;;  %v3804_v30 = vcombine.low %v10634_v21, %v3797_v27  ;;  %v3805_v40 = vcombine.high %v10634_v21, %v3797_v27  ;;  %v12929_v16 = vld [vmem:[#allocation43_spill] sm:$0xff]  ;;  %v12930_v27 = vld [vmem:[#allocation14_spill] sm:$0xff] }
 0x38c   : > { %v10791_v44 = vadd.f32 %v9973_v24, %v3798_v36  ;;  %v10794_v49 = vadd.f32 %v9978_v22, %v3799_v50  ;;  %v10797_v2 = vadd.f32 %v9981_v23, %v3800_v39  ;;  %v10800_v56 = vadd.f32 %v9984_v31, %v3801_v63  ;;  %v12916_v24 = vld [vmem:[#allocation62_spill] sm:$0xff]  ;;  %v12917_v22 = vld [vmem:[#allocation41_spill] sm:$0xff] }
 0x38d   : > { %v10803_v19 = vadd.f32 %v9993_v58, %v3802_v7  ;;  %v10806_v45 = vadd.f32 %v9998_v37, %v3803_v11  ;;  %v10809_v21 = vadd.f32 %v12915_v35, %v3804_v30  ;;  %v10812_v53 = vadd.f32 %v12916_v24, %v3805_v40  ;;  %v12923_v58 = vld [vmem:[#allocation42_spill] sm:$0xff] }
 0x38e   : > { %v12919_v10 = vcombine.low %v12917_v22, %v12918_v28  ;;  %v12921_v31 = vcombine.high %v12917_v22, %v12918_v28  ;;  %v12925_v37 = vcombine.low %v12923_v58, %v12924_v57  ;;  %v12927_v48 = vcombine.high %v12923_v58, %v12924_v57  ;;  %v12935_v22 = vld [vmem:[#allocation44_spill] sm:$0xff]  ;;  %v12936_v28 = vld [vmem:[#allocation19_spill] sm:$0xff] }
 0x38f   : > { %v12931_v35 = vcombine.low %v12929_v16, %v12930_v27  ;;  %v12933_v24 = vcombine.high %v12929_v16, %v12930_v27  ;;  %v3846_v58 = vrot.slane %v3838_v17, %v9695_v61  ;;  %v3862_v57 = vrot.slane %v3854_v34, %v9695_v61 }
 0x390   : > { %v10817_v23 = vadd.f32 %v3798_v36, %v12919_v10  ;;  %v10822_v15 = vadd.f32 %v3799_v50, %v12921_v31  ;;  %v10827_v9 = vadd.f32 %v3800_v39, %v12925_v37  ;;  %v10832_v51 = vadd.f32 %v3801_v63, %v12927_v48 }
 0x391   : > { %v10837_v36 = vadd.f32 %v3802_v7, %v12931_v35  ;;  %v10842_v50 = vadd.f32 %v3803_v11, %v12933_v24  ;;  %v12937_v10 = vcombine.low %v12935_v22, %v12936_v28  ;;  %v12939_v31 = vcombine.high %v12935_v22, %v12936_v28 }
 0x392   : > { %12920 = vst [vmem:[#allocation32_spill] sm:$0xff] %v10817_v23  ;;  %12922 = vst [vmem:[#allocation57_spill] sm:$0xff] %v10822_v15  ;;  %v3853_v7 = vrot.slane %v3839_v47, %v9695_v61  ;;  %v3869_v37 = vrot.slane %v3855_v5, %v9695_v61  ;;  %v3530_v11 = vadd.f32 %v10698_v46, %v10622_v59  ;;  %v12966_v15 = vld [vmem:[#allocation47_spill] sm:$0xff] }
 0x393   : > { %12926 = vst [vmem:[#allocation58_spill] sm:$0xff] %v10827_v9  ;;  %12928 = vst [vmem:[#allocation59_spill] sm:$0xff] %v10832_v51  ;;  %v10847_v39 = vadd.f32 %v3804_v30, %v12937_v10  ;;  %v10852_v63 = vadd.f32 %v3805_v40, %v12939_v31  ;;  %v3532_v48 = vadd.f32 %v3531_v52, %v10622_v59  ;;  %v12961_v51 = vld [vmem:[#allocation38_spill] sm:$0xff]  ;;  %v12967_v23 = vld [vmem:[#allocation39_spill] sm:$0xff] }
 0x394   : > { %12932 = vst [vmem:[#allocation60_spill] sm:$0xff] %v10837_v36  ;;  %12934 = vst [vmem:[#allocation15_spill] sm:$0xff] %v10842_v50  ;;  %v12941_v30 = vcombine.low %v10642_v32, %v10648_v62  ;;  %v12942_v17 = vcombine.high %v10642_v32, %v10648_v62  ;;  %v3902_v47 = vcombine.low %v3846_v58, %v3862_v57 }
 0x395   : > { %12938 = vst [vmem:[#allocation17_spill] sm:$0xff] %v10847_v39  ;;  %12940 = vst [vmem:[#allocation25_spill] sm:$0xff] %v10852_v63  ;;  %v3903_v27 = vcombine.high %v3846_v58, %v3862_v57  ;;  %v3918_v34 = vcombine.low %v3853_v7, %v3869_v37  ;;  %v3919_v35 = vcombine.high %v3853_v7, %v3869_v37  ;;  %v12944_v37 = vld [vmem:[#allocation54_spill] sm:$0xff]  ;;  %v12952_v63 = vld [vmem:[#allocation69_spill] sm:$0xff] }
 0x396   : > { %v3950_v16 = vrot.slane %v12941_v30, %v9695_v61  ;;  %v3957_v40 = vrot.slane %v12942_v17, %v9695_v61  ;;  %v3958_v5 = vcombine.low %v10645_v41, %v10654_v6  ;;  %v3959_v59 = vcombine.high %v10645_v41, %v10654_v6  ;;  %v12945_v17 = vld [vmem:[#allocation55_spill] sm:$0xff]  ;;  %v12955_v39 = vld [vmem:[#allocation37_spill] sm:$0xff] }
 0x397   : > { %v3974_v46 = vcombine.low %v3441_v42, %v3530_v11  ;;  %v3975_v52 = vcombine.high %v3441_v42, %v3530_v11  ;;  %v3910_v24 = vrot.slane %v3902_v47, %v9720_v38  ;;  %v3917_v22 = vrot.slane %v3903_v27, %v9720_v38  ;;  %v12943_v42 = vld [vmem:[#allocation53_spill] sm:$0xff] }
 0x398   : > { %v3926_v28 = vrot.slane %v3918_v34, %v9720_v38  ;;  %v3933_v32 = vrot.slane %v3919_v35, %v9720_v38  ;;  %v3966_v62 = vrot.slane %v3958_v5, %v9695_v61  ;;  %v3973_v10 = vrot.slane %v3959_v59, %v9695_v61  ;;  %v12946_v34 = vld [vmem:[#allocation63_spill] sm:$0xff]  ;;  %v12947_v5 = vld [vmem:[#allocation64_spill] sm:$0xff] }
 0x399   : > { %v3982_v31 = vrot.slane %v3974_v46, %v9695_v61  ;;  %v3989_v58 = vrot.slane %v3975_v52, %v9695_v61  ;;  %v3934_v41 = vcombine.low %v10657_v3, %v3910_v24  ;;  %v3935_v6 = vcombine.high %v10657_v3, %v3910_v24  ;;  %v12948_v46 = vld [vmem:[#allocation65_spill] sm:$0xff]  ;;  %v12949_v52 = vld [vmem:[#allocation66_spill] sm:$0xff] }
 0x39a   : > { %v3936_v7 = vcombine.low %v12943_v42, %v3917_v22  ;;  %v3937_v57 = vcombine.high %v12943_v42, %v3917_v22  ;;  %v3938_v11 = vcombine.low %v12944_v37, %v3926_v28  ;;  %v3939_v30 = vcombine.high %v12944_v37, %v3926_v28  ;;  %v12950_v22 = vld [vmem:[#allocation67_spill] sm:$0xff]  ;;  %v12951_v28 = vld [vmem:[#allocation68_spill] sm:$0xff] }
 0x39b   : > { %v3940_v47 = vcombine.low %v12945_v17, %v3933_v32  ;;  %v3941_v27 = vcombine.high %v12945_v17, %v3933_v32  ;;  %v10890_v35 = vadd.f32 %v12946_v34, %v3934_v41  ;;  %v10893_v59 = vadd.f32 %v12947_v5, %v3935_v6  ;;  %v12953_v17 = vld [vmem:[#allocation22_spill] sm:$0xff]  ;;  %v12954_v5 = vld [vmem:[#allocation45_spill] sm:$0xff] }
 0x39c   : > { %v10896_v3 = vadd.f32 %v12948_v46, %v3936_v7  ;;  %v10899_v24 = vadd.f32 %v12949_v52, %v3937_v57  ;;  %v10902_v42 = vadd.f32 %v12950_v22, %v3938_v11  ;;  %v10905_v37 = vadd.f32 %v12951_v28, %v3939_v30  ;;  %v12960_v22 = vld [vmem:[#allocation46_spill] sm:$0xff] }
 0x39d   : > { %v10908_v32 = vadd.f32 %v12952_v63, %v3940_v47  ;;  %v10911_v34 = vadd.f32 %v12953_v17, %v3941_v27  ;;  %v12956_v50 = vcombine.low %v12954_v5, %v12955_v39  ;;  %v12958_v52 = vcombine.high %v12954_v5, %v12955_v39  ;;  %v12973_v5 = vld [vmem:[#allocation40_spill] sm:$0xff] }
 0x39e   : > { %v12962_v28 = vcombine.low %v12960_v22, %v12961_v51  ;;  %v12964_v63 = vcombine.high %v12960_v22, %v12961_v51  ;;  %v12968_v14 = vcombine.low %v12966_v15, %v12967_v23  ;;  %v12970_v39 = vcombine.high %v12966_v15, %v12967_v23 }
 0x39f   : > { %v10916_v46 = vadd.f32 %v3934_v41, %v12956_v50  ;;  %v10921_v36 = vadd.f32 %v3935_v6, %v12958_v52  ;;  %v12972_v6 = vld [vmem:[#allocation48_spill] sm:$0xff]  ;;  %v3990_v22 = vcombine.low %v10771_v26, %v3532_v48  ;;  %v4023_v23 = vcombine.high %v3957_v40, %v3973_v10 }
 0x3a0   : > { %v10926_v9 = vadd.f32 %v3936_v7, %v12962_v28  ;;  %v10931_v17 = vadd.f32 %v3937_v57, %v12964_v63  ;;  %v10936_v50 = vadd.f32 %v3938_v11, %v12968_v14  ;;  %v10941_v41 = vadd.f32 %v3939_v30, %v12970_v39 }
 0x3a1   : > { %12957 = vst [vmem:[#allocation27_spill] sm:$0xff] %v10916_v46  ;;  %12959 = vst [vmem:[#allocation16_spill] sm:$0xff] %v10921_v36  ;;  %v12974_v52 = vcombine.low %v12972_v6, %v12973_v5  ;;  %v12976_v51 = vcombine.high %v12972_v6, %v12973_v5  ;;  %v3991_v14 = vcombine.high %v10771_v26, %v3532_v48  ;;  %v12981_v36 = vld [vmem:[#allocation36_spill] sm:$0xff] }
 0x3a2   : > { %12963 = vst [vmem:[#allocation18_spill] sm:$0xff] %v10926_v9  ;;  %12965 = vst [vmem:[#allocation26_spill] sm:$0xff] %v10931_v17  ;;  %v4006_v11 = vcombine.low %v3950_v16, %v3966_v62  ;;  %v4007_v28 = vcombine.high %v3950_v16, %v3966_v62  ;;  %v4022_v63 = vcombine.low %v3957_v40, %v3973_v10  ;;  %v12979_v17 = vld [vmem:[#allocation34_spill] sm:$0xff]  ;;  %v12980_v9 = vld [vmem:[#allocation35_spill] sm:$0xff] }
 0x3a3   : > { %12969 = vst [vmem:[#allocation28_spill] sm:$0xff] %v10936_v50  ;;  %12971 = vst [vmem:[#allocation61_spill] sm:$0xff] %v10941_v41  ;;  %v10946_v7 = vadd.f32 %v3940_v47, %v12974_v52  ;;  %v10951_v57 = vadd.f32 %v3941_v27, %v12976_v51  ;;  %v4502_v15 = vcombine.low %v10705_v12, %v10711_v43  ;;  %v12978_v50 = vld [vmem:[#allocation33_spill] sm:$0xff]  ;;  %v12982_v46 = vld [vmem:[#allocation8_spill] sm:$0xff] }
 0x3a4   : > { %v4518_v30 = vcombine.low %v10708_v33, %v10714_v0  ;;  %v3998_v47 = vrot.slane %v3990_v22, %v9695_v61  ;;  %v4005_v39 = vrot.slane %v3991_v14, %v9695_v61  ;;  %v4014_v27 = vrot.slane %v4006_v11, %v9720_v38 }
 0x3a5   : > { %12975 = vst [vmem:[#allocation62_spill] sm:$0xff] %v10946_v7  ;;  %12977 = vst [vmem:[#allocation41_spill] sm:$0xff] %v10951_v57  ;;  %v4021_v6 = vrot.slane %v4007_v28, %v9720_v38  ;;  %v4030_v26 = vrot.slane %v4022_v63, %v9720_v38  ;;  %v4037_v48 = vrot.slane %v4023_v23, %v9720_v38 }
 0x3a6   : > { %v10966_v16 = vrot.slane %v4502_v15, %v9695_v61  ;;  %v10969_v40 = vrot.slane %v4518_v30, %v9695_v61  ;;  %v4038_v62 = vcombine.low %v3982_v31, %v3998_v47  ;;  %v4039_v10 = vcombine.high %v3982_v31, %v3998_v47 }
 0x3a7   : > { %v4054_v5 = vcombine.low %v3989_v58, %v4005_v39  ;;  %v4055_v52 = vcombine.high %v3989_v58, %v4005_v39  ;;  %v4534_v51 = vcombine.low %v10717_v13, %v10723_v60  ;;  %v4550_v22 = vcombine.low %v10720_v8, %v10726_v20 }
 0x3a8   : > { %v4566_v14 = vcombine.low %v10966_v16, %v10969_v40  ;;  %v4638_v11 = vcombine.low %v10791_v44, %v10797_v2  ;;  %v4046_v28 = vrot.slane %v4038_v62, %v9720_v38  ;;  %v4053_v63 = vrot.slane %v4039_v10, %v9720_v38 }
 0x3a9   : > { %v4062_v31 = vrot.slane %v4054_v5, %v9720_v38  ;;  %v4069_v58 = vrot.slane %v4055_v52, %v9720_v38  ;;  %v10984_v23 = vrot.slane %v4534_v51, %v9695_v61  ;;  %v10987_v15 = vrot.slane %v4550_v22, %v9695_v61 }
 0x3aa   : > { %v10990_v30 = vrot.slane %v4566_v14, %v9720_v38  ;;  %v10993_v47 = vrot.slane %v4638_v11, %v9695_v61  ;;  %v4070_v39 = vcombine.low %v4014_v27, %v4046_v28  ;;  %v4071_v62 = vcombine.high %v4014_v27, %v4046_v28 }
 0x3ab   : > { %v4072_v57 = vcombine.low %v4021_v6, %v4053_v63  ;;  %v4073_v10 = vcombine.high %v4021_v6, %v4053_v63  ;;  %v4074_v7 = vcombine.low %v4030_v26, %v4062_v31  ;;  %v4075_v5 = vcombine.high %v4030_v26, %v4062_v31  ;;  %v12983_v6 = vld [vmem:[#allocation10_spill] sm:$0xff]  ;;  %v12984_v26 = vld [vmem:[#allocation12_spill] sm:$0xff] }
 0x3ac   : > { %v4076_v41 = vcombine.low %v4037_v48, %v4069_v58  ;;  %v4077_v52 = vcombine.high %v4037_v48, %v4069_v58  ;;  %v10996_v51 = vadd.f32 %v12978_v50, %v4070_v39  ;;  %v10999_v22 = vadd.f32 %v12979_v17, %v4071_v62  ;;  %v12985_v50 = vld [vmem:[#allocation13_spill] sm:$0xff]  ;;  %v12987_v31 = vld [vmem:[#allocation70_spill] sm:$0xff] }
 0x3ad   : > { %v11002_v14 = vadd.f32 %v12980_v9, %v4072_v57  ;;  %v11005_v11 = vadd.f32 %v12981_v36, %v4073_v10  ;;  %v11008_v27 = vadd.f32 %v12982_v46, %v4074_v7  ;;  %v11011_v28 = vadd.f32 %v12983_v6, %v4075_v5  ;;  %v12986_v17 = vld [vmem:[#allocation49_spill] sm:$0xff]  ;;  %v12992_v46 = vld [vmem:[#allocation50_spill] sm:$0xff] }
 0x3ae   : > { %v11014_v48 = vadd.f32 %v12984_v26, %v4076_v41  ;;  %v11017_v63 = vadd.f32 %v12985_v50, %v4077_v52  ;;  %v12988_v58 = vcombine.low %v12986_v17, %v12987_v31  ;;  %v12990_v36 = vcombine.high %v12986_v17, %v12987_v31  ;;  %v13004_v31 = vld [vmem:[#allocation52_spill] sm:$0xff] }
 0x3af   : > { %v12994_v6 = vcombine.low %v12992_v46, %v12993_v29  ;;  %v12996_v26 = vcombine.high %v12992_v46, %v12993_v29  ;;  %v13000_v55 = vcombine.low %v12998_v25, %v12999_v54  ;;  %v13002_v17 = vcombine.high %v12998_v25, %v12999_v54 }
 0x3b0   : > { %v11022_v9 = vadd.f32 %v4070_v39, %v12988_v58  ;;  %v11027_v18 = vadd.f32 %v4071_v62, %v12990_v36  ;;  %v13005_v58 = vld [vmem:[#allocation73_spill] sm:$0xff]  ;;  %v4598_v46 = vcombine.low %v10984_v23, %v10987_v15  ;;  %v4670_v54 = vcombine.low %v10803_v19, %v10809_v21 }
 0x3b1   : > { %v11032_v4 = vadd.f32 %v4072_v57, %v12994_v6  ;;  %v11037_v50 = vadd.f32 %v4073_v10, %v12996_v26  ;;  %v11042_v39 = vadd.f32 %v4074_v7, %v13000_v55  ;;  %v11047_v62 = vadd.f32 %v4075_v5, %v13002_v17 }
 0x3b2   : > { %12989 = vst [vmem:[#allocation9_spill] sm:$0xff] %v11022_v9  ;;  %12991 = vst [vmem:[#allocation42_spill] sm:$0xff] %v11027_v18  ;;  %v13006_v36 = vcombine.low %v13004_v31, %v13005_v58  ;;  %v13008_v29 = vcombine.high %v13004_v31, %v13005_v58  ;;  %v4654_v55 = vcombine.low %v10794_v49, %v10800_v56 }
 0x3b3   : > { %12995 = vst [vmem:[#allocation11_spill] sm:$0xff] %v11032_v4  ;;  %12997 = vst [vmem:[#allocation43_spill] sm:$0xff] %v11037_v50  ;;  %v4686_v25 = vcombine.low %v10806_v45, %v10812_v53  ;;  %v4519_v7 = vcombine.high %v10708_v33, %v10714_v0  ;;  %v4535_v5 = vcombine.high %v10717_v13, %v10723_v60 }
 0x3b4   : > { %13001 = vst [vmem:[#allocation14_spill] sm:$0xff] %v11042_v39  ;;  %13003 = vst [vmem:[#allocation44_spill] sm:$0xff] %v11047_v62  ;;  %v11052_v57 = vadd.f32 %v4076_v41, %v13006_v36  ;;  %v11057_v10 = vadd.f32 %v4077_v52, %v13008_v29  ;;  %v4503_v41 = vcombine.high %v10705_v12, %v10711_v43 }
 0x3b5   : > { %v4551_v52 = vcombine.high %v10720_v8, %v10726_v20  ;;  %v4606_v6 = vrot.slane %v4598_v46, %v9720_v38  ;;  %v11077_v26 = vrot.slane %v4654_v55, %v9695_v61  ;;  %v11080_v17 = vrot.slane %v4670_v54, %v9695_v61 }
 0x3b6   : > { %13007 = vst [vmem:[#allocation19_spill] sm:$0xff] %v11052_v57  ;;  %13009 = vst [vmem:[#allocation53_spill] sm:$0xff] %v11057_v10  ;;  %v11083_v31 = vrot.slane %v4686_v25, %v9695_v61  ;;  %v11086_v12 = vrot.slane %v4503_v41, %v9695_v61  ;;  %v11089_v33 = vrot.slane %v4519_v7, %v9695_v61 }
 0x3b7   : > { %v11092_v43 = vrot.slane %v4535_v5, %v9695_v61  ;;  %v11095_v0 = vrot.slane %v4551_v52, %v9695_v61  ;;  %v4631_v13 = vcombine.high %v10990_v30, %v4606_v6  ;;  %v4702_v8 = vcombine.low %v10993_v47, %v11077_v26 }
 0x3b8   : > { %v4734_v60 = vcombine.low %v11080_v17, %v11083_v31  ;;  %v4639_v20 = vcombine.high %v10791_v44, %v10797_v2  ;;  %v4582_v58 = vcombine.low %v11086_v12, %v11089_v33  ;;  %v4655_v29 = vcombine.high %v10794_v49, %v10800_v56 }
 0x3b9   : > { %v4614_v36 = vcombine.low %v11092_v43, %v11095_v0  ;;  %v4671_v46 = vcombine.high %v10803_v19, %v10809_v21  ;;  %v4710_v55 = vrot.slane %v4702_v8, %v9720_v38  ;;  %v4687_v44 = vcombine.high %v10806_v45, %v10812_v53 }
 0x3ba   : > { %v4742_v54 = vrot.slane %v4734_v60, %v9720_v38  ;;  %v11115_v25 = vrot.slane %v4639_v20, %v9695_v61  ;;  %v4590_v2 = vrot.slane %v4582_v58, %v9720_v38  ;;  %v11122_v7 = vrot.slane %v4655_v29, %v9695_v61 }
 0x3bb   : > { %v4622_v41 = vrot.slane %v4614_v36, %v9720_v38  ;;  %v11125_v49 = vrot.slane %v4671_v46, %v9695_v61  ;;  %v11128_v19 = vrot.slane %v4687_v44, %v9695_v61  ;;  %v4630_v21 = vcombine.low %v10990_v30, %v4606_v6 }
 0x3bc   : > { %v4767_v56 = vcombine.high %v4710_v55, %v4742_v54  ;;  %v4766_v5 = vcombine.low %v4710_v55, %v4742_v54  ;;  %v4718_v45 = vcombine.low %v11115_v25, %v11122_v7  ;;  %v4774_v8 = vcombine.low %v10890_v35, %v10896_v3 }
 0x3bd   : > { %v4635_v52 = vcombine.high %v4590_v2, %v4622_v41  ;;  %v4634_v53 = vcombine.low %v4590_v2, %v4622_v41  ;;  %v4750_v20 = vcombine.low %v11125_v49, %v11128_v19  ;;  %v4790_v36 = vcombine.low %v10893_v59, %v10899_v24 }
 0x3be   : > { %v8231_v60 = vpack.c.bf16 %v4767_v56, %v4631_v13  ;;  %v8233_v58 = vpack.c.bf16 %v4766_v5, %v4630_v21  ;;  %v4726_v29 = vrot.slane %v4718_v45, %v9720_v38  ;;  %v11141_v30 = vrot.slane %v4774_v8, %v9695_v61 }
 0x3bf   : > { %v4806_v6 = vcombine.low %v10902_v42, %v10908_v32  ;;  %v4822_v46 = vcombine.low %v10905_v37, %v10911_v34  ;;  %v4758_v13 = vrot.slane %v4750_v20, %v9720_v38  ;;  %v11149_v55 = vrot.slane %v4790_v36, %v9695_v61 }
 0x3c0   : > { %8232 = vmatprep.subr.bf16.mxu1 %v8231_v60  ;;  %v4910_v54 = vcombine.low %v10996_v51, %v11002_v14  ;;  %v4926_v44 = vcombine.low %v10999_v22, %v11005_v11  ;;  %v4942_v56 = vcombine.low %v11008_v27, %v11014_v48  ;;  %v4958_v21 = vcombine.low %v11011_v28, %v11017_v63 }
 0x3c1   : > { %8234 = vmatpush1.bf16.msra.mxu1 %v8233_v58  ;;  %v11156_v2 = vrot.slane %v4806_v6, %v9695_v61  ;;  %v11159_v41 = vrot.slane %v4822_v46, %v9695_v61  ;;  %v4771_v5 = vcombine.high %v4726_v29, %v4758_v13  ;;  %v4770_v45 = vcombine.low %v4726_v29, %v4758_v13 }
 0x3c2   : > { %v4838_v8 = vcombine.low %v11141_v30, %v11149_v55  ;;  %v11168_v60 = vrot.slane %v4910_v54, %v9695_v61  ;;  %v11173_v58 = vrot.slane %v4926_v44, %v9695_v61  ;;  %v11176_v36 = vrot.slane %v4942_v56, %v9695_v61 }
 0x3c3   : > { %v4870_v20 = vcombine.low %v11156_v2, %v11159_v41  ;;  %v11179_v6 = vrot.slane %v4958_v21, %v9695_v61  ;;  %v8247_v46 = vpack.c.bf16 %v4771_v5, %v4635_v52  ;;  %v8249_v29 = vpack.c.bf16 %v4770_v45, %v4634_v53 }
 0x3c4   : > { %v4846_v13 = vrot.slane %v4838_v8, %v9720_v38  ;;  %v4775_v54 = vcombine.high %v10890_v35, %v10896_v3  ;;  %v4974_v57 = vcombine.low %v11168_v60, %v11173_v58  ;;  %v4791_v56 = vcombine.high %v10893_v59, %v10899_v24 }
 0x3c5   : > { %v4878_v10 = vrot.slane %v4870_v20, %v9720_v38  ;;  %v5006_v44 = vcombine.low %v11176_v36, %v11179_v6  ;;  %8248 = vmatprep.subr.bf16.mxu0 %v8247_v46  ;;  %v4807_v53 = vcombine.high %v10902_v42, %v10908_v32  ;;  %v4823_v35 = vcombine.high %v10905_v37, %v10911_v34 }
 0x3c6   : > { %v11192_v52 = vrot.slane %v4775_v54, %v9695_v61  ;;  %v4911_v3 = vcombine.high %v10996_v51, %v11002_v14  ;;  %8250 = vmatpush1.bf16.msra.mxu0 %v8249_v29  ;;  %v4982_v5 = vrot.slane %v4974_v57, %v9720_v38  ;;  %v11203_v24 = vrot.slane %v4791_v56, %v9695_v61 }
 0x3c7   : > { %v4903_v21 = vcombine.high %v4846_v13, %v4878_v10  ;;  %v5014_v59 = vrot.slane %v5006_v44, %v9720_v38  ;;  %v11206_v45 = vrot.slane %v4807_v53, %v9695_v61  ;;  %v11209_v42 = vrot.slane %v4823_v35, %v9695_v61 }
 0x3c8   : > { %v11212_v37 = vrot.slane %v4911_v3, %v9695_v61  ;;  %v4927_v32 = vcombine.high %v10999_v22, %v11005_v11  ;;  %v4854_v51 = vcombine.low %v11192_v52, %v11203_v24  ;;  %v4943_v14 = vcombine.high %v11008_v27, %v11014_v48 }
 0x3c9   : > { %v5039_v34 = vcombine.high %v4982_v5, %v5014_v59  ;;  %v4959_v57 = vcombine.high %v11011_v28, %v11017_v63  ;;  %v4886_v8 = vcombine.low %v11206_v45, %v11209_v42  ;;  %v4902_v46 = vcombine.low %v4846_v13, %v4878_v10 }
 0x3ca   : > { %v11225_v20 = vrot.slane %v4927_v32, %v9695_v61  ;;  %v5038_v29 = vcombine.low %v4982_v5, %v5014_v59  ;;  %v4862_v22 = vrot.slane %v4854_v51, %v9720_v38  ;;  %v11229_v11 = vrot.slane %v4943_v14, %v9695_v61 }
 0x3cb   : > { %v8235_v54 = vpack.c.bf16 %v5039_v34, %v4903_v21  ;;  %v11232_v44 = vrot.slane %v4959_v57, %v9695_v61  ;;  %v4894_v27 = vrot.slane %v4886_v8, %v9720_v38  ;;  %v4567_v63 = vcombine.high %v10966_v16, %v10969_v40  ;;  %v11249_v40 = vld [vmem:[#allocation2 + $0x90] sm:$0xff] }
 0x3cc   : > { %v4990_v28 = vcombine.low %v11212_v37, %v11225_v20  ;;  %v8237_v48 = vpack.c.bf16 %v5038_v29, %v4902_v46  ;;  %v4599_v13 = vcombine.high %v10984_v23, %v10987_v15  ;;  %v4703_v56 = vcombine.high %v10993_v47, %v11077_v26 }
 0x3cd   : > { %8236 = vmatprep.subr.bf16.mxu1 %v8235_v54  ;;  %v5022_v10 = vcombine.low %v11229_v11, %v11232_v44  ;;  %v4735_v53 = vcombine.high %v11080_v17, %v11083_v31  ;;  %v4907_v35 = vcombine.high %v4862_v22, %v4894_v27  ;;  %v4906_v21 = vcombine.low %v4862_v22, %v4894_v27  ;;  %v5047_v54 = vld [vmem:[#allocation2 + $0x98] sm:$0xff] }
 0x3ce   : > { %v4998_v3 = vrot.slane %v4990_v28, %v9720_v38  ;;  %8238 = vmatpush1.bf16.msra.mxu1 %v8237_v48  ;;  %v4581_v16 = vrot.slane %v4567_v63, %v9720_v38  ;;  %v4613_v59 = vrot.slane %v4599_v13, %v9720_v38  ;;  %v4717_v23 = vrot.slane %v4703_v56, %v9720_v38 }
 0x3cf   : > { %v5030_v5 = vrot.slane %v5022_v10, %v9720_v38  ;;  %v4749_v15 = vrot.slane %v4735_v53, %v9720_v38  ;;  %v4839_v47 = vcombine.high %v11141_v30, %v11149_v55  ;;  %v4871_v26 = vcombine.high %v11156_v2, %v11159_v41 }
 0x3d0   : > { %v4975_v17 = vcombine.high %v11168_v60, %v11173_v58  ;;  %v5007_v31 = vcombine.high %v11176_v36, %v11179_v6  ;;  %v4633_v51 = vcombine.high %v4581_v16, %v4613_v59  ;;  %v4632_v57 = vcombine.low %v4581_v16, %v4613_v59 }
 0x3d1   : > { %v5043_v32 = vcombine.high %v4998_v3, %v5030_v5  ;;  %v5042_v34 = vcombine.low %v4998_v3, %v5030_v5  ;;  %v4769_v14 = vcombine.high %v4717_v23, %v4749_v15  ;;  %8049 = vmatmul.mubr.msk.f32.vlgmr.msra.gmra.mrb[56].mxu1 %vm5060_vm1, %v11249_v40  ;;  %v4768_v8 = vcombine.low %v4717_v23, %v4749_v15 }
 0x3d2   : > { %v4853_v30 = vrot.slane %v4839_v47, %v9720_v38  ;;  %v4885_v55 = vrot.slane %v4871_v26, %v9720_v38  ;;  %v13010_v2 = vmov 0.0   ;;  %v4989_v36 = vrot.slane %v4975_v17, %v9720_v38  ;;  %v5397_v47 = vld [vmem:[%s12558_s3 + $0x10] sm:$0xff]  ;;  %v8508_v17 = vld [vmem:[%s12558_s3] sm:$0xff] }
 0x3d3   : > { %5137 = vmatprep.mubr.f32.mxu1 %v13010_v2  ;;  %v8251_v41 = vpack.c.bf16 %v5043_v32, %v4907_v35  ;;  %v8253_v60 = vpack.c.bf16 %v5042_v34, %v4906_v21  ;;  %v8239_v58 = vpack.c.bf16 %v4769_v14, %v4633_v51  ;;  %v8241_v6 = vpack.c.bf16 %v4768_v8, %v4632_v57  ;;  %v5053_v51 = vpop.permute.xlu1 %5052  ;;  %v5058_v14 = vpop.permute.xlu0 %5057 }
 0x3d4   : > { %v4905_v46 = vcombine.high %v4853_v30, %v4885_v55  ;;  %v5021_v29 = vrot.slane %v5007_v31, %v9720_v38  ;;  %v4904_v22 = vcombine.low %v4853_v30, %v4885_v55  ;;  %v4583_v27 = vcombine.high %v11086_v12, %v11089_v33  ;;  %v5398_v31 = vld [vmem:[%s12558_s3 + $0x18] sm:$0xff] }
 0x3d5   : > { %8252 = vmatprep.subr.bf16.mxu0 %v8251_v41  ;;  %8240 = vmatprep.subr.bf16.mxu1 %v8239_v58  ;;  %v4615_v28 = vcombine.high %v11092_v43, %v11095_v0  ;;  %v4719_v48 = vcombine.high %v11115_v25, %v11122_v7  ;;  %v4751_v13 = vcombine.high %v11125_v49, %v11128_v19  ;;  %v8621_v26 = vmov 3  }
 0x3d6   : > { %8254 = vmatpush1.bf16.msra.mxu0 %v8253_v60  ;;  %8242 = vmatpush1.bf16.msra.mxu1 %v8241_v6  ;;  %v5041_v63 = vcombine.high %v4989_v36, %v5021_v29  ;;  %v5040_v10 = vcombine.low %v4989_v36, %v5021_v29  ;;  %v4597_v56 = vrot.slane %v4583_v27, %v9720_v38 }
 0x3d7   : > { %8050 = vmatmul.mubr.msk.f32.gmra.mrb[58].mxu1 %vm5060_vm1, %v5047_v54  ;;  %v4629_v53 = vrot.slane %v4615_v28, %v9720_v38  ;;  %v4733_v12 = vrot.slane %v4719_v48, %v9720_v38  ;;  %v4855_v33 = vcombine.high %v11192_v52, %v11203_v24  ;;  %v4765_v25 = vrot.slane %v4751_v13, %v9720_v38 }
 0x3d8   : > { %v8243_v43 = vpack.c.bf16 %v5041_v63, %v4905_v46  ;;  %v8245_v0 = vpack.c.bf16 %v5040_v10, %v4904_v22  ;;  %5208 = vmatprep.mubr.f32.mxu1 %v13010_v2  ;;  %v4887_v7 = vcombine.high %v11206_v45, %v11209_v42  ;;  %v4991_v3 = vcombine.high %v11212_v37, %v11225_v20 }
 0x3d9   : > { %v4637_v49 = vcombine.high %v4597_v56, %v4629_v53  ;;  %v4636_v19 = vcombine.low %v4597_v56, %v4629_v53  ;;  %v4869_v35 = vrot.slane %v4855_v33, %v9720_v38  ;;  %8053 = vmatmul.mubr.msk.f32.vlgmr.msra.gmra.mrb[70].mxu0 %vm5060_vm1, %v11249_v40  ;;  %v4773_v52 = vcombine.high %v4733_v12, %v4765_v25 }
 0x3da   : > { %8244 = vmatprep.subr.bf16.mxu1 %v8243_v43  ;;  %v4772_v24 = vcombine.low %v4733_v12, %v4765_v25  ;;  %v4901_v21 = vrot.slane %v4887_v7, %v9720_v38  ;;  %v5023_v16 = vcombine.high %v11229_v11, %v11232_v44  ;;  %v5005_v45 = vrot.slane %v4991_v3, %v9720_v38 }
 0x3db   : > { %8246 = vmatpush1.bf16.msra.mxu1 %v8245_v0  ;;  %5291 = vmatprep.mubr.f32.mxu0 %v13010_v2  ;;  %v8255_v42 = vpack.c.bf16 %v4773_v52, %v4637_v49  ;;  %v5391_v0 = vld [vmem:[#allocation2 + $0xa0] sm:$0xff] }
 0x3dc   : > { %v8257_v5 = vpack.c.bf16 %v4772_v24, %v4636_v19  ;;  %v4909_v59 = vcombine.high %v4869_v35, %v4901_v21  ;;  %v5037_v37 = vrot.slane %v5023_v16, %v9720_v38  ;;  %v4908_v20 = vcombine.low %v4869_v35, %v4901_v21  ;;  %8374 = vset.pattern.permute.xlu1 %v8621_v26 }
 0x3dd   : > { %8054 = vmatmul.mubr.msk.f32.gmra.mrb[72].mxu0 %vm5060_vm1, %v5047_v54  ;;  %8256 = vmatprep.subr.bf16.mxu1 %v8255_v42 }
 0x3de   : > { %8051 = vmatmul.mubr.msk.f32.vlgmr.msra.gmra.mrb[60].mxu1 %vm5060_vm1, %v11249_v40  ;;  %v5045_v23 = vcombine.high %v5005_v45, %v5037_v37  ;;  %v5044_v15 = vcombine.low %v5005_v45, %v5037_v37  ;;  %5495 = vmatprep.mubr.f32.mxu0 %v13010_v2  ;;  %v5392_v45 = vld [vmem:[#allocation2 + $0xa8] sm:$0xff] }
 0x3df   : > { %8258 = vmatpush1.bf16.msra.mxu1 %v8257_v5  ;;  %5214 = vmatprep.mubr.f32.mxu1 %v13010_v2 }
 0x3e0   : > { %v8259_v11 = vpack.c.bf16 %v5045_v23, %v4909_v59  ;;  %v8261_v44 = vpack.c.bf16 %v5044_v15, %v4908_v20  ;;  %8375 = vset.pattern.permute.xlu0 %v8621_v26  ;;  %5401 = vperm.xlu1 %8374, %v8508_v17  }
 0x3e1   : > { %5411 = vperm.xlu0 %8375, %v5397_v47  }
 0x3e2   : > { %8260 = vmatprep.subr.bf16.mxu1 %v8259_v11  ;;  %8052 = vmatmul.mubr.msk.f32.gmra.mrb[62].mxu1 %vm5060_vm1, %v5047_v54 }
 0x3e3   : > { %8262 = vmatpush1.bf16.msra.mxu1 %v8261_v44  ;;  %5362 = vmatprep.mubr.f32.mxu1 %v13010_v2  ;;  %v5393_v44 = vld [vmem:[#allocation2 + $0xb0] sm:$0xff] }
 0x3e6   : > { %8055 = vmatmul.mubr.msk.f32.vlgmr.msra.gmra.mrb[64].mxu1 %vm5060_vm1, %v11249_v40  ;;  %v8509_v40 = vld [vmem:[%s12558_s3 + $0x8] sm:$0xff] }
 0x3e7   : > { %5368 = vmatprep.mubr.f32.mxu1 %v13010_v2  ;;  %5406 = vperm.xlu1 %8374, %v8509_v40  }
 0x3ea   : > { %8056 = vmatmul.mubr.msk.f32.gmra.mrb[66].mxu1 %vm5060_vm1, %v5047_v54 }
 0x3eb   : > { %5584 = vmatprep.mubr.f32.mxu1 %v13010_v2  ;;  %5416 = vperm.xlu1 %8374, %v5398_v31  }
 0x4a4   : > { %v5133_v32 = vpop.f32.mrb[56].mxu1 }
 0x4a5   : > { %v5135_v34 = vpop.f32.mrb[57].mxu1  ;;  %v5134_v57 = vadd.f32 %v5133_v32, %v5053_v51 }
 0x4a6   : > { %v5136_v30 = vadd.f32 %v5135_v34, %v5053_v51  ;;  %v5394_v34 = vld [vmem:[#allocation2 + $0xb8] sm:$0xff] }
 0x4a7   : > { %v5375_v36 = vmax.f32 %v5134_v57, 0.0 }
 0x4a8   : > { %v5376_v54 = vmax.f32 %v5136_v30, 0.0 }
 0x4aa   : > { %v5139_v8 = vpop.f32.mrb[58].mxu1 }
 0x4ab   : > { %v5141_v55 = vpop.f32.mrb[59].mxu1  ;;  %v5140_v41 = vadd.f32 %v5139_v8, %v5058_v14 }
 0x4ac   : > { %v5142_v60 = vadd.f32 %v5141_v55, %v5058_v14  ;;  %v5287_v58 = vpop.f32.mrb[70].mxu0 }
 0x4ad   : > { %v5383_v6 = vmax.f32 %v5140_v41, 0.0  ;;  %v5288_v46 = vadd.f32 %v5287_v58, %v5053_v51  ;;  %v5289_v29 = vpop.f32.mrb[71].mxu0 }
 0x4ae   : > { %v5384_v22 = vmax.f32 %v5142_v60, 0.0  ;;  %v5290_v27 = vadd.f32 %v5289_v29, %v5053_v51 }
 0x4af   : > { %v8265_v28 = vpack.c.bf16 %v5383_v6, %v5375_v36  ;;  %v5379_v13 = vmax.f32 %v5288_v46, 0.0  ;;  %v11353_v6 = vpop.permute.xlu1 %5401 }
 0x4b0   : > { %v8263_v48 = vpack.c.bf16 %v5384_v22, %v5376_v54  ;;  %v5293_v63 = vpop.f32.mrb[72].mxu0  ;;  %v5380_v33 = vmax.f32 %v5290_v27, 0.0 }
 0x4b1   : > { %v5210_v10 = vpop.f32.mrb[60].mxu1  ;;  %v5294_v56 = vadd.f32 %v5293_v63, %v5058_v14  ;;  %v5295_v53 = vpop.f32.mrb[73].mxu0 }
 0x4b2   : > { %v5212_v12 = vpop.f32.mrb[61].mxu1  ;;  %8264 = vmatprep.subr.bf16.mxu0 %v8263_v48  ;;  %v5296_v43 = vadd.f32 %v5295_v53, %v5058_v14  ;;  %v5211_v7 = vadd.f32 %v5210_v10, %v5053_v51 }
 0x4b3   : > { %8266 = vmatpush1.bf16.msra.mxu0 %v8265_v28  ;;  %v5387_v25 = vmax.f32 %v5294_v56, 0.0  ;;  %v5213_v35 = vadd.f32 %v5212_v12, %v5053_v51  ;;  %v11357_v28 = vpop.permute.xlu1 %5406 }
 0x4b4   : > { %v5388_v49 = vmax.f32 %v5296_v43, 0.0  ;;  %v5377_v42 = vmax.f32 %v5211_v7, 0.0 }
 0x4b5   : > { %v5216_v19 = vpop.f32.mrb[62].mxu1  ;;  %v8273_v3 = vpack.c.bf16 %v5387_v25, %v5379_v13  ;;  %v5378_v59 = vmax.f32 %v5213_v35, 0.0 }
 0x4b6   : > { %v5218_v52 = vpop.f32.mrb[63].mxu1  ;;  %v5217_v24 = vadd.f32 %v5216_v19, %v5058_v14  ;;  %8057 = vmatmul.mubr.msk.f32.vlgmr.msra.gmra.mrb[74].mxu0 %vm3165_vm0, %v5391_v0  ;;  %v8271_v21 = vpack.c.bf16 %v5388_v49, %v5380_v33 }
 0x4b7   : > { %v5219_v16 = vadd.f32 %v5218_v52, %v5058_v14  ;;  %5501 = vmatprep.mubr.f32.mxu0 %v13010_v2 }
 0x4b8   : > { %v5385_v5 = vmax.f32 %v5217_v24, 0.0  ;;  %8272 = vmatprep.subr.bf16.mxu0 %v8271_v21 }
 0x4b9   : > { %v5386_v37 = vmax.f32 %v5219_v16, 0.0  ;;  %v5364_v20 = vpop.f32.mrb[64].mxu1  ;;  %8274 = vmatpush1.bf16.msra.mxu0 %v8273_v3  ;;  %v11381_v16 = vpop.permute.xlu0 %5411 }
 0x4ba   : > { %v8269_v23 = vpack.c.bf16 %v5385_v5, %v5377_v42  ;;  %v5366_v15 = vpop.f32.mrb[65].mxu1  ;;  %8058 = vmatmul.mubr.msk.f32.gmra.mrb[76].mxu0 %vm3165_vm0, %v5392_v45  ;;  %v5365_v47 = vadd.f32 %v5364_v20, %v5053_v51 }
 0x4bb   : > { %v8267_v11 = vpack.c.bf16 %v5386_v37, %v5378_v59  ;;  %5507 = vmatprep.mubr.f32.mxu0 %v13010_v2  ;;  %v5367_v26 = vadd.f32 %v5366_v15, %v5053_v51 }
 0x4bc   : > { %v5381_v57 = vmax.f32 %v5365_v47, 0.0 }
 0x4bd   : > { %8268 = vmatprep.subr.bf16.mxu1 %v8267_v11  ;;  %v5370_v17 = vpop.f32.mrb[66].mxu1  ;;  %v5382_v30 = vmax.f32 %v5367_v26, 0.0 }
 0x4be   : > { %8270 = vmatpush1.bf16.msra.mxu1 %v8269_v23  ;;  %v5371_v40 = vadd.f32 %v5370_v17, %v5058_v14  ;;  %v5372_v31 = vpop.f32.mrb[67].mxu1  ;;  %8059 = vmatmul.mubr.msk.f32.gmra.mrb[78].mxu0 %vm3165_vm0, %v5393_v44 }
 0x4bf   : > { %v5373_v32 = vadd.f32 %v5372_v31, %v5058_v14  ;;  %5513 = vmatprep.mubr.f32.mxu0 %v13010_v2 }
 0x4c0   : > { %v5389_v8 = vmax.f32 %v5371_v40, 0.0 }
 0x4c1   : > { %8061 = vmatmul.mubr.msk.f32.vlgmr.msra.gmra.mrb[68].mxu1 %vm3165_vm0, %v5391_v0  ;;  %v5390_v55 = vmax.f32 %v5373_v32, 0.0 }
 0x4c2   : > { %5590 = vmatprep.mubr.f32.mxu1 %v13010_v2  ;;  %v8277_v41 = vpack.c.bf16 %v5389_v8, %v5381_v57  ;;  %8060 = vmatmul.mubr.msk.f32.gmra.mrb[80].mxu0 %vm3165_vm0, %v5394_v34 }
 0x4c3   : > { %v8275_v51 = vpack.c.bf16 %v5390_v55, %v5382_v30  ;;  %5673 = vmatprep.mubr.f32.mxu0 %v13010_v2 }
 0x4c5   : > { %8062 = vmatmul.mubr.msk.f32.gmra.mrb[70].mxu1 %vm3165_vm0, %v5392_v45  ;;  %8276 = vmatprep.subr.bf16.mxu1 %v8275_v51 }
 0x4c6   : > { %5596 = vmatprep.mubr.f32.mxu1 %v13010_v2  ;;  %8278 = vmatpush1.bf16.msra.mxu1 %v8277_v41 }
 0x4c7   : > { %8065 = vmatmul.mubr.msk.f32.vlgmr.msra.gmra.mrb[82].mxu0 %vm3165_vm0, %v5391_v0 }
 0x4c8   : > { %5679 = vmatprep.mubr.f32.mxu0 %v13010_v2 }
 0x4c9   : > { %8063 = vmatmul.mubr.msk.f32.gmra.mrb[72].mxu1 %vm3165_vm0, %v5393_v44 }
 0x4ca   : > { %5602 = vmatprep.mubr.f32.mxu1 %v13010_v2 }
 0x4cb   : > { %8066 = vmatmul.mubr.msk.f32.gmra.mrb[84].mxu0 %vm3165_vm0, %v5392_v45 }
 0x4cc   : > { %5685 = vmatprep.mubr.f32.mxu0 %v13010_v2 }
 0x4cd   : > { %8064 = vmatmul.mubr.msk.f32.gmra.mrb[74].mxu1 %vm3165_vm0, %v5394_v34 }
 0x4ce   : > { %5762 = vmatprep.mubr.f32.mxu1 %v13010_v2 }
 0x4cf   : > { %8067 = vmatmul.mubr.msk.f32.gmra.mrb[86].mxu0 %vm3165_vm0, %v5393_v44 }
 0x4d0   : > { %5691 = vmatprep.mubr.f32.mxu0 %v13010_v2 }
 0x4d1   : > { %8069 = vmatmul.mubr.msk.f32.vlgmr.msra.gmra.mrb[76].mxu1 %vm3165_vm0, %v5391_v0 }
 0x4d2   : > { %5768 = vmatprep.mubr.f32.mxu1 %v13010_v2 }
 0x4d3   : > { %8068 = vmatmul.mubr.msk.f32.gmra.mrb[88].mxu0 %vm3165_vm0, %v5394_v34 }
 0x4d5   : > { %8070 = vmatmul.mubr.msk.f32.gmra.mrb[78].mxu1 %vm3165_vm0, %v5392_v45 }
 0x4d6   : > { %5774 = vmatprep.mubr.f32.mxu1 %v13010_v2 }
 0x4d9   : > { %8071 = vmatmul.mubr.msk.f32.gmra.mrb[80].mxu1 %vm3165_vm0, %v5393_v44 }
 0x4da   : > { %5780 = vmatprep.mubr.f32.mxu1 %v13010_v2 }
 0x4dd   : > { %8072 = vmatmul.mubr.msk.f32.gmra.mrb[82].mxu1 %vm3165_vm0, %v5394_v34 }
 0x589   : > { %v5497_v14 = vpop.f32.mrb[74].mxu0 }
 0x58a   : > { %v5499_v60 = vpop.f32.mrb[75].mxu0  ;;  %v5498_v54 = vadd.f32 %v5497_v14, %v11353_v6 }
 0x58b   : > { %v5500_v27 = vadd.f32 %v5499_v60, %v11353_v6 }
 0x58d   : > { %v5503_v58 = vpop.f32.mrb[76].mxu0 }
 0x58e   : > { %v5505_v36 = vpop.f32.mrb[77].mxu0  ;;  %v5504_v12 = vadd.f32 %v5503_v58, %v11357_v28 }
 0x58f   : > { %v5506_v19 = vadd.f32 %v5505_v36, %v11357_v28 }
 0x591   : > { %v5509_v46 = vpop.f32.mrb[78].mxu0 }
 0x592   : > { %v5511_v29 = vpop.f32.mrb[79].mxu0  ;;  %v5510_v26 = vadd.f32 %v5509_v46, %v11381_v16 }
 0x593   : > { %v5512_v32 = vadd.f32 %v5511_v29, %v11381_v16 }
 0x594   : > { %v5586_v22 = vpop.f32.mrb[68].mxu1 }
 0x595   : > { %v5588_v48 = vpop.f32.mrb[69].mxu1  ;;  %v11359_v63 = vpop.f32.mrb[80].mxu0  ;;  %v5587_v2 = vadd.f32 %v5586_v22, %v11353_v6 }
 0x596   : > { %v11362_v10 = vpop.f32.mrb[81].mxu0  ;;  %v5589_v13 = vadd.f32 %v5588_v48, %v11353_v6 }
 0x597   : > { %v5787_v56 = vcombine.low %v5498_v54, %v5587_v2  ;;  %v5788_v53 = vcombine.high %v5498_v54, %v5587_v2 }
 0x598   : > { %v5592_v33 = vpop.f32.mrb[70].mxu1  ;;  %v5803_v43 = vcombine.low %v5500_v27, %v5589_v13  ;;  %v5804_v0 = vcombine.high %v5500_v27, %v5589_v13 }
 0x599   : > { %v5594_v25 = vpop.f32.mrb[71].mxu1  ;;  %v11367_v7 = vrot.slane %v5787_v56, %v9695_v61  ;;  %v11370_v49 = vrot.slane %v5788_v53, %v9695_v61  ;;  %v5593_v35 = vadd.f32 %v5592_v33, %v11357_v28 }
 0x59a   : > { %v5675_v3 = vpop.f32.mrb[82].mxu0  ;;  %v11375_v52 = vrot.slane %v5803_v43, %v9695_v61  ;;  %v11378_v24 = vrot.slane %v5804_v0, %v9695_v61  ;;  %v5595_v21 = vadd.f32 %v5594_v25, %v11357_v28 }
 0x59b   : > { %v5677_v45 = vpop.f32.mrb[83].mxu0  ;;  %v5923_v42 = vcombine.low %v5504_v12, %v5593_v35  ;;  %v5924_v5 = vcombine.high %v5504_v12, %v5593_v35  ;;  %v5676_v48 = vadd.f32 %v5675_v3, %v11353_v6 }
 0x59c   : > { %v5598_v59 = vpop.f32.mrb[72].mxu1  ;;  %v5851_v37 = vcombine.low %v11367_v7, %v11375_v52  ;;  %v5852_v20 = vcombine.high %v11367_v7, %v11375_v52  ;;  %v5867_v23 = vcombine.low %v11370_v49, %v11378_v24  ;;  %v5868_v11 = vcombine.high %v11370_v49, %v11378_v24 }
 0x59d   : > { %v5600_v15 = vpop.f32.mrb[73].mxu1  ;;  %v11392_v44 = vrot.slane %v5923_v42, %v9695_v61  ;;  %v5939_v47 = vcombine.low %v5506_v19, %v5595_v21  ;;  %v11396_v40 = vrot.slane %v5924_v5, %v9695_v61  ;;  %v5940_v31 = vcombine.high %v5506_v19, %v5595_v21 }
 0x59e   : > { %v5681_v17 = vpop.f32.mrb[84].mxu0  ;;  %v5599_v8 = vadd.f32 %v5598_v59, %v11381_v16  ;;  %v5601_v41 = vadd.f32 %v5600_v15, %v11381_v16  ;;  %v5678_v53 = vadd.f32 %v5677_v45, %v11353_v6  ;;  %v5875_v7 = vrot.slane %v5867_v23, %v9720_v38 }
 0x59f   : > { %v5683_v34 = vpop.f32.mrb[85].mxu0  ;;  %v11400_v57 = vrot.slane %v5939_v47, %v9695_v61  ;;  %v11406_v55 = vrot.slane %v5940_v31, %v9695_v61  ;;  %v11440_v35 = vadd.f32 %v5681_v17, %v11357_v28  ;;  %v11454_v31 = vpop.permute.xlu1 %5416  ;;  %v5882_v52 = vrot.slane %v5868_v11, %v9720_v38 }
 0x5a0   : > { %v11403_v30 = vpop.f32.mrb[74].mxu1  ;;  %v6059_v58 = vcombine.low %v5510_v26, %v5599_v8  ;;  %v6060_v36 = vcombine.high %v5510_v26, %v5599_v8  ;;  %v6075_v22 = vcombine.low %v5512_v32, %v5601_v41  ;;  %v6076_v27 = vcombine.high %v5512_v32, %v5601_v41 }
 0x5a1   : > { %v11409_v51 = vpop.f32.mrb[75].mxu1  ;;  %v5987_v14 = vcombine.low %v11392_v44, %v11400_v57  ;;  %v11459_v41 = vadd.f32 %v5683_v34, %v11357_v28  ;;  %v11475_v34 = vadd.f32 %v11359_v63, %v11454_v31 }
 0x5a2   : > { %v11419_v54 = vpop.f32.mrb[86].mxu0  ;;  %v11425_v13 = vrot.slane %v6059_v58, %v9695_v61  ;;  %v11429_v12 = vrot.slane %v6060_v36, %v9695_v61  ;;  %v11433_v0 = vrot.slane %v6075_v22, %v9695_v61  ;;  %v11436_v25 = vrot.slane %v6076_v27, %v9695_v61 }
 0x5a3   : > { %v11422_v2 = vpop.f32.mrb[87].mxu0 }
 0x5a4   : > { %v5764_v56 = vpop.f32.mrb[76].mxu1 }
 0x5a5   : > { %v5765_v33 = vadd.f32 %v5764_v56, %v11353_v6  ;;  %v5766_v43 = vpop.f32.mrb[77].mxu1 }
 0x5a6   : > { %v5767_v19 = vadd.f32 %v5766_v43, %v11353_v6  ;;  %v11442_v3 = vpop.f32.mrb[88].mxu0 }
 0x5a7   : > { %13011 = vst [vmem:[#allocation54_spill] sm:$0xff] %v11442_v3  ;;  %v5819_v21 = vcombine.low %v5676_v48, %v5765_v33  ;;  %v5820_v45 = vcombine.high %v5676_v48, %v5765_v33  ;;  %v11448_v59 = vpop.f32.mrb[89].mxu0  ;;  %v13015_v3 = vcombine.high %v11392_v44, %v11400_v57 }
 0x5a8   : > { %13012 = vst [vmem:[#allocation55_spill] sm:$0xff] %v11448_v59  ;;  %v5835_v15 = vcombine.low %v5678_v53, %v5767_v19  ;;  %v5836_v47 = vcombine.high %v5678_v53, %v5767_v19  ;;  %v5770_v26 = vpop.f32.mrb[78].mxu1 }
 0x5a9   : > { %v5827_v32 = vrot.slane %v5819_v21, %v9695_v61  ;;  %v5834_v8 = vrot.slane %v5820_v45, %v9695_v61  ;;  %v11462_v58 = vadd.f32 %v5770_v26, %v11357_v28  ;;  %v5772_v36 = vpop.f32.mrb[79].mxu1  ;;  %v6002_v59 = vrot.slane %v13015_v3, %v9720_v38 }
 0x5aa   : > { %v5843_v22 = vrot.slane %v5835_v15, %v9695_v61  ;;  %v5850_v27 = vrot.slane %v5836_v47, %v9695_v61  ;;  %v11467_v48 = vadd.f32 %v5772_v36, %v11357_v28  ;;  %v5859_v28 = vrot.slane %v5851_v37, %v9720_v38 }
 0x5ab   : > { %v5866_v15 = vrot.slane %v5852_v20, %v9720_v38  ;;  %v11506_v20 = vrot.slane %v5987_v14, %v9720_v38  ;;  %v13019_v3 = vcombine.high %v11396_v40, %v11406_v55 }
 0x5ac   : > { %v5883_v33 = vcombine.low %v5827_v32, %v5843_v22  ;;  %v5884_v43 = vcombine.high %v5827_v32, %v5843_v22  ;;  %v5899_v19 = vcombine.low %v5834_v8, %v5850_v27  ;;  %v5900_v21 = vcombine.high %v5834_v8, %v5850_v27  ;;  %v11477_v45 = vpop.f32.mrb[80].mxu1 }
 0x5ad   : > { %v11491_v26 = vpop.f32.mrb[81].mxu1  ;;  %v11510_v22 = vadd.f32 %v11362_v10, %v11454_v31  ;;  %v13018_v44 = vcombine.low %v11459_v41, %v11467_v48 }
 0x5ae   : > { %v5891_v32 = vrot.slane %v5883_v33, %v9720_v38  ;;  %v5898_v8 = vrot.slane %v5884_v43, %v9720_v38  ;;  %v5907_v36 = vrot.slane %v5899_v19, %v9720_v38  ;;  %v5914_v37 = vrot.slane %v5900_v21, %v9720_v38 }
 0x5af   : > { %v5979_v57 = vrot.slane %v13018_v44, %v9695_v61 }
 0x5b0   : > { %v11512_v27 = vcombine.low %v5859_v28, %v5891_v32  ;;  %v11514_v33 = vcombine.high %v5859_v28, %v5891_v32  ;;  %v11516_v43 = vcombine.low %v5866_v15, %v5898_v8  ;;  %v11518_v19 = vcombine.high %v5866_v15, %v5898_v8  ;;  %v11520_v23 = vpop.f32.mrb[82].mxu1 }
 0x5b1   : > { %13013 = vst [vmem:[#allocation63_spill] sm:$0xff] %v11520_v23  ;;  %v11522_v21 = vcombine.low %v5875_v7, %v5907_v36  ;;  %v11524_v49 = vcombine.high %v5875_v7, %v5907_v36  ;;  %v11526_v24 = vcombine.low %v5882_v52, %v5914_v37  ;;  %v11528_v11 = vcombine.high %v5882_v52, %v5914_v37  ;;  %v11530_v10 = vpop.f32.mrb[83].mxu1 }
 0x5b2   : > { %13014 = vst [vmem:[#allocation64_spill] sm:$0xff] %v11530_v10  ;;  %v6331_v14 = vrot.slane %v11512_v27, 4  ;;  %v6337_v28 = vrot.slane %v11514_v33, 4  ;;  %v6343_v32 = vrot.slane %v11516_v43, 4  ;;  %v6349_v15 = vrot.slane %v11518_v19, 4 }
 0x5b3   : > { %v6355_v8 = vrot.slane %v11522_v21, 4  ;;  %v6361_v17 = vrot.slane %v11524_v49, 4  ;;  %v6367_v36 = vrot.slane %v11526_v24, 4  ;;  %v6373_v7 = vrot.slane %v11528_v11, 4 }
 0x5b4   : > { %v6332_v37 = vmax.f32 %v11512_v27, %v6331_v14  ;;  %v6338_v52 = vmax.f32 %v11514_v33, %v6337_v28  ;;  %v6344_v6 = vmax.f32 %v11516_v43, %v6343_v32  ;;  %v6350_v5 = vmax.f32 %v11518_v19, %v6349_v15 }
 0x5b5   : > { %v6356_v42 = vmax.f32 %v11522_v21, %v6355_v8  ;;  %v6362_v47 = vmax.f32 %v11524_v49, %v6361_v17  ;;  %v6368_v53 = vmax.f32 %v11526_v24, %v6367_v36  ;;  %v6374_v29 = vmax.f32 %v11528_v11, %v6373_v7 }
 0x5b6   : > { %v6333_v63 = vrot.slane %v6332_v37, 2  ;;  %v6339_v56 = vrot.slane %v6338_v52, 2  ;;  %v6345_v46 = vrot.slane %v6344_v6, 2  ;;  %v6351_v60 = vrot.slane %v6350_v5, 2 }
 0x5b7   : > { %v6357_v62 = vrot.slane %v6356_v42, 2  ;;  %v6363_v14 = vrot.slane %v6362_v47, 2  ;;  %v6369_v39 = vrot.slane %v6368_v53, 2  ;;  %v6375_v28 = vrot.slane %v6374_v29, 2 }
 0x5b8   : > { %v6334_v50 = vmax.f32 %v6332_v37, %v6333_v63  ;;  %v6340_v32 = vmax.f32 %v6338_v52, %v6339_v56  ;;  %v6346_v4 = vmax.f32 %v6344_v6, %v6345_v46  ;;  %v6352_v15 = vmax.f32 %v6350_v5, %v6351_v60 }
 0x5b9   : > { %v6358_v18 = vmax.f32 %v6356_v42, %v6357_v62  ;;  %v6364_v8 = vmax.f32 %v6362_v47, %v6363_v14  ;;  %v6370_v9 = vmax.f32 %v6368_v53, %v6369_v39  ;;  %v6376_v17 = vmax.f32 %v6374_v29, %v6375_v28 }
 0x5ba   : > { %v6335_v1 = vrot.slane %v6334_v50, 1  ;;  %v6341_v36 = vrot.slane %v6340_v32, 1  ;;  %v6347_v10 = vrot.slane %v6346_v4, 1  ;;  %v6353_v7 = vrot.slane %v6352_v15, 1 }
 0x5bb   : > { %v6359_v23 = vrot.slane %v6358_v18, 1  ;;  %v13016_v56 = vcombine.low %v11396_v40, %v11406_v55  ;;  %v11558_v62 = vadd.f32 %v11419_v54, %v11381_v16  ;;  %v6365_v39 = vrot.slane %v6364_v8, 1 }
 0x5bc   : > { %v13017_v60 = vcombine.low %v11440_v35, %v11462_v58  ;;  %v6018_v42 = vrot.slane %v13019_v3, %v9720_v38  ;;  %v6342_v5 = vmax.f32 %v6340_v32, %v6341_v36  ;;  %v6371_v6 = vrot.slane %v6370_v9, 1 }
 0x5bd   : > { %v6011_v46 = vrot.slane %v13016_v56, %v9720_v38  ;;  %v6377_v54 = vrot.slane %v6376_v17, 1  ;;  %v11574_v53 = vadd.f32 %v11422_v2, %v11381_v16  ;;  %v6336_v63 = vmax.f32 %v6334_v50, %v6335_v1 }
 0x5be   : > { %v5963_v29 = vrot.slane %v13017_v60, %v9695_v61  ;;  %v6348_v47 = vmax.f32 %v6346_v4, %v6347_v10  ;;  %v11576_v37 = vmax.f32 %v6352_v15, %v6353_v7  ;;  %v11580_v52 = vadd.f32 %v11403_v30, %v11454_v31 }
 0x5bf   : > { %v11582_v14 = vmax.f32 %v6358_v18, %v6359_v23  ;;  %v13020_v40 = vcombine.high %v11440_v35, %v11462_v58  ;;  %v13021_v2 = vcombine.high %v11459_v41, %v11467_v48  ;;  %v11594_v1 = vadd.f32 %v11409_v51, %v11454_v31 }
 0x5c0   : > { %v11596_v4 = vmax.f32 %v6364_v8, %v6365_v39  ;;  %v6019_v50 = vcombine.low %v5963_v29, %v5979_v57  ;;  %v11600_v18 = vadd.f32 %v11477_v45, %v11381_v16  ;;  %v13022_v30 = vcombine.low %v11425_v13, %v11433_v0 }
 0x5c1   : > { %v5970_v55 = vrot.slane %v13020_v40, %v9695_v61  ;;  %v5986_v28 = vrot.slane %v13021_v2, %v9695_v61  ;;  %v11608_v58 = vmax.f32 %v6370_v9, %v6371_v6  ;;  %v11610_v41 = vmax.f32 %v6376_v17, %v6377_v54 }
 0x5c2   : > { %v11606_v35 = vrot.slane %v13022_v30, %v9720_v38  ;;  %v6524_v51 = vsub.f32 %v11514_v33, %v6342_v5  ;;  %v6020_v48 = vcombine.high %v5963_v29, %v5979_v57  ;;  %v6523_v23 = vsub.f32 %v11512_v27, %v6336_v63 }
 0x5c3   : > { %v6525_v10 = vsub.f32 %v11516_v43, %v6348_v47  ;;  %v6526_v45 = vsub.f32 %v11518_v19, %v11576_v37  ;;  %v6027_v32 = vrot.slane %v6019_v50, %v9720_v38  ;;  %v6527_v15 = vsub.f32 %v11522_v21, %v11582_v14 }
 0x5c4   : > { %v6034_v9 = vrot.slane %v6020_v48, %v9720_v38  ;;  %v6035_v8 = vcombine.low %v5970_v55, %v5986_v28  ;;  %v6036_v17 = vcombine.high %v5970_v55, %v5986_v28  ;;  %v6528_v33 = vsub.f32 %v11524_v49, %v11596_v4 }
 0x5c5   : > { %v11624_v36 = vcombine.low %v11506_v20, %v6027_v32  ;;  %v11627_v27 = vcombine.high %v11506_v20, %v6027_v32  ;;  %v6091_v43 = vcombine.low %v11558_v62, %v11600_v18  ;;  %v6557_v19 = vmul.f32 1.442695, %v6524_v51 }
 0x5c6   : > { %v6043_v7 = vrot.slane %v6035_v8, %v9720_v38  ;;  %v6050_v21 = vrot.slane %v6036_v17, %v9720_v38  ;;  %v11633_v56 = vcombine.low %v6002_v59, %v6034_v9  ;;  %v6529_v39 = vsub.f32 %v11526_v24, %v11608_v58 }
 0x5c7   : > { %v11637_v49 = vcombine.high %v6002_v59, %v6034_v9  ;;  %v6379_v60 = vrot.slane %v11624_v36, 4  ;;  %v6385_v20 = vrot.slane %v11627_v27, 4  ;;  %v6555_v29 = vmul.f32 1.442695, %v6523_v23 }
 0x5c8   : > { %v11641_v44 = vcombine.low %v6011_v46, %v6043_v7  ;;  %v11643_v57 = vcombine.high %v6011_v46, %v6043_v7  ;;  %v11645_v3 = vcombine.low %v6018_v42, %v6050_v21  ;;  %v6530_v5 = vsub.f32 %v11528_v11, %v11610_v41 }
 0x5c9   : > { %v11649_v6 = vcombine.high %v6018_v42, %v6050_v21  ;;  %v6380_v24 = vmax.f32 %v11624_v36, %v6379_v60  ;;  %v6386_v59 = vmax.f32 %v11627_v27, %v6385_v20  ;;  %8380 = vpow2.f32 %v6557_v19 }
 0x5ca   : > { %v6391_v54 = vrot.slane %v11633_v56, 4  ;;  %v6397_v63 = vrot.slane %v11637_v49, 4  ;;  %v6403_v47 = vrot.slane %v11641_v44, 4  ;;  %v6409_v14 = vrot.slane %v11643_v57, 4 }
 0x5cb   : > { %v6381_v46 = vrot.slane %v6380_v24, 2  ;;  %v6387_v37 = vrot.slane %v6386_v59, 2  ;;  %v6415_v40 = vrot.slane %v11645_v3, 4  ;;  %8382 = vpow2.f32 %v6555_v29 }
 0x5cc   : > { %v6392_v11 = vmax.f32 %v11633_v56, %v6391_v54  ;;  %v6398_v42 = vmax.f32 %v11637_v49, %v6397_v63  ;;  %v6404_v55 = vmax.f32 %v11641_v44, %v6403_v47  ;;  %v6410_v4 = vmax.f32 %v11643_v57, %v6409_v14 }
 0x5cd   : > { %v6382_v2 = vmax.f32 %v6380_v24, %v6381_v46  ;;  %v6388_v28 = vmax.f32 %v6386_v59, %v6387_v37  ;;  %v6416_v50 = vmax.f32 %v11645_v3, %v6415_v40  ;;  %v6559_v30 = vmul.f32 1.442695, %v6525_v10 }
 0x5ce   : > { %v6393_v58 = vrot.slane %v6392_v11, 2  ;;  %v6399_v41 = vrot.slane %v6398_v42, 2  ;;  %v6405_v51 = vrot.slane %v6404_v55, 2  ;;  %v6411_v32 = vrot.slane %v6410_v4, 2 }
 0x5cf   : > { %v6383_v48 = vrot.slane %v6382_v2, 1  ;;  %v6389_v23 = vrot.slane %v6388_v28, 1  ;;  %v6421_v9 = vrot.slane %v11649_v6, 4  ;;  %v6417_v7 = vrot.slane %v6416_v50, 2 }
 0x5d0   : > { %v6394_v8 = vmax.f32 %v6392_v11, %v6393_v58  ;;  %v6400_v17 = vmax.f32 %v6398_v42, %v6399_v41  ;;  %v6406_v19 = vmax.f32 %v6404_v55, %v6405_v51  ;;  %v6561_v21 = vmul.f32 1.442695, %v6526_v45 }
 0x5d1   : > { %v6384_v60 = vmax.f32 %v6382_v2, %v6383_v48  ;;  %v6412_v20 = vmax.f32 %v6410_v4, %v6411_v32  ;;  %v13023_v29 = vcombine.high %v11425_v13, %v11433_v0  ;;  %v6563_v24 = vmul.f32 1.442695, %v6527_v15 }
 0x5d2   : > { %v6565_v59 = vmul.f32 1.442695, %v6528_v33  ;;  %v6418_v54 = vmax.f32 %v6416_v50, %v6417_v7  ;;  %v13024_v63 = vcombine.low %v11429_v12, %v11436_v25  ;;  %v6567_v46 = vmul.f32 1.442695, %v6529_v39 }
 0x5d3   : > { %v11668_v10 = vrot.slane %v13023_v29, %v9720_v38  ;;  %v6569_v37 = vmul.f32 1.442695, %v6530_v5  ;;  %v6390_v45 = vmax.f32 %v6388_v28, %v6389_v23  ;;  %v6422_v14 = vmax.f32 %v11649_v6, %v6421_v9  ;;  %v11677_v40 = vpop.eup %8380 }
 0x5d4   : > { %v11674_v47 = vrot.slane %v13024_v63, %v9720_v38  ;;  %13025 = vst [vmem:[#allocation65_spill] sm:$0xff] %v11677_v40  ;;  %8384 = vpow2.f32 %v6559_v30  ;;  %v6395_v13 = vrot.slane %v6394_v8, 1  ;;  %v6401_v0 = vrot.slane %v6400_v17, 1 }
 0x5d5   : > { %v6407_v11 = vrot.slane %v6406_v19, 1  ;;  %8386 = vpow2.f32 %v6561_v21  ;;  %v6413_v15 = vrot.slane %v6412_v20, 1  ;;  %v6423_v33 = vrot.slane %v6422_v14, 2  ;;  %v11680_v55 = vpop.eup %8382 }
 0x5d6   : > { %v6531_v42 = vsub.f32 %v11624_v36, %v6384_v60  ;;  %8388 = vpow2.f32 %v6563_v24  ;;  %v6419_v2 = vrot.slane %v6418_v54, 1  ;;  %v5779_v39 = vadd.f32 %v11491_v26, %v11381_v16 }
 0x5d7   : > { %v13026_v5 = vcombine.high %v11429_v12, %v11436_v25  ;;  %8390 = vpow2.f32 %v6565_v59  ;;  %v6625_v4 = vrot.slane %v11677_v40, 4  ;;  %v6532_v50 = vsub.f32 %v11627_v27, %v6390_v45 }
 0x5d8   : > { %v6092_v36 = vcombine.high %v11558_v62, %v11600_v18  ;;  %8392 = vpow2.f32 %v6567_v46  ;;  %v6396_v30 = vmax.f32 %v6394_v8, %v6395_v13  ;;  %v6402_v58 = vmax.f32 %v6400_v17, %v6401_v0 }
 0x5d9   : > { %v6154_v28 = vrot.slane %v13026_v5, %v9720_v38  ;;  %v6408_v41 = vmax.f32 %v6406_v19, %v6407_v11  ;;  %8394 = vpow2.f32 %v6569_v37  ;;  %v6414_v51 = vmax.f32 %v6412_v20, %v6413_v15 }
 0x5da   : > { %v6424_v16 = vmax.f32 %v6422_v14, %v6423_v33  ;;  %v6571_v26 = vmul.f32 1.442695, %v6531_v42  ;;  %v11693_v12 = vmax.f32 %v6418_v54, %v6419_v2  ;;  %v6099_v25 = vrot.slane %v6091_v43, %v9695_v61 }
 0x5db   : > { %v6107_v27 = vcombine.low %v11574_v53, %v5779_v39  ;;  %v11701_v23 = vadd.f32 %v11677_v40, %v6625_v4  ;;  %v6573_v32 = vmul.f32 1.442695, %v6532_v50  ;;  %v6106_v9 = vrot.slane %v6092_v36, %v9695_v61 }
 0x5dc   : > { %v6108_v8 = vcombine.high %v11574_v53, %v5779_v39  ;;  %v6533_v17 = vsub.f32 %v11633_v56, %v6396_v30  ;;  %v6534_v19 = vsub.f32 %v11637_v49, %v6402_v58  ;;  %v6535_v7 = vsub.f32 %v11641_v44, %v6408_v41 }
 0x5dd   : > { %v6115_v21 = vrot.slane %v6107_v27, %v9695_v61  ;;  %v6425_v62 = vrot.slane %v6424_v16, 1  ;;  %v6536_v18 = vsub.f32 %v11643_v57, %v6414_v51  ;;  %8396 = vpow2.f32 %v6571_v26 }
 0x5de   : > { %v6122_v43 = vrot.slane %v6108_v8, %v9695_v61  ;;  %v11711_v60 = vpop.eup %8384  ;;  %v6537_v20 = vsub.f32 %v11645_v3, %v11693_v12  ;;  %v6195_v56 = vcombine.low %v11475_v34, %v11580_v52  ;;  %8398 = vpow2.f32 %v6573_v32 }
 0x5df   : > { %v6155_v53 = vcombine.low %v6099_v25, %v6115_v21  ;;  %v6156_v29 = vcombine.high %v6099_v25, %v6115_v21  ;;  %v11717_v49 = vpop.eup %8386  ;;  %v6196_v57 = vcombine.high %v11475_v34, %v11580_v52  ;;  %v6575_v54 = vmul.f32 1.442695, %v6533_v17 }
 0x5e0   : > { %v6171_v44 = vcombine.low %v6106_v9, %v6122_v43  ;;  %v6172_v24 = vcombine.high %v6106_v9, %v6122_v43  ;;  %v11721_v59 = vpop.eup %8388  ;;  %v6211_v46 = vcombine.low %v11510_v22, %v11594_v1  ;;  %v6426_v45 = vmax.f32 %v6424_v16, %v6425_v62 }
 0x5e1   : > { %v6163_v63 = vrot.slane %v6155_v53, %v9720_v38  ;;  %v6170_v3 = vrot.slane %v6156_v29, %v9720_v38  ;;  %v11727_v37 = vpop.eup %8390  ;;  %v6577_v14 = vmul.f32 1.442695, %v6534_v19  ;;  %v6579_v15 = vmul.f32 1.442695, %v6535_v7 }
 0x5e2   : > { %v6179_v13 = vrot.slane %v6171_v44, %v9720_v38  ;;  %v6186_v0 = vrot.slane %v6172_v24, %v9720_v38  ;;  %v11731_v11 = vpop.eup %8392  ;;  %v6581_v5 = vmul.f32 1.442695, %v6536_v18  ;;  %v6538_v51 = vsub.f32 %v11649_v6, %v6426_v45 }
 0x5e3   : > { %v11734_v33 = vcombine.low %v11606_v35, %v6163_v63  ;;  %v11737_v42 = vcombine.high %v11606_v35, %v6163_v63  ;;  %v11740_v2 = vcombine.low %v11668_v10, %v6170_v3  ;;  %v11742_v39 = vpop.eup %8394  ;;  %v11745_v4 = vcombine.high %v11668_v10, %v6170_v3 }
 0x5e4   : > { %v11748_v50 = vcombine.low %v11674_v47, %v6179_v13  ;;  %v11751_v36 = vcombine.high %v11674_v47, %v6179_v13  ;;  %v11753_v30 = vcombine.low %v6154_v28, %v6186_v0  ;;  %v11755_v58 = vcombine.high %v6154_v28, %v6186_v0 }
 0x5e5   : > { %v6427_v35 = vrot.slane %v11734_v33, 4  ;;  %v6433_v41 = vrot.slane %v11737_v42, 4  ;;  %v6439_v16 = vrot.slane %v11740_v2, 4  ;;  %v6445_v10 = vrot.slane %v11745_v4, 4 }
 0x5e6   : > { %v6451_v26 = vrot.slane %v11748_v50, 4  ;;  %v6457_v25 = vrot.slane %v11751_v36, 4  ;;  %v6463_v28 = vrot.slane %v11753_v30, 4  ;;  %v6469_v8 = vrot.slane %v11755_v58, 4 }
 0x5e7   : > { %v6428_v12 = vmax.f32 %v11734_v33, %v6427_v35  ;;  %v6434_v47 = vmax.f32 %v11737_v42, %v6433_v41  ;;  %v11767_v27 = vpop.eup %8396  ;;  %v6440_v32 = vmax.f32 %v11740_v2, %v6439_v16  ;;  %v6446_v6 = vmax.f32 %v11745_v4, %v6445_v10 }
 0x5e8   : > { %v6452_v9 = vmax.f32 %v11748_v50, %v6451_v26  ;;  %v6458_v7 = vmax.f32 %v11751_v36, %v6457_v25  ;;  %v6464_v21 = vmax.f32 %v11753_v30, %v6463_v28  ;;  %v11775_v62 = vpop.eup %8398  ;;  %v6470_v29 = vmax.f32 %v11755_v58, %v6469_v8  ;;  %v13028_v28 = vld [vmem:[#allocation55_spill] sm:$0xff] }
 0x5e9   : > { %v6429_v17 = vrot.slane %v6428_v12, 2  ;;  %v6435_v19 = vrot.slane %v6434_v47, 2  ;;  %13027 = vst [vmem:[#allocation66_spill] sm:$0xff] %v11775_v62  ;;  %v6441_v18 = vrot.slane %v6440_v32, 2  ;;  %v6447_v43 = vrot.slane %v6446_v6, 2 }
 0x5ea   : > { %v6453_v53 = vrot.slane %v6452_v9, 2  ;;  %v6459_v63 = vrot.slane %v6458_v7, 2  ;;  %v6465_v3 = vrot.slane %v6464_v21, 2  ;;  %8400 = vpow2.f32 %v6575_v54 }
 0x5eb   : > { %v6430_v44 = vmax.f32 %v6428_v12, %v6429_v17  ;;  %v6436_v24 = vmax.f32 %v6434_v47, %v6435_v19  ;;  %v6442_v45 = vmax.f32 %v6440_v32, %v6441_v18  ;;  %v6448_v13 = vmax.f32 %v6446_v6, %v6447_v43  ;;  %v13029_v47 = vld [vmem:[#allocation54_spill] sm:$0xff] }
 0x5ec   : > { %v6471_v0 = vrot.slane %v6470_v29, 2  ;;  %v6583_v35 = vmul.f32 1.442695, %v6537_v20  ;;  %v6454_v41 = vmax.f32 %v6452_v9, %v6453_v53  ;;  %v6460_v16 = vmax.f32 %v6458_v7, %v6459_v63  ;;  %v13030_v20 = vld [vmem:[#allocation63_spill] sm:$0xff] }
 0x5ed   : > { %v6466_v10 = vmax.f32 %v6464_v21, %v6465_v3  ;;  %8402 = vpow2.f32 %v6577_v14  ;;  %v6431_v26 = vrot.slane %v6430_v44, 1  ;;  %v6437_v25 = vrot.slane %v6436_v24, 1 }
 0x5ee   : > { %v5696_v48 = vadd.f32 %v13028_v28, %v11454_v31  ;;  %8404 = vpow2.f32 %v6579_v15  ;;  %v6585_v8 = vmul.f32 1.442695, %v6538_v51  ;;  %v6472_v12 = vmax.f32 %v6470_v29, %v6471_v0  ;;  %v13031_v15 = vld [vmem:[#allocation64_spill] sm:$0xff] }
 0x5ef   : > { %v5694_v17 = vadd.f32 %v13029_v47, %v11454_v31  ;;  %v6673_v54 = vrot.slane %v11775_v62, 4  ;;  %v6443_v32 = vrot.slane %v6442_v45, 1  ;;  %v6449_v6 = vrot.slane %v6448_v13, 1 }
 0x5f0   : > { %v5783_v9 = vadd.f32 %v13030_v20, %v11454_v31  ;;  %8406 = vpow2.f32 %v6581_v5  ;;  %v6455_v14 = vrot.slane %v6454_v41, 1  ;;  %v6461_v19 = vrot.slane %v6460_v16, 1 }
 0x5f1   : > { %v6467_v7 = vrot.slane %v6466_v10, 1  ;;  %8408 = vpow2.f32 %v6583_v35  ;;  %v6432_v21 = vmax.f32 %v6430_v44, %v6431_v26  ;;  %v6438_v18 = vmax.f32 %v6436_v24, %v6437_v25 }
 0x5f2   : > { %v5785_v51 = vadd.f32 %v13031_v15, %v11454_v31  ;;  %8410 = vpow2.f32 %v6585_v8  ;;  %v6473_v43 = vrot.slane %v6472_v12, 1  ;;  %v6203_v53 = vrot.slane %v6195_v56, %v9695_v61 }
 0x5f3   : > { %v6210_v5 = vrot.slane %v6196_v57, %v9695_v61  ;;  %v11797_v44 = vadd.f32 %v11775_v62, %v6673_v54  ;;  %v6444_v24 = vmax.f32 %v6442_v45, %v6443_v32  ;;  %v6450_v63 = vmax.f32 %v6448_v13, %v6449_v6 }
 0x5f4   : > { %v11799_v31 = vmax.f32 %v6454_v41, %v6455_v14  ;;  %v11801_v3 = vmax.f32 %v6460_v16, %v6461_v19  ;;  %v11803_v0 = vmax.f32 %v6466_v10, %v6467_v7  ;;  %v6212_v56 = vcombine.high %v11510_v22, %v11594_v1  ;;  %v11807_v35 = vpop.eup %8400 }
 0x5f5   : > { %v6539_v34 = vsub.f32 %v11734_v33, %v6432_v21  ;;  %v6540_v52 = vsub.f32 %v11737_v42, %v6438_v18  ;;  %v6219_v57 = vrot.slane %v6211_v46, %v9695_v61  ;;  %v6227_v45 = vcombine.low %v5694_v17, %v5783_v9 }
 0x5f6   : > { %v11815_v13 = vmax.f32 %v6472_v12, %v6473_v43  ;;  %v6226_v41 = vrot.slane %v6212_v56, %v9695_v61  ;;  %v6228_v16 = vcombine.high %v5694_v17, %v5783_v9  ;;  %v6243_v10 = vcombine.low %v5696_v48, %v5785_v51 }
 0x5f7   : > { %v11818_v26 = vpop.eup %8402  ;;  %v6541_v25 = vsub.f32 %v11740_v2, %v6444_v24  ;;  %v6235_v33 = vrot.slane %v6227_v45, %v9695_v61  ;;  %v6244_v28 = vcombine.high %v5696_v48, %v5785_v51  ;;  %v6259_v42 = vcombine.low %v6203_v53, %v6219_v57 }
 0x5f8   : > { %v11822_v8 = vpop.eup %8404  ;;  %v6542_v22 = vsub.f32 %v11745_v4, %v6450_v63  ;;  %v6242_v1 = vrot.slane %v6228_v16, %v9695_v61  ;;  %v6251_v46 = vrot.slane %v6243_v10, %v9695_v61  ;;  %v6260_v12 = vcombine.high %v6203_v53, %v6219_v57 }
 0x5f9   : > { %v6543_v47 = vsub.f32 %v11748_v50, %v11799_v31  ;;  %v6258_v2 = vrot.slane %v6244_v28, %v9695_v61  ;;  %v6275_v54 = vcombine.low %v6210_v5, %v6226_v41  ;;  %v6587_v4 = vmul.f32 1.442695, %v6539_v34 }
 0x5fa   : > { %v11832_v48 = vpop.eup %8406  ;;  %v6276_v6 = vcombine.high %v6210_v5, %v6226_v41  ;;  %v6291_v20 = vcombine.low %v6235_v33, %v6251_v46  ;;  %v6589_v19 = vmul.f32 1.442695, %v6540_v52  ;;  %v6292_v7 = vcombine.high %v6235_v33, %v6251_v46 }
 0x5fb   : > { %v11836_v9 = vpop.eup %8408  ;;  %v6307_v21 = vcombine.low %v6242_v1, %v6258_v2  ;;  %v6591_v61 = vmul.f32 1.442695, %v6541_v25  ;;  %v6267_v15 = vrot.slane %v6259_v42, %v9720_v38  ;;  %v6308_v43 = vcombine.high %v6242_v1, %v6258_v2 }
 0x5fc   : > { %v11840_v18 = vpop.eup %8410  ;;  %v6299_v51 = vrot.slane %v6291_v20, %v9720_v38  ;;  %v6274_v53 = vrot.slane %v6260_v12, %v9720_v38  ;;  %v6283_v5 = vrot.slane %v6275_v54, %v9720_v38  ;;  %v6306_v24 = vrot.slane %v6292_v7, %v9720_v38 }
 0x5fd   : > { %v6315_v63 = vrot.slane %v6307_v21, %v9720_v38  ;;  %v6290_v56 = vrot.slane %v6276_v6, %v9720_v38  ;;  %v6322_v34 = vrot.slane %v6308_v43, %v9720_v38  ;;  %v6593_v45 = vmul.f32 1.442695, %v6542_v22 }
 0x5fe   : > { %v11850_v52 = vcombine.low %v6267_v15, %v6299_v51  ;;  %v11852_v57 = vcombine.high %v6267_v15, %v6299_v51  ;;  %v11854_v41 = vcombine.low %v6274_v53, %v6306_v24  ;;  %v11856_v16 = vcombine.high %v6274_v53, %v6306_v24 }
 0x5ff   : > { %v11858_v10 = vcombine.low %v6283_v5, %v6315_v63  ;;  %8412 = vpow2.f32 %v6589_v19  ;;  %v11860_v25 = vcombine.high %v6283_v5, %v6315_v63  ;;  %v11862_v33 = vcombine.low %v6290_v56, %v6322_v34 }
 0x600   : > { %v11864_v28 = vcombine.high %v6290_v56, %v6322_v34  ;;  %v6475_v38 = vrot.slane %v11850_v52, 4  ;;  %v6481_v42 = vrot.slane %v11852_v57, 4  ;;  %v6487_v1 = vrot.slane %v11854_v41, 4 }
 0x601   : > { %v6493_v22 = vrot.slane %v11856_v16, 4  ;;  %8414 = vpow2.f32 %v6587_v4  ;;  %v6499_v46 = vrot.slane %v11858_v10, 4  ;;  %v6505_v12 = vrot.slane %v11860_v25, 4 }
 0x602   : > { %v6511_v2 = vrot.slane %v11862_v33, 4  ;;  %v6476_v54 = vmax.f32 %v11850_v52, %v6475_v38  ;;  %v6482_v6 = vmax.f32 %v11852_v57, %v6481_v42  ;;  %v6488_v20 = vmax.f32 %v11854_v41, %v6487_v1 }
 0x603   : > { %v6494_v19 = vmax.f32 %v11856_v16, %v6493_v22  ;;  %v6500_v7 = vmax.f32 %v11858_v10, %v6499_v46  ;;  %v6506_v21 = vmax.f32 %v11860_v25, %v6505_v12  ;;  %v6517_v15 = vrot.slane %v11864_v28, 4 }
 0x604   : > { %v6512_v4 = vmax.f32 %v11862_v33, %v6511_v2  ;;  %v6477_v51 = vrot.slane %v6476_v54, 2  ;;  %v6483_v43 = vrot.slane %v6482_v6, 2  ;;  %v6489_v53 = vrot.slane %v6488_v20, 2 }
 0x605   : > { %v6495_v5 = vrot.slane %v6494_v19, 2  ;;  %v6501_v24 = vrot.slane %v6500_v7, 2  ;;  %v6507_v63 = vrot.slane %v6506_v21, 2  ;;  %v6518_v34 = vmax.f32 %v11864_v28, %v6517_v15 }
 0x606   : > { %v6513_v56 = vrot.slane %v6512_v4, 2  ;;  %v6478_v38 = vmax.f32 %v6476_v54, %v6477_v51  ;;  %v6484_v42 = vmax.f32 %v6482_v6, %v6483_v43  ;;  %v6490_v1 = vmax.f32 %v6488_v20, %v6489_v53 }
 0x607   : > { %v6496_v22 = vmax.f32 %v6494_v19, %v6495_v5  ;;  %v6595_v46 = vmul.f32 1.442695, %v6543_v47  ;;  %v6502_v12 = vmax.f32 %v6500_v7, %v6501_v24  ;;  %v6508_v2 = vmax.f32 %v6506_v21, %v6507_v63  ;;  %v13055_v63 = vld [vmem:[#allocation30_spill] sm:$0xff] }
 0x608   : > { %v6519_v29 = vrot.slane %v6518_v34, 2  ;;  %v6479_v14 = vrot.slane %v6478_v38, 1  ;;  %v6485_v32 = vrot.slane %v6484_v42, 1  ;;  %v6491_v17 = vrot.slane %v6490_v1, 1 }
 0x609   : > { %v6514_v62 = vmax.f32 %v6512_v4, %v6513_v56  ;;  %v11885_v40 = vpop.eup %8412  ;;  %v13033_v15 = vsub.f32 %v11751_v36, %v11801_v3  ;;  %v13034_v6 = vsub.f32 %v11753_v30, %v11803_v0  ;;  %v6497_v19 = vrot.slane %v6496_v22, 1 }
 0x60a   : > { %13032 = vst [vmem:[#allocation67_spill] sm:$0xff] %v11885_v40  ;;  %v6520_v50 = vmax.f32 %v6518_v34, %v6519_v29  ;;  %8416 = vpow2.f32 %v6591_v61  ;;  %v6480_v31 = vmax.f32 %v6478_v38, %v6479_v14  ;;  %v6503_v47 = vrot.slane %v6502_v12, 1 }
 0x60b   : > { %v6597_v54 = vmul.f32 1.442695, %v13033_v15  ;;  %v6599_v20 = vmul.f32 1.442695, %v13034_v6  ;;  %v6509_v7 = vrot.slane %v6508_v2, 1  ;;  %v11893_v21 = vpop.eup %8414  ;;  %8418 = vpow2.f32 %v6593_v45 }
 0x60c   : > { %v13035_v4 = vsub.f32 %v11755_v58, %v11815_v13  ;;  %v6486_v43 = vmax.f32 %v6484_v42, %v6485_v32  ;;  %v13036_v36 = vrot.slane %v11680_v55, 4  ;;  %8420 = vpow2.f32 %v6595_v46 }
 0x60d   : > { %v6721_v30 = vrot.slane %v11885_v40, 4  ;;  %v6492_v29 = vmax.f32 %v6490_v1, %v6491_v17  ;;  %v6515_v0 = vrot.slane %v6514_v62, 1  ;;  %8422 = vpow2.f32 %v6597_v54 }
 0x60e   : > { %v6601_v51 = vmul.f32 1.442695, %v13035_v4  ;;  %v6620_v3 = vadd.f32 %v11680_v55, %v13036_v36  ;;  %v6498_v14 = vmax.f32 %v6496_v22, %v6497_v19  ;;  %v6521_v61 = vrot.slane %v6520_v50, 1 }
 0x60f   : > { %v6631_v53 = vrot.slane %v11711_v60, 4  ;;  %8424 = vpow2.f32 %v6599_v20  ;;  %v6504_v45 = vmax.f32 %v6502_v12, %v6503_v47  ;;  %v6510_v5 = vmax.f32 %v6508_v2, %v6509_v7 }
 0x610   : > { %v6547_v58 = vsub.f32 %v11850_v52, %v6480_v31  ;;  %8426 = vpow2.f32 %v6601_v51  ;;  %v6548_v13 = vsub.f32 %v11852_v57, %v6486_v43  ;;  %v6621_v32 = vrot.slane %v6620_v3, 2 }
 0x611   : > { %v6627_v24 = vrot.slane %v11701_v23, 2  ;;  %v11908_v17 = vadd.f32 %v11885_v40, %v6721_v30  ;;  %v6516_v56 = vmax.f32 %v6514_v62, %v6515_v0  ;;  %v6549_v34 = vsub.f32 %v11854_v41, %v6492_v29 }
 0x612   : > { %v6522_v38 = vmax.f32 %v6520_v50, %v6521_v61  ;;  %v6550_v42 = vsub.f32 %v11856_v16, %v6498_v14  ;;  %v6632_v1 = vadd.f32 %v11711_v60, %v6631_v53  ;;  %v6637_v52 = vrot.slane %v11717_v49, 4 }
 0x613   : > { %v6551_v57 = vsub.f32 %v11858_v10, %v6504_v45  ;;  %v6552_v22 = vsub.f32 %v11860_v25, %v6510_v5  ;;  %v6603_v46 = vmul.f32 1.442695, %v6547_v58  ;;  %v6643_v12 = vrot.slane %v11721_v59, 4 }
 0x614   : > { %v6605_v2 = vmul.f32 1.442695, %v6548_v13  ;;  %v6633_v15 = vrot.slane %v6632_v1, 2  ;;  %v6638_v62 = vadd.f32 %v11717_v49, %v6637_v52  ;;  %v6649_v41 = vrot.slane %v11727_v37, 4  ;;  %v11919_v54 = vpop.eup %8416 }
 0x615   : > { %v6622_v16 = vadd.f32 %v6621_v32, %v6620_v3  ;;  %v6628_v6 = vadd.f32 %v6627_v24, %v11701_v23  ;;  %v6644_v20 = vadd.f32 %v11721_v59, %v6643_v12  ;;  %v6655_v10 = vrot.slane %v11731_v11, 4  ;;  %v11924_v19 = vpop.eup %8418 }
 0x616   : > { %13037 = vst [vmem:[#allocation68_spill] sm:$0xff] %v11924_v19  ;;  %v6553_v25 = vsub.f32 %v11862_v33, %v6516_v56  ;;  %v6607_v50 = vmul.f32 1.442695, %v6549_v34  ;;  %v6634_v31 = vadd.f32 %v6633_v15, %v6632_v1  ;;  %v6639_v47 = vrot.slane %v6638_v62, 2  ;;  %v11927_v7 = vpop.eup %8420 }
 0x617   : > { %13038 = vst [vmem:[#allocation69_spill] sm:$0xff] %v11927_v7  ;;  %v6609_v4 = vmul.f32 1.442695, %v6550_v42  ;;  %v6645_v51 = vrot.slane %v6644_v20, 2  ;;  %v6650_v43 = vadd.f32 %v11727_v37, %v6649_v41  ;;  %v6656_v36 = vadd.f32 %v11731_v11, %v6655_v10  ;;  %v11931_v23 = vpop.eup %8422 }
 0x618   : > { %13039 = vst [vmem:[#allocation22_spill] sm:$0xff] %v11931_v23  ;;  %v6554_v3 = vsub.f32 %v11864_v28, %v6522_v38  ;;  %8428 = vpow2.f32 %v6603_v46  ;;  %v6611_v30 = vmul.f32 1.442695, %v6551_v57  ;;  %v6661_v29 = vrot.slane %v11742_v39, 4 }
 0x619   : > { %v11935_v33 = vpop.eup %8424  ;;  %8430 = vpow2.f32 %v6605_v2  ;;  %v6613_v0 = vmul.f32 1.442695, %v6552_v22  ;;  %v6623_v14 = vrot.slane %v6622_v16, 1  ;;  %v6629_v61 = vrot.slane %v6628_v6, 1 }
 0x61a   : > { %13040 = vst [vmem:[#allocation45_spill] sm:$0xff] %v11935_v33  ;;  %v11937_v53 = vpop.eup %8426  ;;  %8432 = vpow2.f32 %v6607_v50  ;;  %v6615_v45 = vmul.f32 1.442695, %v6553_v25  ;;  %v6635_v5 = vrot.slane %v6634_v31, 1  ;;  %v6640_v58 = vadd.f32 %v6639_v47, %v6638_v62 }
 0x61b   : > { %13041 = vst [vmem:[#allocation37_spill] sm:$0xff] %v11937_v53  ;;  %8434 = vpow2.f32 %v6609_v4  ;;  %v6646_v13 = vadd.f32 %v6645_v51, %v6644_v20  ;;  %v6651_v32 = vrot.slane %v6650_v43, 2  ;;  %v6657_v28 = vrot.slane %v6656_v36, 2 }
 0x61c   : > { %8436 = vpow2.f32 %v6611_v30  ;;  %v11939_v24 = vmul.f32 1.442695, %v6554_v3  ;;  %v6662_v56 = vadd.f32 %v11742_v39, %v6661_v29  ;;  %v13043_v34 = vrot.slane %v11767_v27, 4 }
 0x61d   : > { %8438 = vpow2.f32 %v6613_v0  ;;  %v11945_v42 = vadd.f32 %v6623_v14, %v6622_v16  ;;  %v11947_v1 = vadd.f32 %v6629_v61, %v6628_v6  ;;  %v6675_v52 = vrot.slane %v11797_v44, 2  ;;  %v13046_v0 = vld [vmem:[#allocation56_spill] sm:$0xff] }
 0x61e   : > { %13042 = vst [vmem:[#allocation46_spill] sm:$0xff] %v11939_v24  ;;  %v6668_v38 = vadd.f32 %v11767_v27, %v13043_v34  ;;  %8440 = vpow2.f32 %v6615_v45  ;;  %v11950_v57 = vadd.f32 %v6635_v5, %v6634_v31  ;;  %v6641_v22 = vrot.slane %v6640_v58, 1 }
 0x61f   : > { %v6679_v46 = vrot.slane %v11807_v35, 4  ;;  %v6647_v12 = vrot.slane %v6646_v13, 1  ;;  %v6652_v2 = vadd.f32 %v6651_v32, %v6650_v43  ;;  %v6658_v15 = vadd.f32 %v6657_v28, %v6656_v36  ;;  %v13048_v32 = vld [vmem:[#allocation20_spill] sm:$0xff]  ;;  %v13049_v28 = vld [vmem:[#allocation65_spill] sm:$0xff] }
 0x620   : > { %v6685_v62 = vrot.slane %v11818_v26, 4  ;;  %v6663_v41 = vrot.slane %v6662_v56, 2  ;;  %v6669_v20 = vrot.slane %v6668_v38, 2  ;;  %v6691_v6 = vrot.slane %v11822_v8, 4 }
 0x621   : > { %v6680_v16 = vadd.f32 %v11807_v35, %v6679_v46  ;;  %v6676_v10 = vadd.f32 %v6675_v52, %v11797_v44  ;;  %v6697_v50 = vrot.slane %v11832_v48, 4  ;;  %v6703_v31 = vrot.slane %v11836_v9, 4 }
 0x622   : > { %v6686_v25 = vadd.f32 %v11818_v26, %v6685_v62  ;;  %v11960_v47 = vpop.eup %8428  ;;  %v11962_v4 = vadd.f32 %v6641_v22, %v6640_v58  ;;  %v6692_v43 = vadd.f32 %v11822_v8, %v6691_v6  ;;  %v6709_v36 = vrot.slane %v11840_v18, 4  ;;  %v13051_v6 = vld [vmem:[#allocation23_spill] sm:$0xff] }
 0x623   : > { %13044 = vst [vmem:[#allocation38_spill] sm:$0xff] %v11960_v47  ;;  %v6681_v51 = vrot.slane %v6680_v16, 2  ;;  %v11966_v3 = vpop.eup %8430  ;;  %v6653_v30 = vrot.slane %v6652_v2, 1  ;;  %v6698_v44 = vadd.f32 %v11832_v48, %v6697_v50  ;;  %v6704_v29 = vadd.f32 %v11836_v9, %v6703_v31 }
 0x624   : > { %13045 = vst [vmem:[#allocation47_spill] sm:$0xff] %v11966_v3  ;;  %v6843_v14 = vmul.f32 %v11680_v55, %v13046_v0  ;;  %v11972_v61 = vpop.eup %8432  ;;  %v6659_v45 = vrot.slane %v6658_v15, 1  ;;  %v11974_v5 = vadd.f32 %v6663_v41, %v6662_v56  ;;  %v6710_v58 = vadd.f32 %v11840_v18, %v6709_v36  ;;  %v13053_v36 = vld [vmem:[#allocation29_spill] sm:$0xff] }
 0x625   : > { %13047 = vst [vmem:[#allocation39_spill] sm:$0xff] %v11972_v61  ;;  %v6844_v34 = vmul.f32 %v13049_v28, %v13048_v32  ;;  %v11979_v52 = vpop.eup %8434  ;;  %v11981_v22 = vadd.f32 %v6669_v20, %v6668_v38  ;;  %v6677_v46 = vrot.slane %v6676_v10, 1  ;;  %v6687_v62 = vrot.slane %v6686_v25, 2  ;;  %v13062_v61 = vld [vmem:[#allocation66_spill] sm:$0xff] }
 0x626   : > { %13050 = vst [vmem:[#allocation48_spill] sm:$0xff] %v11979_v52  ;;  %v6845_v50 = vmul.f32 %v11711_v60, %v13051_v6  ;;  %v11985_v55 = vpop.eup %8436  ;;  %v11987_v31 = vadd.f32 %v6647_v12, %v6646_v13  ;;  %v11989_v56 = vadd.f32 %v6681_v51, %v6680_v16  ;;  %v6693_v41 = vrot.slane %v6692_v43, 2  ;;  %v13057_v16 = vld [vmem:[#allocation21_spill] sm:$0xff] }
 0x627   : > { %13052 = vst [vmem:[#allocation40_spill] sm:$0xff] %v11985_v55  ;;  %v6846_v0 = vmul.f32 %v11717_v49, %v13053_v36  ;;  %v11993_v32 = vpop.eup %8438  ;;  %v11995_v28 = vadd.f32 %v6653_v30, %v6652_v2  ;;  %v6699_v38 = vrot.slane %v6698_v44, 2  ;;  %v6705_v20 = vrot.slane %v6704_v29, 2  ;;  %v13058_v30 = vld [vmem:[#allocation24_spill] sm:$0xff] }
 0x628   : > { %13054 = vst [vmem:[#allocation33_spill] sm:$0xff] %v11993_v32  ;;  %v6847_v40 = vmul.f32 %v11721_v59, %v13055_v63  ;;  %v11999_v60 = vpop.eup %8440  ;;  %v12001_v6 = vadd.f32 %v6659_v45, %v6658_v15  ;;  %v6665_v13 = vrot.slane %v11974_v5, 1  ;;  %v6711_v12 = vrot.slane %v6710_v58, 2  ;;  %v13060_v45 = vld [vmem:[#allocation32_spill] sm:$0xff] }
 0x629   : > { %13056 = vst [vmem:[#allocation34_spill] sm:$0xff] %v11999_v60  ;;  %v6848_v51 = vmul.f32 %v11727_v37, %v13057_v16  ;;  %v6671_v49 = vrot.slane %v11981_v22, 1  ;;  %v12007_v36 = vadd.f32 %v6677_v46, %v6676_v10  ;;  %v6688_v2 = vadd.f32 %v6687_v62, %v6686_v25  ;;  %v13059_v60 = vld [vmem:[#allocation31_spill] sm:$0xff]  ;;  %v13061_v16 = vld [vmem:[#allocation57_spill] sm:$0xff]  ;;  %v13063_v25 = vld [vmem:[#allocation58_spill] sm:$0xff] }
 0x62a   : > { %v6849_v32 = vmul.f32 %v11731_v11, %v13058_v30  ;;  %v6683_v59 = vrot.slane %v11989_v56, 1  ;;  %v6694_v63 = vadd.f32 %v6693_v41, %v6692_v43  ;;  %v6850_v15 = vmul.f32 %v11742_v39, %v13059_v60  ;;  %v13064_v62 = vld [vmem:[#allocation59_spill] sm:$0xff]  ;;  %v13065_v39 = vld [vmem:[#allocation60_spill] sm:$0xff] }
 0x62b   : > { %v12016_v55 = vmul.f32 %v11767_v27, %v13060_v45  ;;  %v6700_v52 = vadd.f32 %v6699_v38, %v6698_v44  ;;  %v6706_v37 = vadd.f32 %v6705_v20, %v6704_v29  ;;  %v12020_v10 = vmul.f32 %v13062_v61, %v13061_v16  ;;  %v13066_v27 = vld [vmem:[#allocation15_spill] sm:$0xff]  ;;  %v13067_v29 = vld [vmem:[#allocation17_spill] sm:$0xff] }
 0x62c   : > { %v12024_v46 = vmul.f32 %v11807_v35, %v13063_v25  ;;  %v6712_v11 = vadd.f32 %v6711_v12, %v6710_v58  ;;  %v12028_v43 = vmul.f32 %v11818_v26, %v13064_v62  ;;  %v12032_v41 = vmul.f32 %v11822_v8, %v13065_v39  ;;  %v13068_v38 = vld [vmem:[#allocation25_spill] sm:$0xff] }
 0x62d   : > { %v12036_v44 = vmul.f32 %v11832_v48, %v13066_v27  ;;  %v12040_v61 = vmul.f32 %v11836_v9, %v13067_v29  ;;  %v12044_v35 = vmul.f32 %v11840_v18, %v13068_v38  ;;  %v6875_v58 = vrot.slane %v6843_v14, 4 }
 0x62e   : > { %v6881_v20 = vrot.slane %v6844_v34, 4  ;;  %v6887_v26 = vrot.slane %v6845_v50, 4  ;;  %v6893_v60 = vrot.slane %v6846_v0, 4  ;;  %v6899_v12 = vrot.slane %v6847_v40, 4 }
 0x62f   : > { %v6905_v30 = vrot.slane %v6848_v51, 4  ;;  %v6876_v8 = vadd.f32 %v6875_v58, %v6843_v14  ;;  %v6911_v16 = vrot.slane %v6849_v32, 4  ;;  %v6917_v25 = vrot.slane %v6850_v15, 4 }
 0x630   : > { %v6882_v45 = vadd.f32 %v6881_v20, %v6844_v34  ;;  %v6888_v48 = vadd.f32 %v6887_v26, %v6845_v50  ;;  %v6894_v62 = vadd.f32 %v6893_v60, %v6846_v0  ;;  %v6900_v39 = vadd.f32 %v6899_v12, %v6847_v40  ;;  %v7227_v50 = vld [vmem:[#allocation2 + $0xc0] sm:$0xff] }
 0x631   : > { %v6906_v27 = vadd.f32 %v6905_v30, %v6848_v51  ;;  %v6877_v9 = vrot.slane %v6876_v8, 2  ;;  %v6912_v53 = vadd.f32 %v6911_v16, %v6849_v32  ;;  %v6918_v47 = vadd.f32 %v6917_v25, %v6850_v15  ;;  %8173 = vmatprep.mubr.msk.f32.mxu0 %vm5060_vm1, %v7227_v50 }
 0x632   : > { %v6883_v29 = vrot.slane %v6882_v45, 2  ;;  %v6689_v18 = vrot.slane %v6688_v2, 1  ;;  %v6695_v38 = vrot.slane %v6694_v63, 1  ;;  %v6701_v33 = vrot.slane %v6700_v52, 1 }
 0x633   : > { %v6889_v3 = vrot.slane %v6888_v48, 2  ;;  %v6707_v24 = vrot.slane %v6706_v37, 1  ;;  %v6713_v23 = vrot.slane %v6712_v11, 1  ;;  %v6895_v7 = vrot.slane %v6894_v62, 2 }
 0x634   : > { %v6901_v19 = vrot.slane %v6900_v39, 2  ;;  %v6878_v14 = vadd.f32 %v6877_v9, %v6876_v8  ;;  %v6884_v34 = vadd.f32 %v6883_v29, %v6882_v45  ;;  %v6907_v58 = vrot.slane %v6906_v27, 2 }
 0x635   : > { %v6913_v20 = vrot.slane %v6912_v53, 2  ;;  %v12047_v40 = vadd.f32 %v6665_v13, %v11974_v5  ;;  %v12050_v0 = vadd.f32 %v6671_v49, %v11981_v22  ;;  %v6890_v32 = vadd.f32 %v6889_v3, %v6888_v48 }
 0x636   : > { %v6919_v51 = vrot.slane %v6918_v47, 2  ;;  %v12054_v15 = vadd.f32 %v6683_v59, %v11989_v56  ;;  %v12056_v26 = vadd.f32 %v6689_v18, %v6688_v2  ;;  %v12058_v60 = vadd.f32 %v6695_v38, %v6694_v63 }
 0x637   : > { %v12060_v12 = vadd.f32 %v6701_v33, %v6700_v52  ;;  %v12062_v30 = vadd.f32 %v6707_v24, %v6706_v37  ;;  %v12064_v5 = vadd.f32 %v6713_v23, %v6712_v11  ;;  %v6896_v13 = vadd.f32 %v6895_v7, %v6894_v62 }
 0x638   : > { %v6902_v22 = vadd.f32 %v6901_v19, %v6900_v39  ;;  %v6879_v49 = vrot.slane %v6878_v14, 1  ;;  %v6885_v3 = vrot.slane %v6884_v34, 1  ;;  %v6908_v8 = vadd.f32 %v6907_v58, %v6906_v27 }
 0x639   : > { %v6914_v45 = vadd.f32 %v6913_v20, %v6912_v53  ;;  %v6891_v16 = vrot.slane %v6890_v32, 1  ;;  %v6920_v25 = vadd.f32 %v6919_v51, %v6918_v47  ;;  %v6923_v56 = vrot.slane %v12016_v55, 4 }
 0x63a   : > { %v6929_v2 = vrot.slane %v12020_v10, 4  ;;  %v6935_v59 = vrot.slane %v12024_v46, 4  ;;  %v6941_v33 = vrot.slane %v12028_v43, 4  ;;  %v6947_v24 = vrot.slane %v12032_v41, 4 }
 0x63b   : > { %v6953_v23 = vrot.slane %v12036_v44, 4  ;;  %v6924_v19 = vadd.f32 %v6923_v56, %v12016_v55  ;;  %v6959_v53 = vrot.slane %v12040_v61, 4  ;;  %v6965_v47 = vrot.slane %v12044_v35, 4 }
 0x63c   : > { %v6930_v7 = vadd.f32 %v6929_v2, %v12020_v10  ;;  %v6936_v52 = vadd.f32 %v6935_v59, %v12024_v46  ;;  %v6942_v63 = vadd.f32 %v6941_v33, %v12028_v43  ;;  %v6948_v37 = vadd.f32 %v6947_v24, %v12032_v41 }
 0x63d   : > { %v6954_v11 = vadd.f32 %v6953_v23, %v12036_v44  ;;  %v6925_v48 = vrot.slane %v6924_v19, 2  ;;  %v6960_v39 = vadd.f32 %v6959_v53, %v12040_v61  ;;  %v6966_v55 = vadd.f32 %v6965_v47, %v12044_v35 }
 0x63e   : > { %v6931_v62 = vrot.slane %v6930_v7, 2  ;;  %v6937_v27 = vrot.slane %v6936_v52, 2  ;;  %v6943_v10 = vrot.slane %v6942_v63, 2  ;;  %v6949_v9 = vrot.slane %v6948_v37, 2 }
 0x63f   : > { %v6955_v29 = vrot.slane %v6954_v11, 2  ;;  %v6926_v18 = vadd.f32 %v6925_v48, %v6924_v19  ;;  %v6961_v58 = vrot.slane %v6960_v39, 2  ;;  %v6967_v46 = vrot.slane %v6966_v55, 2 }
 0x640   : > { %v6932_v38 = vadd.f32 %v6931_v62, %v6930_v7  ;;  %v6897_v20 = vrot.slane %v6896_v13, 1  ;;  %v6938_v43 = vadd.f32 %v6937_v27, %v6936_v52  ;;  %v6944_v50 = vadd.f32 %v6943_v10, %v6942_v63 }
 0x641   : > { %v6950_v41 = vadd.f32 %v6949_v9, %v6948_v37  ;;  %v6903_v51 = vrot.slane %v6902_v22, 1  ;;  %v6956_v44 = vadd.f32 %v6955_v29, %v6954_v11  ;;  %v6962_v56 = vadd.f32 %v6961_v58, %v6960_v39 }
 0x642   : > { %v6968_v2 = vadd.f32 %v6967_v46, %v6966_v55  ;;  %v6880_v59 = vadd.f32 %v6879_v49, %v6878_v14  ;;  %v12082_v61 = vadd.f32 %v6885_v3, %v6884_v34  ;;  %v6909_v35 = vrot.slane %v6908_v8, 1 }
 0x643   : > { %v6915_v33 = vrot.slane %v6914_v45, 1  ;;  %v12084_v24 = vadd.f32 %v6891_v16, %v6890_v32  ;;  %v6921_v23 = vrot.slane %v6920_v25, 1  ;;  %v6927_v19 = vrot.slane %v6926_v18, 1 }
 0x644   : > { %v6933_v7 = vrot.slane %v6932_v38, 1  ;;  %v12086_v53 = vadd.f32 %v6897_v20, %v6896_v13  ;;  %v6939_v47 = vrot.slane %v6938_v43, 1  ;;  %v6945_v52 = vrot.slane %v6944_v50, 1 }
 0x645   : > { %v6951_v63 = vrot.slane %v6950_v41, 1  ;;  %v6957_v37 = vrot.slane %v6956_v44, 1  ;;  %v6963_v48 = vrot.slane %v6962_v56, 1  ;;  %v6969_v11 = vrot.slane %v6968_v2, 1 }
 0x646   : > { %8442 = vrcp.f32 %v11945_v42  ;;  %v12089_v14 = vadd.f32 %v6903_v51, %v6902_v22  ;;  %v12091_v34 = vadd.f32 %v6909_v35, %v6908_v8  ;;  %v12093_v32 = vadd.f32 %v6915_v33, %v6914_v45 }
 0x647   : > { %8444 = vrcp.f32 %v11947_v1  ;;  %v12096_v49 = vadd.f32 %v6921_v23, %v6920_v25  ;;  %v12098_v13 = vadd.f32 %v6927_v19, %v6926_v18  ;;  %v12100_v3 = vadd.f32 %v6933_v7, %v6932_v38 }
 0x648   : > { %8446 = vrcp.f32 %v11950_v57  ;;  %v12103_v16 = vadd.f32 %v6939_v47, %v6938_v43  ;;  %v12105_v42 = vadd.f32 %v6945_v52, %v6944_v50  ;;  %v12107_v22 = vadd.f32 %v6951_v63, %v6950_v41  ;;  %v12119_v57 = vld [vmem:[%s8751_s8] sm:$0xff] }
 0x649   : > { %8448 = vrcp.f32 %v11962_v4  ;;  %v12110_v8 = vadd.f32 %v6957_v37, %v6956_v44  ;;  %v12112_v1 = vadd.f32 %v6963_v48, %v6962_v56  ;;  %v12114_v45 = vadd.f32 %v6969_v11, %v6968_v2 }
 0x64a   : > { %8450 = vrcp.f32 %v11987_v31  ;;  %v7135_v25 = vrot.slane %v12119_v57, 1  ;;  %v7136_v62 = vrot.slane %v12119_v57, 2  ;;  %v7137_v39 = vrot.slane %v12119_v57, 3 }
 0x64b   : > { %8452 = vrcp.f32 %v11995_v28  ;;  %v7138_v4 = vrot.slane %v12119_v57, 4  ;;  %v7139_v55 = vrot.slane %v12119_v57, 5  ;;  %v7140_v27 = vrot.slane %v12119_v57, 6  ;;  %v12131_v28 = vld [vmem:[%s8751_s8 + $0x8] sm:$0xff] }
 0x64c   : > { %8454 = vrcp.f32 %v12001_v6  ;;  %v7141_v31 = vrot.slane %v12119_v57, 7  ;;  %v7142_v10 = vrot.slane %v12131_v28, 1  ;;  %v7143_v9 = vrot.slane %v12131_v28, 2 }
 0x64d   : > { %8456 = vrcp.f32 %v12047_v40  ;;  %v7144_v6 = vrot.slane %v12131_v28, 3  ;;  %v7145_v29 = vrot.slane %v12131_v28, 4  ;;  %v7146_v18 = vrot.slane %v12131_v28, 5 }
 0x64e   : > { %8458 = vrcp.f32 %v12050_v0  ;;  %v7147_v40 = vrot.slane %v12131_v28, 6  ;;  %v7148_v38 = vrot.slane %v12131_v28, 7  ;;  %v13069_v0 = vrot.slane %v11893_v21, 4 }
 0x64f   : > { %8460 = vrcp.f32 %v12007_v36  ;;  %v6727_v44 = vrot.slane %v11919_v54, 4 }
 0x650   : > { %v8443_v58 = vpop.eup %8442  ;;  %8462 = vrcp.f32 %v12054_v15  ;;  %v12146_v46 = vadd.f32 %v11893_v21, %v13069_v0  ;;  %v6723_v15 = vrot.slane %v11908_v17, 2 }
 0x651   : > { %v8445_v20 = vpop.eup %8444  ;;  %8464 = vrcp.f32 %v12056_v26  ;;  %v7099_v43 = vmul.f32 %v8443_v58, %v6880_v59  ;;  %v13070_v26 = vld [vmem:[#allocation68_spill] sm:$0xff]  ;;  %v12166_v11 = vadd.f32 %v11919_v54, %v6727_v44 }
 0x652   : > { %v8447_v36 = vpop.eup %8446  ;;  %8466 = vrcp.f32 %v12058_v60  ;;  %v7100_v50 = vmul.f32 %v8445_v20, %v12082_v61  ;;  %v6733_v56 = vrot.slane %v13070_v26, 4  ;;  %v6717_v61 = vrot.slane %v12146_v46, 2 }
 0x653   : > { %v8449_v41 = vpop.eup %8448  ;;  %8468 = vrcp.f32 %v12060_v12  ;;  %v7101_v51 = vmul.f32 %v8447_v36, %v12084_v24  ;;  %v13071_v24 = vld [vmem:[#allocation69_spill] sm:$0xff]  ;;  %v7195_v47 = vadd.f32 %v12119_v57, %v7099_v43 }
 0x654   : > { %v8451_v2 = vpop.eup %8450  ;;  %8470 = vrcp.f32 %v12062_v30  ;;  %v7102_v60 = vmul.f32 %v8449_v41, %v12086_v53  ;;  %v7196_v59 = vadd.f32 %v7135_v25, %v7100_v50  ;;  %v6739_v23 = vrot.slane %v13071_v24, 4 }
 0x655   : > { %v8453_v35 = vpop.eup %8452  ;;  %8472 = vrcp.f32 %v12064_v5  ;;  %v7103_v12 = vmul.f32 %v8451_v2, %v12089_v14  ;;  %v7197_v33 = vadd.f32 %v7136_v62, %v7101_v51 }
 0x656   : > { %v8455_v19 = vpop.eup %8454  ;;  %v7104_v7 = vmul.f32 %v8453_v35, %v12091_v34  ;;  %v7198_v52 = vadd.f32 %v7137_v39, %v7102_v60  ;;  %v7315_v30 = vrot.slane %v7196_v59, 7 }
 0x657   : > { %v8457_v63 = vpop.eup %8456  ;;  %v7105_v53 = vmul.f32 %v8455_v19, %v12093_v32  ;;  %v7199_v37 = vadd.f32 %v7138_v4, %v7103_v12  ;;  %v7318_v48 = vrot.slane %v7197_v33, 6 }
 0x658   : > { %v8459_v5 = vpop.eup %8458  ;;  %v7106_v14 = vmul.f32 %v8457_v63, %v12096_v49  ;;  %v7200_v25 = vadd.f32 %v7139_v55, %v7104_v7  ;;  %v7317_v62 = vsel %vm7316_vm3, %v7315_v30, %v7195_v47  ;;  %v7321_v58 = vrot.slane %v7198_v52, 5 }
 0x659   : > { %v8461_v34 = vpop.eup %8460  ;;  %v7107_v0 = vmul.f32 %v8459_v5, %v12098_v13  ;;  %v7201_v39 = vadd.f32 %v7140_v27, %v7105_v53  ;;  %v7320_v20 = vsel %vm7319_vm4, %v7318_v48, %v7317_v62  ;;  %v7324_v43 = vrot.slane %v7199_v37, 4  ;;  %v13072_v48 = vld [vmem:[#allocation22_spill] sm:$0xff] }
 0x65a   : > { %v8463_v32 = vpop.eup %8462  ;;  %v7108_v4 = vmul.f32 %v8461_v34, %v12100_v3  ;;  %v7202_v36 = vadd.f32 %v7141_v31, %v7106_v14  ;;  %v7323_v50 = vsel %vm7322_vm11, %v7321_v58, %v7320_v20  ;;  %v7327_v49 = vrot.slane %v7200_v25, 3 }
 0x65b   : > { %v8465_v55 = vpop.eup %8464  ;;  %v7109_v41 = vmul.f32 %v8463_v32, %v12103_v16  ;;  %v7326_v51 = vsel %vm7325_vm14, %v7324_v43, %v7323_v50  ;;  %v7330_v44 = vrot.slane %v7201_v39, 2  ;;  %v6734_v13 = vadd.f32 %v13070_v26, %v6733_v56 }
 0x65c   : > { %v8467_v27 = vpop.eup %8466  ;;  %v7110_v2 = vmul.f32 %v8465_v55, %v12105_v42  ;;  %v7204_v3 = vadd.f32 %v7142_v10, %v7108_v4  ;;  %v7329_v57 = vsel %vm7328_vm6, %v7327_v49, %v7326_v51  ;;  %v7333_v31 = vrot.slane %v7202_v36, 1  ;;  %v13074_v4 = vld [vmem:[#allocation47_spill] sm:$0xff]  ;;  %v13076_v51 = vld [vmem:[#allocation38_spill] sm:$0xff] }
 0x65d   : > { %v8469_v60 = vpop.eup %8468  ;;  %v7111_v59 = vmul.f32 %v8467_v27, %v12107_v22  ;;  %v7203_v35 = vadd.f32 %v12131_v28, %v7107_v0  ;;  %v7205_v16 = vadd.f32 %v7143_v9, %v7109_v41  ;;  %v7332_v12 = vsel %vm7331_vm15, %v7330_v44, %v7329_v57 }
 0x65e   : > { %v8471_v56 = vpop.eup %8470  ;;  %v7112_v33 = vmul.f32 %v8469_v60, %v12110_v8  ;;  %v7206_v42 = vadd.f32 %v7144_v6, %v7110_v2  ;;  %v12192_v10 = vsel %vm7334_vm5, %v7333_v31, %v7332_v12  ;;  %v7336_v19 = vrot.slane %v7204_v3, 7 }
 0x65f   : > { %v8473_v7 = vpop.eup %8472  ;;  %v7113_v22 = vmul.f32 %v8471_v56, %v12112_v1  ;;  %v7207_v47 = vadd.f32 %v7145_v29, %v7111_v59  ;;  %v7338_v52 = vrot.slane %v7205_v16, 6  ;;  %v6740_v9 = vadd.f32 %v13071_v24, %v6739_v23  ;;  %v13078_v59 = vld [vmem:[#allocation39_spill] sm:$0xff] }
 0x660   : > { %v7114_v30 = vmul.f32 %v8473_v7, %v12114_v45  ;;  %v7208_v8 = vadd.f32 %v7146_v18, %v7112_v33  ;;  %v7337_v6 = vsel %vm7316_vm3, %v7336_v19, %v7203_v35  ;;  %v7340_v63 = vrot.slane %v7206_v42, 5  ;;  %v13073_v18 = vld [vmem:[#allocation46_spill] sm:$0xff]  ;;  %v13079_v33 = vld [vmem:[#allocation48_spill] sm:$0xff] }
 0x661   : > { %v7209_v53 = vadd.f32 %v7147_v40, %v7113_v22  ;;  %v7339_v37 = vsel %vm7319_vm4, %v7338_v52, %v7337_v6  ;;  %v7342_v1 = vrot.slane %v7207_v47, 4  ;;  %v6745_v5 = vrot.slane %v13072_v48, 4  ;;  %v13080_v19 = vld [vmem:[#allocation40_spill] sm:$0xff] }
 0x662   : > { %v7210_v29 = vadd.f32 %v7148_v38, %v7114_v30  ;;  %v7341_v23 = vsel %vm7322_vm11, %v7340_v63, %v7339_v37  ;;  %v7344_v45 = vrot.slane %v7208_v8, 3  ;;  %v6729_v14 = vrot.slane %v12166_v11, 2 }
 0x663   : > { %8474 = vpow2.f32 %v13073_v18  ;;  %v7343_v25 = vsel %vm7325_vm14, %v7342_v1, %v7341_v23  ;;  %v7346_v62 = vrot.slane %v7209_v53, 2  ;;  %v6735_v58 = vrot.slane %v6734_v13, 2  ;;  %v13082_v53 = vld [vmem:[#allocation34_spill] sm:$0xff]  ;;  %v13083_v23 = vld [vmem:[#allocation27_spill] sm:$0xff] }
 0x664   : > { %v7345_v40 = vsel %vm7328_vm6, %v7344_v45, %v7343_v25  ;;  %v7348_v34 = vrot.slane %v7210_v29, 1  ;;  %v6724_v0 = vadd.f32 %v6723_v15, %v11908_v17  ;;  %v6741_v28 = vrot.slane %v6740_v9, 2  ;;  %v13075_v15 = vld [vmem:[#allocation45_spill] sm:$0xff] }
 0x665   : > { %v7347_v38 = vsel %vm7331_vm15, %v7346_v62, %v7345_v40  ;;  %v6718_v39 = vadd.f32 %v6717_v61, %v12146_v46  ;;  %v6730_v43 = vadd.f32 %v6729_v14, %v12166_v11  ;;  %v6746_v32 = vadd.f32 %v13072_v48, %v6745_v5  ;;  %v13077_v11 = vld [vmem:[#allocation37_spill] sm:$0xff]  ;;  %v13084_v62 = vld [vmem:[#allocation16_spill] sm:$0xff] }
 0x666   : > { %v12221_v20 = vsel %vm7334_vm5, %v7348_v34, %v7347_v38  ;;  %v6769_v36 = vrot.slane %v13074_v4, 4  ;;  %v6736_v17 = vadd.f32 %v6735_v58, %v6734_v13  ;;  %v6751_v49 = vrot.slane %v13075_v15, 4  ;;  %v13085_v58 = vld [vmem:[#allocation67_spill] sm:$0xff]  ;;  %v13086_v38 = vld [vmem:[#allocation18_spill] sm:$0xff] }
 0x667   : > { %v8279_v50 = vpack.c.bf16 %v12221_v20, %v12192_v10  ;;  %v6725_v55 = vrot.slane %v6724_v0, 1  ;;  %v6742_v41 = vadd.f32 %v6741_v28, %v6740_v9  ;;  %v6763_v44 = vrot.slane %v13076_v51, 4  ;;  %v13081_v9 = vld [vmem:[#allocation33_spill] sm:$0xff] }
 0x668   : > { %v6719_v46 = vrot.slane %v6718_v39, 1  ;;  %v6731_v61 = vrot.slane %v6730_v43, 1  ;;  %v6747_v27 = vrot.slane %v6746_v32, 2  ;;  %v6757_v2 = vrot.slane %v13077_v11, 4 }
 0x669   : > { %8280 = vmatprep.subr.bf16.mxu0 %v8279_v50  ;;  %v6770_v3 = vadd.f32 %v13074_v4, %v6769_v36  ;;  %v6737_v57 = vrot.slane %v6736_v17, 1  ;;  %v6752_v31 = vadd.f32 %v13075_v15, %v6751_v49  ;;  %v12233_v60 = vadd.f32 %v6725_v55, %v6724_v0  ;;  %v13088_v55 = vld [vmem:[#allocation28_spill] sm:$0xff] }
 0x66a   : > { %8282 = vmatpush3.bf16.msra.mxu0 %v8279_v50  ;;  %v6743_v13 = vrot.slane %v6742_v41, 1  ;;  %v6775_v35 = vrot.slane %v13078_v59, 4  ;;  %v12236_v12 = vadd.f32 %v6719_v46, %v6718_v39  ;;  %v6764_v56 = vadd.f32 %v13076_v51, %v6763_v44  ;;  %v13089_v44 = vld [vmem:[#allocation61_spill] sm:$0xff] }
 0x66b   : > { %v6781_v42 = vrot.slane %v13079_v33, 4  ;;  %v6787_v7 = vrot.slane %v13080_v19, 4  ;;  %v12241_v22 = vadd.f32 %v6731_v61, %v6730_v43  ;;  %v6748_v47 = vadd.f32 %v6747_v27, %v6746_v32 }
 0x66c   : > { %v6758_v52 = vadd.f32 %v13077_v11, %v6757_v2  ;;  %v6793_v30 = vrot.slane %v13081_v9, 4  ;;  %v12245_v8 = vadd.f32 %v6737_v57, %v6736_v17  ;;  %v6753_v6 = vrot.slane %v6752_v31, 2  ;;  %v13090_v2 = vld [vmem:[#allocation62_spill] sm:$0xff]  ;;  %v13091_v57 = vld [vmem:[#allocation41_spill] sm:$0xff] }
 0x66d   : > { %v8475_v16 = vpop.eup %8474  ;;  %v6771_v63 = vrot.slane %v6770_v3, 2  ;;  %v6799_v37 = vrot.slane %v13082_v53, 4  ;;  %v12248_v1 = vadd.f32 %v6743_v13, %v6742_v41  ;;  %v6776_v5 = vadd.f32 %v13078_v59, %v6775_v35  ;;  %v13092_v13 = vld [vmem:[#allocation9_spill] sm:$0xff]  ;;  %v13093_v35 = vld [vmem:[#allocation42_spill] sm:$0xff] }
 0x66e   : > { %v6805_v29 = vrot.slane %v8475_v16, 4  ;;  %v6859_v45 = vmul.f32 %v11893_v21, %v13083_v23  ;;  %v6765_v14 = vrot.slane %v6764_v56, 2  ;;  %v6782_v18 = vadd.f32 %v13079_v33, %v6781_v42  ;;  %v13087_v21 = vld [vmem:[#allocation26_spill] sm:$0xff]  ;;  %v13094_v42 = vld [vmem:[#allocation11_spill] sm:$0xff] }
 0x66f   : > { %v6788_v25 = vadd.f32 %v13080_v19, %v6787_v7  ;;  %v6860_v40 = vmul.f32 %v13085_v58, %v13084_v62  ;;  %v6749_v34 = vrot.slane %v6748_v47, 1  ;;  %v6759_v0 = vrot.slane %v6758_v52, 2 }
 0x670   : > { %v6794_v28 = vadd.f32 %v13081_v9, %v6793_v30  ;;  %v6861_v39 = vmul.f32 %v11919_v54, %v13086_v38  ;;  %v6754_v43 = vadd.f32 %v6753_v6, %v6752_v31  ;;  %v6772_v32 = vadd.f32 %v6771_v63, %v6770_v3 }
 0x671   : > { %v6800_v36 = vadd.f32 %v13082_v53, %v6799_v37  ;;  %v6862_v50 = vmul.f32 %v13070_v26, %v13087_v21  ;;  %v6777_v17 = vrot.slane %v6776_v5, 2  ;;  %v6806_v49 = vadd.f32 %v8475_v16, %v6805_v29  ;;  %v13097_v37 = vld [vmem:[#allocation44_spill] sm:$0xff] }
 0x672   : > { %v6863_v41 = vmul.f32 %v13071_v24, %v13088_v55  ;;  %v6864_v46 = vmul.f32 %v13072_v48, %v13089_v44  ;;  %v6783_v61 = vrot.slane %v6782_v18, 2  ;;  %v6789_v27 = vrot.slane %v6788_v25, 2 }
 0x673   : > { %v6865_v54 = vmul.f32 %v13075_v15, %v13090_v2  ;;  %v12271_v3 = vmul.f32 %v13077_v11, %v13091_v57  ;;  %v6795_v31 = vrot.slane %v6794_v28, 2  ;;  %v12275_v26 = vmul.f32 %v13076_v51, %v13092_v13  ;;  %v13095_v15 = vld [vmem:[#allocation43_spill] sm:$0xff]  ;;  %v13096_v11 = vld [vmem:[#allocation14_spill] sm:$0xff] }
 0x674   : > { %v12279_v24 = vmul.f32 %v13074_v4, %v13093_v35  ;;  %v12283_v48 = vmul.f32 %v13078_v59, %v13094_v42  ;;  %v6766_v7 = vadd.f32 %v6765_v14, %v6764_v56  ;;  %v6801_v30 = vrot.slane %v6800_v36, 2  ;;  %v13098_v4 = vld [vmem:[#allocation19_spill] sm:$0xff]  ;;  %v13099_v59 = vld [vmem:[#allocation53_spill] sm:$0xff] }
 0x675   : > { %v12287_v6 = vmul.f32 %v13079_v33, %v13095_v15  ;;  %v12291_v63 = vmul.f32 %v13080_v19, %v13096_v11  ;;  %v6807_v51 = vrot.slane %v6806_v49, 2  ;;  %v12295_v29 = vmul.f32 %v13081_v9, %v13097_v37 }
 0x676   : > { %v12299_v23 = vmul.f32 %v13082_v53, %v13098_v4  ;;  %v12302_v56 = vmul.f32 %v8475_v16, %v13099_v59  ;;  %v12304_v14 = vadd.f32 %v6749_v34, %v6748_v47  ;;  %v6760_v33 = vadd.f32 %v6759_v0, %v6758_v52 }
 0x677   : > { %v6773_v62 = vrot.slane %v6772_v32, 1  ;;  %v6778_v58 = vadd.f32 %v6777_v17, %v6776_v5  ;;  %v6755_v38 = vrot.slane %v6754_v43, 1  ;;  %v6784_v19 = vadd.f32 %v6783_v61, %v6782_v18 }
 0x678   : > { %v6790_v21 = vadd.f32 %v6789_v27, %v6788_v25  ;;  %v6796_v55 = vadd.f32 %v6795_v31, %v6794_v28  ;;  %v6802_v44 = vadd.f32 %v6801_v30, %v6800_v36  ;;  %v6971_v2 = vrot.slane %v6859_v45, 4 }
 0x679   : > { %v6977_v9 = vrot.slane %v6860_v40, 4  ;;  %v6983_v57 = vrot.slane %v6861_v39, 4  ;;  %v6767_v13 = vrot.slane %v6766_v7, 1  ;;  %v6808_v35 = vadd.f32 %v6807_v51, %v6806_v49 }
 0x67a   : > { %v6989_v53 = vrot.slane %v6862_v50, 4  ;;  %v6995_v42 = vrot.slane %v6863_v41, 4  ;;  %v6761_v15 = vrot.slane %v6760_v33, 1  ;;  %v12306_v16 = vadd.f32 %v6773_v62, %v6772_v32 }
 0x67b   : > { %v6779_v47 = vrot.slane %v6778_v58, 1  ;;  %v7001_v34 = vrot.slane %v6864_v46, 4  ;;  %v12308_v52 = vadd.f32 %v6755_v38, %v6754_v43  ;;  %v6785_v5 = vrot.slane %v6784_v19, 1 }
 0x67c   : > { %v6791_v0 = vrot.slane %v6790_v21, 1  ;;  %v6797_v18 = vrot.slane %v6796_v55, 1  ;;  %v6803_v25 = vrot.slane %v6802_v44, 1  ;;  %v6972_v28 = vadd.f32 %v6971_v2, %v6859_v45 }
 0x67d   : > { %v6978_v36 = vadd.f32 %v6977_v9, %v6860_v40  ;;  %v6984_v17 = vadd.f32 %v6983_v57, %v6861_v39  ;;  %v6809_v61 = vrot.slane %v6808_v35, 1  ;;  %v6990_v27 = vadd.f32 %v6989_v53, %v6862_v50 }
 0x67e   : > { %v6996_v31 = vadd.f32 %v6995_v42, %v6863_v41  ;;  %v7007_v49 = vrot.slane %v6865_v54, 4  ;;  %v12310_v30 = vadd.f32 %v6761_v15, %v6760_v33  ;;  %v12312_v11 = vadd.f32 %v6767_v13, %v6766_v7 }
 0x67f   : > { %v12314_v32 = vadd.f32 %v6779_v47, %v6778_v58  ;;  %v7002_v51 = vadd.f32 %v7001_v34, %v6864_v46  ;;  %v12316_v43 = vadd.f32 %v6785_v5, %v6784_v19  ;;  %v12318_v37 = vadd.f32 %v6791_v0, %v6790_v21 }
 0x680   : > { %v12320_v4 = vadd.f32 %v6797_v18, %v6796_v55  ;;  %v7013_v45 = vrot.slane %v12271_v3, 4  ;;  %v12323_v40 = vadd.f32 %v6803_v25, %v6802_v44  ;;  %v6973_v39 = vrot.slane %v6972_v28, 2 }
 0x681   : > { %v6979_v50 = vrot.slane %v6978_v36, 2  ;;  %v6985_v41 = vrot.slane %v6984_v17, 2  ;;  %v12325_v59 = vadd.f32 %v6809_v61, %v6808_v35  ;;  %v6991_v7 = vrot.slane %v6990_v27, 2 }
 0x682   : > { %v6997_v33 = vrot.slane %v6996_v31, 2  ;;  %v7008_v62 = vadd.f32 %v7007_v49, %v6865_v54  ;;  %v7003_v58 = vrot.slane %v7002_v51, 2  ;;  %v7019_v46 = vrot.slane %v12275_v26, 4 }
 0x683   : > { %v7025_v38 = vrot.slane %v12279_v24, 4  ;;  %v7031_v19 = vrot.slane %v12283_v48, 4  ;;  %v7014_v21 = vadd.f32 %v7013_v45, %v12271_v3  ;;  %v7037_v55 = vrot.slane %v12287_v6, 4 }
 0x684   : > { %v7043_v44 = vrot.slane %v12291_v63, 4  ;;  %v7049_v2 = vrot.slane %v12295_v29, 4  ;;  %v6974_v9 = vadd.f32 %v6973_v39, %v6972_v28  ;;  %v6980_v57 = vadd.f32 %v6979_v50, %v6978_v36 }
 0x685   : > { %v6986_v13 = vadd.f32 %v6985_v41, %v6984_v17  ;;  %v7055_v54 = vrot.slane %v12299_v23, 4  ;;  %v7020_v35 = vadd.f32 %v7019_v46, %v12275_v26  ;;  %v7026_v53 = vadd.f32 %v7025_v38, %v12279_v24 }
 0x686   : > { %v7032_v42 = vadd.f32 %v7031_v19, %v12283_v48  ;;  %v7061_v15 = vrot.slane %v12302_v56, 4  ;;  %v7009_v3 = vrot.slane %v7008_v62, 2  ;;  %v7038_v47 = vadd.f32 %v7037_v55, %v12287_v6 }
 0x687   : > { %v7044_v34 = vadd.f32 %v7043_v44, %v12291_v63  ;;  %v7050_v5 = vadd.f32 %v7049_v2, %v12295_v29  ;;  %v6992_v0 = vadd.f32 %v6991_v7, %v6990_v27  ;;  %v6998_v18 = vadd.f32 %v6997_v33, %v6996_v31 }
 0x688   : > { %v7004_v25 = vadd.f32 %v7003_v58, %v7002_v51  ;;  %v7056_v28 = vadd.f32 %v7055_v54, %v12299_v23  ;;  %v6975_v36 = vrot.slane %v6974_v9, 1  ;;  %v6981_v26 = vrot.slane %v6980_v57, 1 }
 0x689   : > { %v7015_v17 = vrot.slane %v7014_v21, 2  ;;  %v7062_v24 = vadd.f32 %v7061_v15, %v12302_v56  ;;  %v6987_v48 = vrot.slane %v6986_v13, 1  ;;  %v7021_v61 = vrot.slane %v7020_v35, 2 }
 0x68a   : > { %v7027_v49 = vrot.slane %v7026_v53, 2  ;;  %v7033_v45 = vrot.slane %v7032_v42, 2  ;;  %v7010_v39 = vadd.f32 %v7009_v3, %v7008_v62  ;;  %v7039_v6 = vrot.slane %v7038_v47, 2  ;;  %v12367_v3 = vld [vmem:[%s12558_s3 + $0x8] sm:$0xff] }
 0x68b   : > { %v7045_v50 = vrot.slane %v7044_v34, 2  ;;  %v7051_v63 = vrot.slane %v7050_v5, 2  ;;  %v6993_v41 = vrot.slane %v6992_v0, 1  ;;  %v6999_v29 = vrot.slane %v6998_v18, 1 }
 0x68c   : > { %v7005_v27 = vrot.slane %v7004_v25, 1  ;;  %v7057_v31 = vrot.slane %v7056_v28, 2  ;;  %v12344_v51 = vadd.f32 %v6975_v36, %v6974_v9  ;;  %v12346_v23 = vadd.f32 %v6981_v26, %v6980_v57  ;;  %v12396_v36 = vld [vmem:[%s12558_s3 + $0x10] sm:$0xff] }
 0x68d   : > { %v7016_v7 = vadd.f32 %v7015_v17, %v7014_v21  ;;  %v7063_v33 = vrot.slane %v7062_v24, 2  ;;  %v12348_v58 = vadd.f32 %v6987_v48, %v6986_v13  ;;  %v7022_v56 = vadd.f32 %v7021_v61, %v7020_v35  ;;  %v12405_v17 = vld [vmem:[%s8751_s8 + $0x10] sm:$0xff] }
 0x68e   : > { %v7028_v46 = vadd.f32 %v7027_v49, %v7026_v53  ;;  %v7034_v38 = vadd.f32 %v7033_v45, %v7032_v42  ;;  %v7040_v19 = vadd.f32 %v7039_v6, %v7038_v47  ;;  %v7046_v62 = vadd.f32 %v7045_v50, %v7044_v34 }
 0x68f   : > { %v7052_v55 = vadd.f32 %v7051_v63, %v7050_v5  ;;  %8476 = vrcp.f32 %v12236_v12  ;;  %v12351_v44 = vadd.f32 %v6993_v41, %v6992_v0  ;;  %v7011_v2 = vrot.slane %v7010_v39, 1 }
 0x690   : > { %v7058_v54 = vadd.f32 %v7057_v31, %v7056_v28  ;;  %8478 = vrcp.f32 %v12233_v60  ;;  %v12354_v9 = vadd.f32 %v6999_v29, %v6998_v18  ;;  %v7017_v21 = vrot.slane %v7016_v7, 1  ;;  %v12362_v60 = vld [vmem:[%s12558_s3] sm:$0xff]  ;;  %v12423_v29 = vld [vmem:[%s8751_s8 + $0x18] sm:$0xff]  ;;  %v7241_v31 = vld [vmem:[%s12558_s3 + $0x30] sm:$0xff] }
 0x691   : > { %v7064_v57 = vadd.f32 %v7063_v33, %v7062_v24  ;;  %8480 = vrcp.f32 %v12241_v22  ;;  %v7023_v13 = vrot.slane %v7022_v56, 1  ;;  %v7029_v35 = vrot.slane %v7028_v46, 1 }
 0x692   : > { %v7035_v53 = vrot.slane %v7034_v38, 1  ;;  %8482 = vrcp.f32 %v12245_v8  ;;  %v7041_v42 = vrot.slane %v7040_v19, 1  ;;  %v7047_v15 = vrot.slane %v7046_v62, 1 }
 0x693   : > { %v7053_v12 = vrot.slane %v7052_v55, 1  ;;  %8484 = vrcp.f32 %v12248_v1  ;;  %v12369_v22 = vadd.f32 %v7005_v27, %v7004_v25  ;;  %v7059_v47 = vrot.slane %v7058_v54, 1  ;;  %v12429_v27 = vld [vmem:[%s12558_s3 + $0x18] sm:$0xff] }
 0x694   : > { %8486 = vrcp.f32 %v12304_v14  ;;  %v12372_v8 = vadd.f32 %v7011_v2, %v7010_v39  ;;  %v12374_v34 = vadd.f32 %v7017_v21, %v7016_v7  ;;  %v7065_v1 = vrot.slane %v7064_v57, 1  ;;  %v7240_v21 = vld [vmem:[%s12558_s3 + $0x28] sm:$0xff] }
 0x695   : > { %8488 = vrcp.f32 %v12308_v52  ;;  %v8622_v5 = vmov 4   ;;  %v12377_v0 = vadd.f32 %v7023_v13, %v7022_v56  ;;  %v12379_v18 = vadd.f32 %v7029_v35, %v7028_v46 }
 0x696   : > { %8376 = vset.pattern.permute.xlu1 %v8622_v5  ;;  %8377 = vset.pattern.permute.xlu0 %v8622_v5  ;;  %v12381_v25 = vadd.f32 %v7035_v53, %v7034_v38  ;;  %8490 = vrcp.f32 %v12310_v30  ;;  %v12386_v14 = vadd.f32 %v7041_v42, %v7040_v19  ;;  %v12388_v28 = vadd.f32 %v7047_v15, %v7046_v62  ;;  %v7239_v30 = vld [vmem:[%s12558_s3 + $0x20] sm:$0xff] }
 0x697   : > { %7245 = vperm.xlu1 %8376, %v12362_v60   ;;  %7250 = vperm.xlu0 %8377, %v12367_v3   ;;  %v12390_v52 = vadd.f32 %v7053_v12, %v7052_v55  ;;  %8492 = vrcp.f32 %v12312_v11  ;;  %v12401_v26 = vadd.f32 %v7059_v47, %v7058_v54  ;;  %v7149_v24 = vrot.slane %v12405_v17, 1 }
 0x698   : > { %8494 = vrcp.f32 %v12306_v16  ;;  %v7150_v48 = vrot.slane %v12405_v17, 2  ;;  %v12409_v61 = vadd.f32 %v7065_v1, %v7064_v57  ;;  %v7151_v49 = vrot.slane %v12405_v17, 3 }
 0x699   : > { %v8477_v11 = vpop.eup %8476  ;;  %8496 = vrcp.f32 %v12314_v32  ;;  %v7152_v45 = vrot.slane %v12405_v17, 4  ;;  %v7153_v6 = vrot.slane %v12405_v17, 5  ;;  %v7154_v50 = vrot.slane %v12405_v17, 6 }
 0x69a   : > { %v8479_v39 = vpop.eup %8478  ;;  %8498 = vrcp.f32 %v12316_v43  ;;  %v7115_v16 = vmul.f32 %v8477_v11, %v12344_v51  ;;  %v7155_v41 = vrot.slane %v12405_v17, 7  ;;  %v7156_v43 = vrot.slane %v12423_v29, 1 }
 0x69b   : > { %7255 = vperm.xlu1 %8376, %v12396_v36   ;;  %7265 = vperm.xlu0 %8377, %v7239_v30   ;;  %v8481_v63 = vpop.eup %8480  ;;  %8500 = vrcp.f32 %v12318_v37  ;;  %v7116_v32 = vmul.f32 %v8479_v39, %v12346_v23  ;;  %v7157_v23 = vrot.slane %v12423_v29, 2  ;;  %v7158_v7 = vrot.slane %v12423_v29, 3 }
 0x69c   : > { %v8483_v51 = vpop.eup %8482  ;;  %8502 = vrcp.f32 %v12320_v4  ;;  %v7117_v37 = vmul.f32 %v8481_v63, %v12348_v58  ;;  %v7159_v46 = vrot.slane %v12423_v29, 4  ;;  %v7160_v4 = vrot.slane %v12423_v29, 5 }
 0x69d   : > { %v8485_v33 = vpop.eup %8484  ;;  %8504 = vrcp.f32 %v12323_v40  ;;  %v7118_v56 = vmul.f32 %v8483_v51, %v12351_v44  ;;  %v7212_v38 = vadd.f32 %v7149_v24, %v7116_v32  ;;  %v7211_v40 = vadd.f32 %v12405_v17, %v7115_v16 }
 0x69e   : > { %v8487_v19 = vpop.eup %8486  ;;  %8506 = vrcp.f32 %v12325_v59  ;;  %v7119_v62 = vmul.f32 %v8485_v33, %v12354_v9  ;;  %v7213_v58 = vadd.f32 %v7150_v48, %v7117_v37  ;;  %v7161_v57 = vrot.slane %v12423_v29, 6 }
 0x69f   : > { %7260 = vperm.xlu1 %8376, %v12429_v27   ;;  %7275 = vperm.xlu0 %8377, %v7241_v31   ;;  %v8489_v55 = vpop.eup %8488  ;;  %v7120_v2 = vmul.f32 %v8487_v19, %v12369_v22  ;;  %v7214_v44 = vadd.f32 %v7151_v49, %v7118_v56  ;;  %v7350_v54 = vrot.slane %v7212_v38, 7 }
 0x6a0   : > { %v8491_v59 = vpop.eup %8490  ;;  %v7121_v9 = vmul.f32 %v8489_v55, %v12372_v8  ;;  %v7215_v13 = vadd.f32 %v7152_v45, %v7119_v62  ;;  %v7352_v35 = vrot.slane %v7213_v58, 6 }
 0x6a1   : > { %v8493_v53 = vpop.eup %8492  ;;  %v7122_v42 = vmul.f32 %v8491_v59, %v12374_v34  ;;  %v7216_v15 = vadd.f32 %v7153_v6, %v7120_v2  ;;  %v7351_v12 = vsel %vm7316_vm3, %v7350_v54, %v7211_v40  ;;  %v7354_v22 = vrot.slane %v7214_v44, 5  ;;  %v7242_v34 = vld [vmem:[%s12558_s3 + $0x38] sm:$0xff] }
 0x6a2   : > { %v8495_v47 = vpop.eup %8494  ;;  %v7123_v1 = vmul.f32 %v8493_v53, %v12377_v0  ;;  %v7217_v5 = vadd.f32 %v7154_v50, %v7121_v9  ;;  %v7353_v30 = vsel %vm7319_vm4, %v7352_v35, %v7351_v12  ;;  %v7356_v17 = vrot.slane %v7215_v13, 4  ;;  %v7228_v35 = vld [vmem:[#allocation2 + $0xc8] sm:$0xff]  ;;  %v7229_v53 = vld [vmem:[#allocation2 + $0xd0] sm:$0xff] }
 0x6a3   : > { %7270 = vperm.xlu1 %8376, %v7240_v21   ;;  %v8497_v8 = vpop.eup %8496  ;;  %v7124_v24 = vmul.f32 %v8495_v47, %v12379_v18  ;;  %v7218_v48 = vadd.f32 %v7155_v41, %v7122_v42  ;;  %v7355_v11 = vsel %vm7322_vm11, %v7354_v22, %v7353_v30  ;;  %v7358_v49 = vrot.slane %v7216_v15, 3  ;;  %v7230_v42 = vld [vmem:[#allocation2 + $0xd8] sm:$0xff]  ;;  %v7231_v15 = vld [vmem:[#allocation2 + $0xe0] sm:$0xff]  ;;  %v7232_v12 = vld [vmem:[#allocation2 + $0xe8] sm:$0xff] }
 0x6a4   : > { %v8499_v45 = vpop.eup %8498  ;;  %v7125_v39 = vmul.f32 %v8497_v8, %v12381_v25  ;;  %v7162_v0 = vrot.slane %v12423_v29, 7  ;;  %v7357_v16 = vsel %vm7325_vm14, %v7356_v17, %v7355_v11  ;;  %v7360_v6 = vrot.slane %v7217_v5, 2  ;;  %v7233_v22 = vld [vmem:[#allocation2 + $0xf0] sm:$0xff]  ;;  %v7234_v47 = vld [vmem:[#allocation2 + $0xf8] sm:$0xff] }
 0x6a5   : > { %v8501_v50 = vpop.eup %8500  ;;  %v7126_v63 = vmul.f32 %v8499_v45, %v12386_v14  ;;  %v7220_v18 = vadd.f32 %v7156_v43, %v7124_v24  ;;  %v7359_v32 = vsel %vm7328_vm6, %v7358_v49, %v7357_v16  ;;  %v7362_v41 = vrot.slane %v7218_v48, 1 }
 0x6a6   : > { %v8503_v31 = vpop.eup %8502  ;;  %v7127_v51 = vmul.f32 %v8501_v50, %v12388_v28  ;;  %v7219_v37 = vadd.f32 %v12423_v29, %v7123_v1  ;;  %v7221_v33 = vadd.f32 %v7157_v23, %v7125_v39  ;;  %v7361_v25 = vsel %vm7331_vm15, %v7360_v6, %v7359_v32  ;;  %v7519_v1 = vld [vmem:[#allocation2 + $0x100] sm:$0xff] }
 0x6a7   : > { %7280 = vperm.xlu1 %8376, %v7242_v34   ;;  %v8505_v56 = vpop.eup %8504  ;;  %v7128_v38 = vmul.f32 %v8503_v31, %v12390_v52  ;;  %v7222_v19 = vadd.f32 %v7158_v7, %v7126_v63  ;;  %v12471_v62 = vsel %vm7334_vm5, %v7362_v41, %v7361_v25  ;;  %v7364_v14 = vrot.slane %v7220_v18, 7  ;;  %8201 = vmatprep.mubr.msk.f32.mxu1 %vm7547_vm12, %v7519_v1 }
 0x6a8   : > { %v8507_v43 = vpop.eup %8506  ;;  %v7129_v58 = vmul.f32 %v8505_v56, %v12401_v26  ;;  %v7223_v55 = vadd.f32 %v7159_v46, %v7127_v51  ;;  %v7366_v2 = vrot.slane %v7221_v33, 6  ;;  %v8623_v5 = vmov 5  }
 0x6a9   : > { %v7130_v28 = vmul.f32 %v8507_v43, %v12409_v61  ;;  %v7224_v29 = vadd.f32 %v7160_v4, %v7128_v38  ;;  %v7365_v23 = vsel %vm7316_vm3, %v7364_v14, %v7219_v37  ;;  %v7368_v40 = vrot.slane %v7222_v19, 5  ;;  %8378 = vset.pattern.permute.xlu0 %v8623_v5 }
 0x6aa   : > { %v7225_v44 = vadd.f32 %v7161_v57, %v7129_v58  ;;  %v7367_v54 = vsel %vm7319_vm4, %v7366_v2, %v7365_v23  ;;  %v7370_v52 = vrot.slane %v7223_v55, 4  ;;  %7529 = vperm.xlu0 %8378, %v12362_v60   ;;  %v7521_v23 = vld [vmem:[#allocation2 + $0x110] sm:$0xff] }
 0x6ab   : > { %v7226_v7 = vadd.f32 %v7162_v0, %v7130_v28  ;;  %v7369_v21 = vsel %vm7322_vm11, %v7368_v40, %v7367_v54  ;;  %v7372_v59 = vrot.slane %v7224_v29, 3  ;;  %8379 = vset.pattern.permute.xlu1 %v8623_v5  ;;  %v7520_v29 = vld [vmem:[#allocation2 + $0x108] sm:$0xff]  ;;  %v7522_v40 = vld [vmem:[#allocation2 + $0x118] sm:$0xff] }
 0x6ac   : > { %v7371_v9 = vsel %vm7325_vm14, %v7370_v52, %v7369_v21  ;;  %v7374_v13 = vrot.slane %v7225_v44, 2  ;;  %7534 = vperm.xlu1 %8379, %v12367_v3  }
 0x6ad   : > { %v7373_v26 = vsel %vm7328_vm6, %v7372_v59, %v7371_v9  ;;  %v7376_v46 = vrot.slane %v7226_v7, 1 }
 0x6ae   : > { %v7375_v61 = vsel %vm7331_vm15, %v7374_v13, %v7373_v26  ;;  %7544 = vperm.xlu0 %8378, %v12429_v27  }
 0x6af   : > { %v12482_v4 = vsel %vm7334_vm5, %v7376_v46, %v7375_v61 }
 0x6b0   : > { %v8283_v57 = vpack.c.bf16 %v12482_v4, %v12471_v62  ;;  %7539 = vperm.xlu1 %8379, %v12396_v36  }
 0x6b2   : > { %8284 = vmatprep.subr.bf16.mxu0 %v8283_v57 }
 0x6b3   : > { %8286 = vmatpush3.bf16.msra.mxu0 %v8283_v57 }
 0x6b6   : > { %8174 = vmatmul.mubr.msk.f32.vlgmr.msra.gmra.mrb[90].mxu0 %vm5060_vm1, %v7228_v35 }
 0x6b7   : > { %8176 = vmatprep.mubr.msk.f32.mxu0 %vm5060_vm1, %v7229_v53 }
 0x6ba   : > { %8177 = vmatmul.mubr.msk.f32.gmra.mrb[92].mxu0 %vm5060_vm1, %v7230_v42 }
 0x6bb   : > { %8179 = vmatprep.mubr.msk.f32.mxu0 %vm5060_vm1, %v7231_v15 }
 0x6be   : > { %8180 = vmatmul.mubr.msk.f32.gmra.mrb[94].mxu0 %vm5060_vm1, %v7232_v12 }
 0x6bf   : > { %8182 = vmatprep.mubr.msk.f32.mxu0 %vm5060_vm1, %v7233_v22 }
 0x6c2   : > { %8183 = vmatmul.mubr.msk.f32.gmra.mrb[96].mxu0 %vm5060_vm1, %v7234_v47 }
 0x716   : > { %v7246_v30 = vpop.permute.xlu1 %7245  ;;  %v7251_v8 = vpop.permute.xlu0 %7250 }
 0x71a   : > { %v7256_v17 = vpop.permute.xlu1 %7255  ;;  %v7266_v27 = vpop.permute.xlu0 %7265 }
 0x71e   : > { %v7261_v48 = vpop.permute.xlu1 %7260  ;;  %v7276_v19 = vpop.permute.xlu0 %7275 }
 0x722   : > { %v7271_v60 = vpop.permute.xlu1 %7270 }
 0x726   : > { %v7281_v56 = vpop.permute.xlu1 %7280 }
 0x729   : > { %v7530_v44 = vpop.permute.xlu0 %7529 }
 0x72b   : > { %v7535_v54 = vpop.permute.xlu1 %7534 }
 0x72d   : > { %v7545_v26 = vpop.permute.xlu0 %7544 }
 0x72f   : > { %v7540_v57 = vpop.permute.xlu1 %7539 }
 0x789   : > { %v8175_v24 = vpop.f32.mrb[90].mxu0 }
 0x78a   : > { %v7478_v11 = vadd.f32 %v8175_v24, %v7251_v8  ;;  %v7472_v49 = vpop.f32.mrb[91].mxu0 }
 0x78b   : > { %v7473_v34 = vadd.f32 %v7472_v49, %v7246_v30 }
 0x78c   : > { %v7512_v45 = vmax.f32 %v7478_v11, 0.0 }
 0x78d   : > { %v7511_v39 = vmax.f32 %v7473_v34, 0.0  ;;  %v8178_v0 = vpop.f32.mrb[92].mxu0 }
 0x78e   : > { %v7488_v16 = vadd.f32 %v8178_v0, %v7261_v48  ;;  %v7482_v6 = vpop.f32.mrb[93].mxu0 }
 0x78f   : > { %v8287_v3 = vpack.c.bf16 %v7512_v45, %v7511_v39  ;;  %v7483_v50 = vadd.f32 %v7482_v6, %v7256_v17 }
 0x790   : > { %v7514_v63 = vmax.f32 %v7488_v16, 0.0 }
 0x791   : > { %v7513_v18 = vmax.f32 %v7483_v50, 0.0  ;;  %v8181_v36 = vpop.f32.mrb[94].mxu0  ;;  %8288 = vmatprep.subr.bf16.mxu1 %v8287_v3 }
 0x792   : > { %v7498_v32 = vadd.f32 %v8181_v36, %v7271_v60  ;;  %v7492_v41 = vpop.f32.mrb[95].mxu0  ;;  %8290 = vmatpush3.bf16.msra.mxu1 %v8287_v3 }
 0x793   : > { %v8291_v31 = vpack.c.bf16 %v7514_v63, %v7513_v18  ;;  %v7493_v51 = vadd.f32 %v7492_v41, %v7266_v27 }
 0x794   : > { %v7516_v37 = vmax.f32 %v7498_v32, 0.0 }
 0x795   : > { %v7515_v33 = vmax.f32 %v7493_v51, 0.0  ;;  %v8184_v25 = vpop.f32.mrb[96].mxu0  ;;  %8292 = vmatprep.subr.bf16.mxu1 %v8291_v31 }
 0x796   : > { %v7508_v38 = vadd.f32 %v8184_v25, %v7281_v56  ;;  %v7502_v14 = vpop.f32.mrb[97].mxu0  ;;  %8294 = vmatpush3.bf16.msra.mxu1 %v8291_v31 }
 0x797   : > { %v8295_v43 = vpack.c.bf16 %v7516_v37, %v7515_v33  ;;  %v7503_v58 = vadd.f32 %v7502_v14, %v7276_v19 }
 0x798   : > { %v7518_v55 = vmax.f32 %v7508_v38, 0.0 }
 0x799   : > { %v7517_v2 = vmax.f32 %v7503_v58, 0.0  ;;  %8296 = vmatprep.subr.bf16.mxu1 %v8295_v43 }
 0x79a   : > { %8298 = vmatpush3.bf16.msra.mxu1 %v8295_v43 }
 0x79b   : > { %v8299_v28 = vpack.c.bf16 %v7518_v55, %v7517_v2 }
 0x79d   : > { %8300 = vmatprep.subr.bf16.mxu1 %v8299_v28 }
 0x79e   : > { %8302 = vmatpush3.bf16.msra.mxu1 %v8299_v28 }
 0x7a1   : > { %8202 = vmatmul.mubr.msk.f32.vlgmr.msra.gmra.mrb[84].mxu1 %vm7547_vm12, %v7520_v29 }
 0x7a2   : > { %8204 = vmatprep.mubr.msk.f32.mxu1 %vm7547_vm12, %v7521_v23 }
 0x7a5   : > { %8205 = vmatmul.mubr.msk.f32.gmra.mrb[86].mxu1 %vm7547_vm12, %v7522_v40 }
 0x874   : > { %v8203_v52 = vpop.f32.mrb[84].mxu1 }
 0x875   : > { %v7632_v7 = vadd.f32 %v8203_v52, %v7535_v54  ;;  %v7626_v21 = vpop.f32.mrb[85].mxu1 }
 0x876   : > { %v7627_v59 = vadd.f32 %v7626_v21, %v7530_v44 }
 0x877   : > { %v7646_v9 = vadd.f32 %v7632_v7, %v12221_v20 }
 0x878   : > { %v7645_v13 = vadd.f32 %v7627_v59, %v12192_v10  ;;  %v8206_v46 = vpop.f32.mrb[86].mxu1 }
 0x879   : > { %7650 = vst [vmem:[%s218_s28 + $0x8] sm:$0xff] %v7646_v9  ;;  %v7642_v61 = vadd.f32 %v8206_v46, %v7545_v26  ;;  %v7636_v35 = vpop.f32.mrb[87].mxu1 }
 0x87a   : > { %7649 = vst [vmem:[%s218_s28] sm:$0xff] %v7645_v13  ;;  %v7637_v53 = vadd.f32 %v7636_v35, %v7540_v57 }
 0x87b   : > { %v7648_v20 = vadd.f32 %v7642_v61, %v12482_v4 }
 0x87c   : > { %v7647_v42 = vadd.f32 %v7637_v53, %v12471_v62 }
 0x87d   : > { %7652 = vst [vmem:[%s218_s28 + $0x18] sm:$0xff] %v7648_v20 }
 0x87e   : > { %7651 = vst [vmem:[%s218_s28 + $0x10] sm:$0xff] %v7647_v42 }
 0x87f   : > { %8555 = shalt.err (!%p8552_p7)
}
 0x880   : > { %s8556_s12 = scalar_lea.hbm %s12512_s6, 512  ;;  %s8560_s14 = scalar_lea.hbm %s12559_s4, 1024 }
 0x881   : > { %p8557_p8 = scmp.ne.s32.totalorder %s12512_s6, %s8556_s12  ;;  %p8561_p1 = scmp.lt.u32.totalorder %s12512_s6, %s12559_s4 }
 0x882   : > { %p8562_p0 = scmp.lt.u32.totalorder %s8560_s14, %s8556_s12  ;;  %p8564_p6 = scmp.lt.u32.totalorder %s8556_s12, %s12512_s6 }
 0x883   : > { %p8558_p11 = pnand %p8557_p8, %p13100_p9 }
 0x884   : > { %p8563_p5 = por %p8562_p0, %p8561_p1 }
 0x885   : > { %p8559_p13 = pneg %p8558_p11 }
 0x886   : > { %p8565_p10 = por %p8564_p6, %p8563_p5 }
 0x888   : > { %p8566_p12 = pnand %p8565_p10, %p8559_p13 }
 0x88a   : > { %8569 = shalt.err (!%p8566_p12)
}
 0x88b   : > { %s8625_s23 = smov 128   ;;  %s8626_s28 = smov 8  }
 0x88c   : > { %8308 = dma.vmem_to_hbm [thread:$0]  (%p13100_p9), %s12505_s30, 512, %s12512_s6, %s12514_s7, %s8625_s23, %s8625_s23, %s8626_s28  }
 0x88d PF: > { %p8320_p2 = scmp.ge.s32.totalorder %s8608_s18, 2  ;;  %s7682_s27 = sand.u32 1, %s8596_s15  }
 0x88e   : > { %p13101_p3 = scmp.ne.s32.totalorder %s12660_s26, 0  ;;  %s7683_s29 = scalar_lea.sflag [#allocation4], %s7682_s27 }
 0x890   : > { %p8315_p4 = pnand %p8320_p2, %p13101_p3 }
 0x892   : > { %8591 = dma.done.wait (!%p8315_p4), %s7683_s29, 512  }
 0x893   : > { %8593 = vsyncadd (!%p8315_p4), %s7683_s29, 4294966784  ;;  %p15_p7 = scmp.ge.s32.totalorder %s8677_s21, 4   ;;  %s13102_s15 = smov %s8600_s16 }
 0x894   : > { %s13103_s16 = smov %s8604_s17  ;;  %s13104_s17 = smov %s8688_s24 }
 0x895   : > { %s13105_s18 = smov %s8677_s21  ;;  %17 = sbr.rel (!%p15_p7) target bundleno = 4 (0x4), region = 79 }
 0x89c   :  { %7688 = vsyncpa [#allocation3], 1 }
 0x89d   :  { %7690 = vsyncpa [#allocation3 + $0x1], 1 }
 0x89e   :  { %7691 = vsyncpa [#allocation4], 1 }
 0x89f   :  { %7693 = vsyncpa [#allocation4 + $0x1], 1 }

</bundles_post_ra>
